<compile_context>
chip_gen: v5e
topology: v5e:2x2
jax: 0.10.0
libtpu: 0.0.40
codegen_flags: <defaults>
</compile_context>

<pallas_src>
import functools

import jax
import jax.numpy as jnp
from jax.experimental import pallas as pl
from jax.experimental.pallas import tpu as pltpu

# bf16 MXU operands (f32 accumulation is kept for every dot).  Flip to
# jnp.float32 only for bit-parity experiments.
MXU_DTYPE = jnp.bfloat16


# --------------------- kernel 1: GroupNorm + fused QKV ---------------------- #

def gn_qkv_kernel(x_ref, gamma_ref, beta_ref, gmat_ref, wqkv_ref, bqkv_ref,
                  q_ref, k_ref, v_ref, *, eps):
    x = x_ref[0].astype(jnp.float32)                     # (C, N), channel-major
    C = x.shape[0]

    # GroupNorm(32, eps): reduce-first statistics.  Lane-reduce to (C,1), then
    # a tiny (C,C)x(C,1) group-averaging matmul (replaces the old full
    # (C,C)x(C,N) matmuls).  Two-pass (centered) variance avoids
    # E[x^2] - E[x]^2 cancellation.
    sum_x = jnp.sum(x, axis=1, keepdims=True)                       # (C, 1)
    mean = jnp.dot(gmat_ref[...], sum_x,
                   preferred_element_type=jnp.float32)              # (C, 1)
    centered = x - mean
    sum_c2 = jnp.sum(centered * centered, axis=1, keepdims=True)    # (C, 1)
    var = jnp.dot(gmat_ref[...], sum_c2,
                  preferred_element_type=jnp.float32)               # (C, 1)
    h = centered * jax.lax.rsqrt(var + eps)
    h = h * gamma_ref[...] + beta_ref[...]                          # (C, N)

    # Fused q/k/v 1x1-conv projection: one (3C,C)x(C,N) MXU matmul, bf16
    # operands, f32 accumulation.  softmax scale C**-0.5 is pre-folded into
    # Wq / bq by the wrapper.
    qkv = jnp.dot(wqkv_ref[...], h.astype(MXU_DTYPE),
                  preferred_element_type=jnp.float32) + bqkv_ref[...]  # (3C, N)
    q_ref[0] = qkv[0 * C:1 * C, :].astype(q_ref.dtype)
    k_ref[0] = qkv[1 * C:2 * C, :].astype(k_ref.dtype)
    v_ref[0] = qkv[2 * C:3 * C, :].astype(v_ref.dtype)


# -------- kernel 2: flash attention + proj_out + residual (tiled) ----------- #

def flash_attn_proj_kernel(q_ref, k_ref, v_ref, x_ref, wo_ref, bo_ref, o_ref,
                           qt_ref, acc_ref, m_ref, l_ref):
    ki = pl.program_id(2)

    @pl.when(ki == 0)
    def _init():
        # One-off per-query-tile transpose so the QK matmul is MXU-native
        # ((tq,C)x(C,tk)); transpose in f32, then cast to the MXU operand
        # dtype.  Reused across all KV steps of this query tile.
        qt_ref[...] = q_ref[0].astype(jnp.float32).T.astype(qt_ref.dtype)
        m_ref[...] = jnp.full_like(m_ref, -jnp.inf)
        l_ref[...] = jnp.zeros_like(l_ref)
        acc_ref[...] = jnp.zeros_like(acc_ref)

    # scores for this (query tile, key tile); scale already folded into q.
    s = jnp.dot(qt_ref[...], k_ref[0],
                preferred_element_type=jnp.float32)                 # (tq, tk)

    m_prev = m_ref[...]
    m_new = jnp.maximum(m_prev, jnp.max(s, axis=-1, keepdims=True))  # (tq, 1)
    alpha = jnp.exp(m_prev - m_new)
    p = jnp.exp(s - m_new)                                           # (tq, tk)
    l_ref[...] = alpha * l_ref[...] + jnp.sum(p, axis=-1, keepdims=True)
    # PV in the MXU-native transposed-RHS form (contract the key axis of both
    # operands) -> token-major (tq, C) accumulator; alpha broadcasts along C.
    pv = jax.lax.dot_general(p.astype(MXU_DTYPE), v_ref[0],
                             (((1,), (1,)), ((), ())),
                             preferred_element_type=jnp.float32)     # (tq, C)
    acc_ref[...] = alpha * acc_ref[...] + pv
    m_ref[...] = m_new

    @pl.when(ki == pl.num_programs(2) - 1)
    def _finalize():
        # Deferred softmax normalization: C*tq multiplies instead of N^2.
        # Exact reciprocal (only tq values) per the parity concern.
        out_tok = acc_ref[...] * pl.reciprocal(l_ref[...], approx=False)  # (tq,C)
        attn_cm = out_tok.T.astype(MXU_DTYPE)                             # (C,tq)
        y = jnp.dot(wo_ref[...], attn_cm,
                    preferred_element_type=jnp.float32) + bo_ref[...]     # (C,tq)
        o_ref[0] = (x_ref[0].astype(jnp.float32) + y).astype(o_ref.dtype)


# ------------------------------- wrapper ------------------------------------ #

def _pick_tile(n, pref):
    """Largest multiple of 128 that divides n and is <= pref; else n (full)."""
    t = (min(pref, n) // 128) * 128
    while t >= 128:
        if n % t == 0:
            return t
        t -= 128
    return n


def spatial_self_attention(x, params, *, num_groups=32, eps=1e-6,
                           tq=128, tk=128):
    """x: (B, C, H, W) -> (B, C, H, W); matches SpatialSelfAttention.forward.

    tq/tk defaults exercise the multi-tile online-softmax path at toy sizes;
    at production sizes raise them (v7x ~256/256-512, v6e/v5e ~512+) — bigger
    tiles amortize per-grid-step overhead.
    """
    B, C, H, W = x.shape
    assert C % num_groups == 0
    N = H * W
    cg = C // num_groups

    x_cn = x.reshape(B, C, N)                  # free reshape, no transpose

    gamma = params["gn_g"].reshape(C, 1).astype(jnp.float32)
    beta = params["gn_b"].reshape(C, 1).astype(jnp.float32)

    # Group-averaging matrix, applied to the (C,1) reduced stats only.
    gid = jnp.arange(C) // cg
    gmat = (gid[:, None] == gid[None, :]).astype(jnp.float32) / float(cg * N)

    # conv1x1 weights are (C_out, C_in); fold softmax scale into the q branch
    # and fuse q/k/v into a single (3C, C) matrix.
    scale = float(C) ** (-0.5)
    wqkv = jnp.concatenate([params["w_q"] * scale, params["w_k"], params["w_v"]],
                           axis=0).astype(MXU_DTYPE)                  # (3C, C)
    bqkv = jnp.concatenate([params["b_q"] * scale, params["b_k"], params["b_v"]],
                           axis=0).reshape(3 * C, 1).astype(jnp.float32)
    wo = params["w_o"].astype(MXU_DTYPE)
    bo = params["b_o"].reshape(C, 1).astype(jnp.float32)

    def bcast(shape):
        return pl.BlockSpec(shape, lambda b: (0,) * len(shape))

    # -------------- call 1: GroupNorm + fused QKV (per batch) --------------- #
    qkv_flops = int(B * (2 * (3 * C) * C * N + 4 * C * C))
    q, k, v = pl.pallas_call(
        functools.partial(gn_qkv_kernel, eps=eps),
        out_shape=(jax.ShapeDtypeStruct((B, C, N), MXU_DTYPE),
                   jax.ShapeDtypeStruct((B, C, N), MXU_DTYPE),
                   jax.ShapeDtypeStruct((B, C, N), MXU_DTYPE)),
        grid=(B,),
        in_specs=[
            pl.BlockSpec((1, C, N), lambda b: (b, 0, 0)),   # x (per batch)
            bcast((C, 1)),                                  # gamma
            bcast((C, 1)),                                  # beta
            bcast((C, C)),                                  # group-average matrix
            bcast((3 * C, C)),                              # fused (scaled) Wqkv
            bcast((3 * C, 1)),                              # fused (scaled) bqkv
        ],
        out_specs=(pl.BlockSpec((1, C, N), lambda b: (b, 0, 0)),
                   pl.BlockSpec((1, C, N), lambda b: (b, 0, 0)),
                   pl.BlockSpec((1, C, N), lambda b: (b, 0, 0))),
        compiler_params=pltpu.CompilerParams(
            dimension_semantics=("parallel",),
            vmem_limit_bytes=64 * 1024 * 1024),
        cost_estimate=pl.CostEstimate(
            flops=qkv_flops,
            transcendentals=int(B * C),
            bytes_accessed=int(B * C * N * 4 + 3 * B * C * N * 2 + 3 * C * C * 2)),
    )(x_cn, gamma, beta, gmat, wqkv, bqkv)

    # ------- call 2: flash-style attention + proj_out + fused residual ------ #
    tq = _pick_tile(N, tq)
    tk = _pick_tile(N, tk)
    nq, nk = N // tq, N // tk

    attn_flops = int(B * (4 * C * N * N + 2 * C * C * N))
    out = pl.pallas_call(
        flash_attn_proj_kernel,
        out_shape=jax.ShapeDtypeStruct((B, C, N), x.dtype),
        grid=(B, nq, nk),
        in_specs=[
            pl.BlockSpec((1, C, tq), lambda b, qi, ki: (b, 0, qi)),   # q tile
            pl.BlockSpec((1, C, tk), lambda b, qi, ki: (b, 0, ki)),   # k tile
            pl.BlockSpec((1, C, tk), lambda b, qi, ki: (b, 0, ki)),   # v tile
            pl.BlockSpec((1, C, tq), lambda b, qi, ki: (b, 0, qi)),   # x (residual)
            pl.BlockSpec((C, C), lambda b, qi, ki: (0, 0)),           # Wo
            pl.BlockSpec((C, 1), lambda b, qi, ki: (0, 0)),           # bo
        ],
        out_specs=pl.BlockSpec((1, C, tq), lambda b, qi, ki: (b, 0, qi)),
        scratch_shapes=[
            pltpu.VMEM((tq, C), MXU_DTYPE),       # transposed q tile
            pltpu.VMEM((tq, C), jnp.float32),     # online-softmax accumulator
            pltpu.VMEM((tq, 1), jnp.float32),     # running max m
            pltpu.VMEM((tq, 1), jnp.float32),     # running sum l
        ],
        compiler_params=pltpu.CompilerParams(
            dimension_semantics=("parallel", "parallel", "arbitrary"),
            vmem_limit_bytes=64 * 1024 * 1024),
        cost_estimate=pl.CostEstimate(
            flops=attn_flops,
            transcendentals=int(B * N * N),
            bytes_accessed=int(3 * B * C * N * 2 + 2 * B * C * N * 4 + C * C * 2)),
    )(q, k, v, x_cn, wo, bo)
    return out.reshape(B, C, H, W)


# --------------------------- pure-JAX reference ----------------------------- #

def reference(x, params, *, num_groups=32, eps=1e-6):
    B, C, H, W = x.shape
    N = H * W
    xg = x.reshape(B, num_groups, (C // num_groups) * N)
    mean = xg.mean(axis=-1, keepdims=True)
    var = xg.var(axis=-1, keepdims=True)
    h = ((xg - mean) / jnp.sqrt(var + eps)).reshape(B, C, N)
    h = h * params["gn_g"][None, :, None] + params["gn_b"][None, :, None]

    def proj(w, b, t):
        return jnp.einsum('oc,bcn->bon', w, t) + b[None, :, None]

    q = proj(params["w_q"], params["b_q"], h)
    k = proj(params["w_k"], params["b_k"], h)
    v = proj(params["w_v"], params["b_v"], h)
    sim = jnp.einsum('bci,bcj->bij', q, k) * (C ** (-0.5))
    p = jax.nn.softmax(sim, axis=-1)
    out = jnp.einsum('bcj,bij->bci', v, p)
    y = proj(params["w_o"], params["b_o"], out)
    return (x.reshape(B, C, N) + y).reshape(B, C, H, W)


# ---------------------------------- main ------------------------------------ #

if __name__ == "__main__":
    # GroupNorm(num_groups=32) requires C % 32 == 0, so the smallest sensible
    # toy config uses C = 64 channels; spatial 16x16 -> N = 256 tokens, which
    # with tq = tk = 128 exercises the multi-tile online-softmax path.
    B, C, H, W = 2, 64, 16, 16

    key = jax.random.PRNGKey(0)
    ks = jax.random.split(key, 11)
    s = 0.05
    params = {
        "gn_g": 1.0 + 0.02 * jax.random.normal(ks[0], (C,), jnp.float32),
        "gn_b": 0.02 * jax.random.normal(ks[1], (C,), jnp.float32),
        "w_q": s * jax.random.normal(ks[2], (C, C), jnp.float32),
        "b_q": s * jax.random.normal(ks[3], (C,), jnp.float32),
        "w_k": s * jax.random.normal(ks[4], (C, C), jnp.float32),
        "b_k": s * jax.random.normal(ks[5], (C,), jnp.float32),
        "w_v": s * jax.random.normal(ks[6], (C, C), jnp.float32),
        "b_v": s * jax.random.normal(ks[7], (C,), jnp.float32),
        "w_o": s * jax.random.normal(ks[8], (C, C), jnp.float32),
        "b_o": s * jax.random.normal(ks[9], (C,), jnp.float32),
    }
    x = jax.random.normal(ks[10], (B, C, H, W), jnp.float32)

    fwd = jax.jit(spatial_self_attention)
    out = fwd(x, params)
    jax.block_until_ready(out)
    assert out.shape == (B, C, H, W) and out.dtype == jnp.float32

    ref = reference(x, params)
    max_err = float(jnp.max(jnp.abs(out - ref)))
    # Tolerance sized for bf16 MXU operands (rel ~2^-8) on O(1) activations;
    # accumulation is f32 and GroupNorm/softmax elementwise math stays f32.
    assert max_err < 5e-2, f"max abs err vs reference: {max_err}"

    print("KERNEL_OK")
</pallas_src>

<mosaic_0001>
module attributes {stable_mosaic.version = 11 : i64} {
  func.func @gn_qkv_kernel(%arg0: i32, %arg1: memref<1x64x256xf32, #tpu.memory_space<vmem>>, %arg2: memref<64x1xf32, #tpu.memory_space<vmem>>, %arg3: memref<64x1xf32, #tpu.memory_space<vmem>>, %arg4: memref<64x64xf32, #tpu.memory_space<vmem>>, %arg5: memref<192x64xbf16, #tpu.memory_space<vmem>>, %arg6: memref<192x1xf32, #tpu.memory_space<vmem>>, %arg7: memref<1x64x256xbf16, #tpu.memory_space<vmem>>, %arg8: memref<1x64x256xbf16, #tpu.memory_space<vmem>>, %arg9: memref<1x64x256xbf16, #tpu.memory_space<vmem>>) attributes {dimension_semantics = [#tpu.dimension_semantics<parallel>], iteration_bounds = array<i64: 2>, scalar_prefetch = 0 : i64, scratch_operands = 0 : i64, tpu.core_type = #tpu.core_type<tc>, window_params = [{transform_indices = @transform_0, window_bounds = array<i64: 1, 64, 256>}, {pipeline_mode = #tpu.pipeline_mode<synchronous>, transform_indices = @transform_1, window_bounds = array<i64: 64, 1>}, {pipeline_mode = #tpu.pipeline_mode<synchronous>, transform_indices = @transform_2, window_bounds = array<i64: 64, 1>}, {pipeline_mode = #tpu.pipeline_mode<synchronous>, transform_indices = @transform_3, window_bounds = array<i64: 64, 64>}, {pipeline_mode = #tpu.pipeline_mode<synchronous>, transform_indices = @transform_4, window_bounds = array<i64: 192, 64>}, {pipeline_mode = #tpu.pipeline_mode<synchronous>, transform_indices = @transform_5, window_bounds = array<i64: 192, 1>}, {transform_indices = @transform_6, window_bounds = array<i64: 1, 64, 256>}, {transform_indices = @transform_7, window_bounds = array<i64: 1, 64, 256>}, {transform_indices = @transform_8, window_bounds = array<i64: 1, 64, 256>}]} {
    %c0 = arith.constant 0 : index
    %c0_0 = arith.constant 0 : index
    %c0_1 = arith.constant 0 : index
    %0 = vector.load %arg1[%c0, %c0_0, %c0_1] : memref<1x64x256xf32, #tpu.memory_space<vmem>>, vector<1x64x256xf32>
    %1 = vector.shape_cast %0 : vector<1x64x256xf32> to vector<64x256xf32>
    %cst = arith.constant dense<0.000000e+00> : vector<64xf32>
    %2 = vector.multi_reduction <add>, %1, %cst [1] : vector<64x256xf32> to vector<64xf32>
    %3 = vector.shape_cast %2 : vector<64xf32> to vector<64x1xf32>
    %c0_2 = arith.constant 0 : index
    %c0_3 = arith.constant 0 : index
    %4 = vector.load %arg4[%c0_2, %c0_3] : memref<64x64xf32, #tpu.memory_space<vmem>>, vector<64x64xf32>
    %cst_4 = arith.constant dense<0.000000e+00> : vector<64x1xf32>
    %5 = tpu.matmul %4, %3, %cst_4 {dimension_numbers = #tpu.dot_dimension_numbers<[1], [0], [0], [1], [0, 0, 1, 1], [], []>} : vector<64x64xf32>, vector<64x1xf32>, vector<64x1xf32> -> vector<64x1xf32>
    %6 = vector.broadcast %5 : vector<64x1xf32> to vector<64x256xf32>
    %7 = arith.subf %1, %6 : vector<64x256xf32>
    %8 = arith.mulf %7, %7 : vector<64x256xf32>
    %cst_5 = arith.constant dense<0.000000e+00> : vector<64xf32>
    %9 = vector.multi_reduction <add>, %8, %cst_5 [1] : vector<64x256xf32> to vector<64xf32>
    %10 = vector.shape_cast %9 : vector<64xf32> to vector<64x1xf32>
    %c0_6 = arith.constant 0 : index
    %c0_7 = arith.constant 0 : index
    %11 = vector.load %arg4[%c0_6, %c0_7] : memref<64x64xf32, #tpu.memory_space<vmem>>, vector<64x64xf32>
    %cst_8 = arith.constant dense<0.000000e+00> : vector<64x1xf32>
    %12 = tpu.matmul %11, %10, %cst_8 {dimension_numbers = #tpu.dot_dimension_numbers<[1], [0], [0], [1], [0, 0, 1, 1], [], []>} : vector<64x64xf32>, vector<64x1xf32>, vector<64x1xf32> -> vector<64x1xf32>
    %cst_9 = arith.constant 9.99999997E-7 : f32
    %13 = vector.broadcast %cst_9 : f32 to vector<64x1xf32>
    %14 = arith.addf %12, %13 : vector<64x1xf32>
    %15 = math.rsqrt %14 : vector<64x1xf32>
    %16 = vector.broadcast %15 : vector<64x1xf32> to vector<64x256xf32>
    %17 = arith.mulf %7, %16 : vector<64x256xf32>
    %c0_10 = arith.constant 0 : index
    %c0_11 = arith.constant 0 : index
    %18 = vector.load %arg2[%c0_10, %c0_11] : memref<64x1xf32, #tpu.memory_space<vmem>>, vector<64x1xf32>
    %19 = vector.broadcast %18 : vector<64x1xf32> to vector<64x256xf32>
    %20 = arith.mulf %17, %19 : vector<64x256xf32>
    %c0_12 = arith.constant 0 : index
    %c0_13 = arith.constant 0 : index
    %21 = vector.load %arg3[%c0_12, %c0_13] : memref<64x1xf32, #tpu.memory_space<vmem>>, vector<64x1xf32>
    %22 = vector.broadcast %21 : vector<64x1xf32> to vector<64x256xf32>
    %23 = arith.addf %20, %22 : vector<64x256xf32>
    %c0_14 = arith.constant 0 : index
    %c0_15 = arith.constant 0 : index
    %24 = vector.load %arg5[%c0_14, %c0_15] : memref<192x64xbf16, #tpu.memory_space<vmem>>, vector<192x64xbf16>
    %25 = arith.truncf %23 : vector<64x256xf32> to vector<64x256xbf16>
    %cst_16 = arith.constant dense<0.000000e+00> : vector<192x256xf32>
    %26 = tpu.matmul %24, %25, %cst_16 {dimension_numbers = #tpu.dot_dimension_numbers<[1], [0], [0], [1], [0, 0, 1, 1], [], []>} : vector<192x64xbf16>, vector<64x256xbf16>, vector<192x256xf32> -> vector<192x256xf32>
    %c0_17 = arith.constant 0 : index
    %c0_18 = arith.constant 0 : index
    %27 = vector.load %arg6[%c0_17, %c0_18] : memref<192x1xf32, #tpu.memory_space<vmem>>, vector<192x1xf32>
    %28 = vector.broadcast %27 : vector<192x1xf32> to vector<192x256xf32>
    %29 = arith.addf %26, %28 : vector<192x256xf32>
    %30 = vector.extract_strided_slice %29 {offsets = [0, 0], sizes = [64, 256], strides = [1, 1]} : vector<192x256xf32> to vector<64x256xf32>
    %31 = arith.truncf %30 : vector<64x256xf32> to vector<64x256xbf16>
    %c0_19 = arith.constant 0 : index
    %c0_20 = arith.constant 0 : index
    %c0_21 = arith.constant 0 : index
    %32 = vector.load %arg7[%c0_19, %c0_20, %c0_21] : memref<1x64x256xbf16, #tpu.memory_space<vmem>>, vector<1x64x256xbf16>
    %33 = vector.shape_cast %32 : vector<1x64x256xbf16> to vector<64x256xbf16>
    %34 = vector.shape_cast %31 : vector<64x256xbf16> to vector<1x64x256xbf16>
    tpu.vector_store %arg7[%c0_19, %c0_20, %c0_21], %34 {strides = array<i32>} : memref<1x64x256xbf16, #tpu.memory_space<vmem>>, vector<1x64x256xbf16>,
    %35 = vector.extract_strided_slice %29 {offsets = [64, 0], sizes = [64, 256], strides = [1, 1]} : vector<192x256xf32> to vector<64x256xf32>
    %36 = arith.truncf %35 : vector<64x256xf32> to vector<64x256xbf16>
    %c0_22 = arith.constant 0 : index
    %c0_23 = arith.constant 0 : index
    %c0_24 = arith.constant 0 : index
    %37 = vector.load %arg8[%c0_22, %c0_23, %c0_24] : memref<1x64x256xbf16, #tpu.memory_space<vmem>>, vector<1x64x256xbf16>
    %38 = vector.shape_cast %37 : vector<1x64x256xbf16> to vector<64x256xbf16>
    %39 = vector.shape_cast %36 : vector<64x256xbf16> to vector<1x64x256xbf16>
    tpu.vector_store %arg8[%c0_22, %c0_23, %c0_24], %39 {strides = array<i32>} : memref<1x64x256xbf16, #tpu.memory_space<vmem>>, vector<1x64x256xbf16>,
    %40 = vector.extract_strided_slice %29 {offsets = [128, 0], sizes = [64, 256], strides = [1, 1]} : vector<192x256xf32> to vector<64x256xf32>
    %41 = arith.truncf %40 : vector<64x256xf32> to vector<64x256xbf16>
    %c0_25 = arith.constant 0 : index
    %c0_26 = arith.constant 0 : index
    %c0_27 = arith.constant 0 : index
    %42 = vector.load %arg9[%c0_25, %c0_26, %c0_27] : memref<1x64x256xbf16, #tpu.memory_space<vmem>>, vector<1x64x256xbf16>
    %43 = vector.shape_cast %42 : vector<1x64x256xbf16> to vector<64x256xbf16>
    %44 = vector.shape_cast %41 : vector<64x256xbf16> to vector<1x64x256xbf16>
    tpu.vector_store %arg9[%c0_25, %c0_26, %c0_27], %44 {strides = array<i32>} : memref<1x64x256xbf16, #tpu.memory_space<vmem>>, vector<1x64x256xbf16>,
    return
  }
  func.func @transform_0(%arg0: i32) -> (i32, i32, i32) {
    %c0_i32 = arith.constant 0 : i32
    %c0_i32_0 = arith.constant 0 : i32
    %c0_i32_1 = arith.constant 0 : i32
    return %arg0, %c0_i32, %c0_i32_0 : i32, i32, i32
  }
  func.func @transform_1(%arg0: i32) -> (i32, i32) {
    %c0_i32 = arith.constant 0 : i32
    %c0_i32_0 = arith.constant 0 : i32
    %c0_i32_1 = arith.constant 0 : i32
    return %c0_i32, %c0_i32_0 : i32, i32
  }
  func.func @transform_2(%arg0: i32) -> (i32, i32) {
    %c0_i32 = arith.constant 0 : i32
    %c0_i32_0 = arith.constant 0 : i32
    %c0_i32_1 = arith.constant 0 : i32
    return %c0_i32, %c0_i32_0 : i32, i32
  }
  func.func @transform_3(%arg0: i32) -> (i32, i32) {
    %c0_i32 = arith.constant 0 : i32
    %c0_i32_0 = arith.constant 0 : i32
    %c0_i32_1 = arith.constant 0 : i32
    return %c0_i32, %c0_i32_0 : i32, i32
  }
  func.func @transform_4(%arg0: i32) -> (i32, i32) {
    %c0_i32 = arith.constant 0 : i32
    %c0_i32_0 = arith.constant 0 : i32
    %c0_i32_1 = arith.constant 0 : i32
    return %c0_i32, %c0_i32_0 : i32, i32
  }
  func.func @transform_5(%arg0: i32) -> (i32, i32) {
    %c0_i32 = arith.constant 0 : i32
    %c0_i32_0 = arith.constant 0 : i32
    %c0_i32_1 = arith.constant 0 : i32
    return %c0_i32, %c0_i32_0 : i32, i32
  }
  func.func @transform_6(%arg0: i32) -> (i32, i32, i32) {
    %c0_i32 = arith.constant 0 : i32
    %c0_i32_0 = arith.constant 0 : i32
    %c0_i32_1 = arith.constant 0 : i32
    return %arg0, %c0_i32, %c0_i32_0 : i32, i32, i32
  }
  func.func @transform_7(%arg0: i32) -> (i32, i32, i32) {
    %c0_i32 = arith.constant 0 : i32
    %c0_i32_0 = arith.constant 0 : i32
    %c0_i32_1 = arith.constant 0 : i32
    return %arg0, %c0_i32, %c0_i32_0 : i32, i32, i32
  }
  func.func @transform_8(%arg0: i32) -> (i32, i32, i32) {
    %c0_i32 = arith.constant 0 : i32
    %c0_i32_0 = arith.constant 0 : i32
    %c0_i32_1 = arith.constant 0 : i32
    return %arg0, %c0_i32, %c0_i32_0 : i32, i32, i32
  }
}

module attributes {stable_mosaic.version = 11 : i64} {
  func.func @flash_attn_proj_kernel(%arg0: i32, %arg1: i32, %arg2: i32, %arg3: memref<1x64x128xbf16, #tpu.memory_space<vmem>>, %arg4: memref<1x64x128xbf16, #tpu.memory_space<vmem>>, %arg5: memref<1x64x128xbf16, #tpu.memory_space<vmem>>, %arg6: memref<1x64x128xf32, #tpu.memory_space<vmem>>, %arg7: memref<64x64xbf16, #tpu.memory_space<vmem>>, %arg8: memref<64x1xf32, #tpu.memory_space<vmem>>, %arg9: memref<1x64x128xf32, #tpu.memory_space<vmem>>, %arg10: memref<128x64xbf16, #tpu.memory_space<vmem>>, %arg11: memref<128x64xf32, #tpu.memory_space<vmem>>, %arg12: memref<128x1xf32, #tpu.memory_space<vmem>>, %arg13: memref<128x1xf32, #tpu.memory_space<vmem>>) attributes {dimension_semantics = [#tpu.dimension_semantics<parallel>, #tpu.dimension_semantics<parallel>, #tpu.dimension_semantics<arbitrary>], iteration_bounds = array<i64: 2, 2, 2>, scalar_prefetch = 0 : i64, scratch_operands = 4 : i64, tpu.core_type = #tpu.core_type<tc>, window_params = [{transform_indices = @transform_0, window_bounds = array<i64: 1, 64, 128>}, {transform_indices = @transform_1, window_bounds = array<i64: 1, 64, 128>}, {transform_indices = @transform_2, window_bounds = array<i64: 1, 64, 128>}, {transform_indices = @transform_3, window_bounds = array<i64: 1, 64, 128>}, {pipeline_mode = #tpu.pipeline_mode<synchronous>, transform_indices = @transform_4, window_bounds = array<i64: 64, 64>}, {pipeline_mode = #tpu.pipeline_mode<synchronous>, transform_indices = @transform_5, window_bounds = array<i64: 64, 1>}, {transform_indices = @transform_6, window_bounds = array<i64: 1, 64, 128>}]} {
    %c0_i32 = arith.constant 0 : i32
    %0 = arith.cmpi eq, %arg2, %c0_i32 : i32
    %1 = arith.extui %0 : i1 to i32
    %c0_i32_0 = arith.constant 0 : i32
    %2 = arith.cmpi ne, %1, %c0_i32_0 : i32
    scf.if %2 {
      %c0_24 = arith.constant 0 : index
      %c0_25 = arith.constant 0 : index
      %c0_26 = arith.constant 0 : index
      %35 = vector.load %arg3[%c0_24, %c0_25, %c0_26] : memref<1x64x128xbf16, #tpu.memory_space<vmem>>, vector<1x64x128xbf16>
      %36 = vector.shape_cast %35 : vector<1x64x128xbf16> to vector<64x128xbf16>
      %37 = arith.extf %36 : vector<64x128xbf16> to vector<64x128xf32>
      %38 = tpu.transpose %37, [1, 0] : vector<64x128xf32> -> vector<128x64xf32>
      %39 = arith.truncf %38 : vector<128x64xf32> to vector<128x64xbf16>
      %c0_27 = arith.constant 0 : index
      %c0_28 = arith.constant 0 : index
      %40 = vector.load %arg10[%c0_27, %c0_28] : memref<128x64xbf16, #tpu.memory_space<vmem>>, vector<128x64xbf16>
      tpu.vector_store %arg10[%c0_27, %c0_28], %39 {strides = array<i32>} : memref<128x64xbf16, #tpu.memory_space<vmem>>, vector<128x64xbf16>,
      %cst_29 = arith.constant 0xFF800000 : f32
      %41 = vector.broadcast %cst_29 : f32 to vector<128x1xf32>
      %c0_30 = arith.constant 0 : index
      %c0_31 = arith.constant 0 : index
      %42 = vector.load %arg12[%c0_30, %c0_31] : memref<128x1xf32, #tpu.memory_space<vmem>>, vector<128x1xf32>
      tpu.vector_store %arg12[%c0_30, %c0_31], %41 {strides = array<i32>} : memref<128x1xf32, #tpu.memory_space<vmem>>, vector<128x1xf32>,
      %cst_32 = arith.constant 0.000000e+00 : f32
      %43 = vector.broadcast %cst_32 : f32 to vector<128x1xf32>
      %c0_33 = arith.constant 0 : index
      %c0_34 = arith.constant 0 : index
      %44 = vector.load %arg13[%c0_33, %c0_34] : memref<128x1xf32, #tpu.memory_space<vmem>>, vector<128x1xf32>
      tpu.vector_store %arg13[%c0_33, %c0_34], %43 {strides = array<i32>} : memref<128x1xf32, #tpu.memory_space<vmem>>, vector<128x1xf32>,
      %cst_35 = arith.constant 0.000000e+00 : f32
      %45 = vector.broadcast %cst_35 : f32 to vector<128x64xf32>
      %c0_36 = arith.constant 0 : index
      %c0_37 = arith.constant 0 : index
      %46 = vector.load %arg11[%c0_36, %c0_37] : memref<128x64xf32, #tpu.memory_space<vmem>>, vector<128x64xf32>
      tpu.vector_store %arg11[%c0_36, %c0_37], %45 {strides = array<i32>} : memref<128x64xf32, #tpu.memory_space<vmem>>, vector<128x64xf32>,
    } else {
    }
    %c0 = arith.constant 0 : index
    %c0_1 = arith.constant 0 : index
    %3 = vector.load %arg10[%c0, %c0_1] : memref<128x64xbf16, #tpu.memory_space<vmem>>, vector<128x64xbf16>
    %c0_2 = arith.constant 0 : index
    %c0_3 = arith.constant 0 : index
    %c0_4 = arith.constant 0 : index
    %4 = vector.load %arg4[%c0_2, %c0_3, %c0_4] : memref<1x64x128xbf16, #tpu.memory_space<vmem>>, vector<1x64x128xbf16>
    %5 = vector.shape_cast %4 : vector<1x64x128xbf16> to vector<64x128xbf16>
    %cst = arith.constant dense<0.000000e+00> : vector<128x128xf32>
    %6 = tpu.matmul %3, %5, %cst {dimension_numbers = #tpu.dot_dimension_numbers<[1], [0], [0], [1], [0, 0, 1, 1], [], []>} : vector<128x64xbf16>, vector<64x128xbf16>, vector<128x128xf32> -> vector<128x128xf32>
    %c0_5 = arith.constant 0 : index
    %c0_6 = arith.constant 0 : index
    %7 = vector.load %arg12[%c0_5, %c0_6] : memref<128x1xf32, #tpu.memory_space<vmem>>, vector<128x1xf32>
    %cst_7 = arith.constant dense<0xFF800000> : vector<128xf32>
    %8 = vector.multi_reduction <maximumf>, %6, %cst_7 [1] : vector<128x128xf32> to vector<128xf32>
    %9 = vector.shape_cast %8 : vector<128xf32> to vector<128x1xf32>
    %10 = arith.maximumf %7, %9 : vector<128x1xf32>
    %11 = arith.subf %7, %10 : vector<128x1xf32>
    %12 = math.exp %11 : vector<128x1xf32>
    %13 = vector.broadcast %10 : vector<128x1xf32> to vector<128x128xf32>
    %14 = arith.subf %6, %13 : vector<128x128xf32>
    %15 = math.exp %14 : vector<128x128xf32>
    %c0_8 = arith.constant 0 : index
    %c0_9 = arith.constant 0 : index
    %16 = vector.load %arg13[%c0_8, %c0_9] : memref<128x1xf32, #tpu.memory_space<vmem>>, vector<128x1xf32>
    %17 = arith.mulf %12, %16 : vector<128x1xf32>
    %cst_10 = arith.constant dense<0.000000e+00> : vector<128xf32>
    %18 = vector.multi_reduction <add>, %15, %cst_10 [1] : vector<128x128xf32> to vector<128xf32>
    %19 = vector.shape_cast %18 : vector<128xf32> to vector<128x1xf32>
    %20 = arith.addf %17, %19 : vector<128x1xf32>
    %c0_11 = arith.constant 0 : index
    %c0_12 = arith.constant 0 : index
    %21 = vector.load %arg13[%c0_11, %c0_12] : memref<128x1xf32, #tpu.memory_space<vmem>>, vector<128x1xf32>
    tpu.vector_store %arg13[%c0_11, %c0_12], %20 {strides = array<i32>} : memref<128x1xf32, #tpu.memory_space<vmem>>, vector<128x1xf32>,
    %22 = arith.truncf %15 : vector<128x128xf32> to vector<128x128xbf16>
    %c0_13 = arith.constant 0 : index
    %c0_14 = arith.constant 0 : index
    %c0_15 = arith.constant 0 : index
    %23 = vector.load %arg5[%c0_13, %c0_14, %c0_15] : memref<1x64x128xbf16, #tpu.memory_space<vmem>>, vector<1x64x128xbf16>
    %24 = vector.shape_cast %23 : vector<1x64x128xbf16> to vector<64x128xbf16>
    %cst_16 = arith.constant dense<0.000000e+00> : vector<128x64xf32>
    %25 = tpu.matmul %22, %24, %cst_16 {dimension_numbers = #tpu.dot_dimension_numbers<[1], [1], [0], [0], [0, 0, 1, 0], [], []>} : vector<128x128xbf16>, vector<64x128xbf16>, vector<128x64xf32> -> vector<128x64xf32>
    %c0_17 = arith.constant 0 : index
    %c0_18 = arith.constant 0 : index
    %26 = vector.load %arg11[%c0_17, %c0_18] : memref<128x64xf32, #tpu.memory_space<vmem>>, vector<128x64xf32>
    %27 = vector.broadcast %12 : vector<128x1xf32> to vector<128x64xf32>
    %28 = arith.mulf %27, %26 : vector<128x64xf32>
    %29 = arith.addf %28, %25 : vector<128x64xf32>
    %c0_19 = arith.constant 0 : index
    %c0_20 = arith.constant 0 : index
    %30 = vector.load %arg11[%c0_19, %c0_20] : memref<128x64xf32, #tpu.memory_space<vmem>>, vector<128x64xf32>
    tpu.vector_store %arg11[%c0_19, %c0_20], %29 {strides = array<i32>} : memref<128x64xf32, #tpu.memory_space<vmem>>, vector<128x64xf32>,
    %c0_21 = arith.constant 0 : index
    %c0_22 = arith.constant 0 : index
    %31 = vector.load %arg12[%c0_21, %c0_22] : memref<128x1xf32, #tpu.memory_space<vmem>>, vector<128x1xf32>
    tpu.vector_store %arg12[%c0_21, %c0_22], %10 {strides = array<i32>} : memref<128x1xf32, #tpu.memory_space<vmem>>, vector<128x1xf32>,
    %c1_i32 = arith.constant 1 : i32
    %32 = arith.cmpi eq, %arg2, %c1_i32 : i32
    %33 = arith.extui %32 : i1 to i32
    %c0_i32_23 = arith.constant 0 : i32
    %34 = arith.cmpi ne, %33, %c0_i32_23 : i32
    scf.if %34 {
      %c0_24 = arith.constant 0 : index
      %c0_25 = arith.constant 0 : index
      %35 = vector.load %arg11[%c0_24, %c0_25] : memref<128x64xf32, #tpu.memory_space<vmem>>, vector<128x64xf32>
      %c0_26 = arith.constant 0 : index
      %c0_27 = arith.constant 0 : index
      %36 = vector.load %arg13[%c0_26, %c0_27] : memref<128x1xf32, #tpu.memory_space<vmem>>, vector<128x1xf32>
      %37 = tpu.reciprocal %36 : vector<128x1xf32> -> vector<128x1xf32>
      %38 = vector.broadcast %37 : vector<128x1xf32> to vector<128x64xf32>
      %39 = arith.mulf %35, %38 : vector<128x64xf32>
      %40 = tpu.transpose %39, [1, 0] : vector<128x64xf32> -> vector<64x128xf32>
      %41 = arith.truncf %40 : vector<64x128xf32> to vector<64x128xbf16>
      %c0_28 = arith.constant 0 : index
      %c0_29 = arith.constant 0 : index
      %42 = vector.load %arg7[%c0_28, %c0_29] : memref<64x64xbf16, #tpu.memory_space<vmem>>, vector<64x64xbf16>
      %cst_30 = arith.constant dense<0.000000e+00> : vector<64x128xf32>
      %43 = tpu.matmul %42, %41, %cst_30 {dimension_numbers = #tpu.dot_dimension_numbers<[1], [0], [0], [1], [0, 0, 1, 1], [], []>} : vector<64x64xbf16>, vector<64x128xbf16>, vector<64x128xf32> -> vector<64x128xf32>
      %c0_31 = arith.constant 0 : index
      %c0_32 = arith.constant 0 : index
      %44 = vector.load %arg8[%c0_31, %c0_32] : memref<64x1xf32, #tpu.memory_space<vmem>>, vector<64x1xf32>
      %45 = vector.broadcast %44 : vector<64x1xf32> to vector<64x128xf32>
      %46 = arith.addf %43, %45 : vector<64x128xf32>
      %c0_33 = arith.constant 0 : index
      %c0_34 = arith.constant 0 : index
      %c0_35 = arith.constant 0 : index
      %47 = vector.load %arg6[%c0_33, %c0_34, %c0_35] : memref<1x64x128xf32, #tpu.memory_space<vmem>>, vector<1x64x128xf32>
      %48 = vector.shape_cast %47 : vector<1x64x128xf32> to vector<64x128xf32>
      %49 = arith.addf %48, %46 : vector<64x128xf32>
      %c0_36 = arith.constant 0 : index
      %c0_37 = arith.constant 0 : index
      %c0_38 = arith.constant 0 : index
      %50 = vector.load %arg9[%c0_36, %c0_37, %c0_38] : memref<1x64x128xf32, #tpu.memory_space<vmem>>, vector<1x64x128xf32>
      %51 = vector.shape_cast %50 : vector<1x64x128xf32> to vector<64x128xf32>
      %52 = vector.shape_cast %49 : vector<64x128xf32> to vector<1x64x128xf32>
      tpu.vector_store %arg9[%c0_36, %c0_37, %c0_38], %52 {strides = array<i32>} : memref<1x64x128xf32, #tpu.memory_space<vmem>>, vector<1x64x128xf32>,
    } else {
    }
    return
  }
  func.func @transform_0(%arg0: i32, %arg1: i32, %arg2: i32) -> (i32, i32, i32) {
    %c0_i32 = arith.constant 0 : i32
    %c0_i32_0 = arith.constant 0 : i32
    return %arg0, %c0_i32, %arg1 : i32, i32, i32
  }
  func.func @transform_1(%arg0: i32, %arg1: i32, %arg2: i32) -> (i32, i32, i32) {
    %c0_i32 = arith.constant 0 : i32
    %c0_i32_0 = arith.constant 0 : i32
    return %arg0, %c0_i32, %arg2 : i32, i32, i32
  }
  func.func @transform_2(%arg0: i32, %arg1: i32, %arg2: i32) -> (i32, i32, i32) {
    %c0_i32 = arith.constant 0 : i32
    %c0_i32_0 = arith.constant 0 : i32
    return %arg0, %c0_i32, %arg2 : i32, i32, i32
  }
  func.func @transform_3(%arg0: i32, %arg1: i32, %arg2: i32) -> (i32, i32, i32) {
    %c0_i32 = arith.constant 0 : i32
    %c0_i32_0 = arith.constant 0 : i32
    return %arg0, %c0_i32, %arg1 : i32, i32, i32
  }
  func.func @transform_4(%arg0: i32, %arg1: i32, %arg2: i32) -> (i32, i32) {
    %c0_i32 = arith.constant 0 : i32
    %c0_i32_0 = arith.constant 0 : i32
    %c0_i32_1 = arith.constant 0 : i32
    return %c0_i32, %c0_i32_0 : i32, i32
  }
  func.func @transform_5(%arg0: i32, %arg1: i32, %arg2: i32) -> (i32, i32) {
    %c0_i32 = arith.constant 0 : i32
    %c0_i32_0 = arith.constant 0 : i32
    %c0_i32_1 = arith.constant 0 : i32
    return %c0_i32, %c0_i32_0 : i32, i32
  }
  func.func @transform_6(%arg0: i32, %arg1: i32, %arg2: i32) -> (i32, i32, i32) {
    %c0_i32 = arith.constant 0 : i32
    %c0_i32_0 = arith.constant 0 : i32
    return %arg0, %c0_i32, %arg1 : i32, i32, i32
  }
}

</mosaic_0001>

<bundles_post_ra>
// kernel: spatial_self_attention.2
= control target key start
LH: loop header
LB: loop body
LE: loop exit
PB: predicated region body
PF: predicated region fallthrough
CT: control target
= control target key end

     0   :  { %s1635_s27 = smov 0   ;;  %s2109_s0 = inlined_call_operand.vmem [shape: f32[2,64,256], index: 0, kind: input, shape index: {}]   ;;  %s2110_s1 = inlined_call_operand.vmem [shape: f32[64,1], index: 1, kind: input, shape index: {}]   ;;  %s2111_s2 = inlined_call_operand.vmem [shape: f32[64,1], index: 2, kind: input, shape index: {}]   ;;  %s2112_s3 = inlined_call_operand.vmem [shape: f32[64,64], index: 3, kind: input, shape index: {}]   ;;  %s2113_s4 = inlined_call_operand.vmem [shape: bf16[192,64], index: 4, kind: input, shape index: {}]   ;;  %s2114_s5 = inlined_call_operand.vmem [shape: f32[192,1], index: 5, kind: input, shape index: {}]   ;;  %s2115_s6 = inlined_call_operand.vmem [shape: bf16[2,64,256], index: 6, kind: output, shape index: {0}]   ;;  %s2116_s7 = inlined_call_operand.vmem [shape: bf16[2,64,256], index: 7, kind: output, shape index: {1}]   ;;  %s2117_s8 = inlined_call_operand.vmem [shape: bf16[2,64,256], index: 8, kind: output, shape index: {2}]  }
   0x1 LB: > { %s1426_s28 = sadd.s32 4294967295, %s1587_s27   ;;  %p1430_p0 = scmp.ge.s32.totalorder %s1587_s27, 1  ;;  %s1587_s27 = sphi %s1635_s27, %s19_s27  }
   0x2   : > { %p267_p1 = scmp.lt.s32.totalorder %s1587_s27, 3 }
   0x4   : > { %p268_p2 = pnand %p1430_p0, %p267_p1 }
   0x5   : > { %p311_p3 = scmp.lt.s32.totalorder (!%p268_p2), %s1426_s28, 1 }
   0x6   : > { %271 = sbr.rel (%p268_p2) target bundleno = 1176 (0x498), region = 44 }
   0xb   : > { %s2119_s28 = smov (!%p311_p3, %s1426_s28), 1  ;;  %v1700_v32 = vld [vmem:[%s2112_s3] sm:$0xff]  ;;  %vm380_vm0 = vcmask 523264   ;;  %v1707_v33 = vld [vmem:[%s2112_s3 + $0x8] sm:$0xff]  ;;  %v1714_v34 = vld [vmem:[%s2112_s3 + $0x10] sm:$0xff]  ;;  %v1589_v40 = vmov 0  }
   0xc   : > { %s1529_s29 = sshll.u32 %s2119_s28, 7  ;;  %v1721_v35 = vld [vmem:[%s2112_s3 + $0x18] sm:$0xff]  ;;  %v1728_v36 = vld [vmem:[%s2112_s3 + $0x20] sm:$0xff]  ;;  %v1735_v37 = vld [vmem:[%s2112_s3 + $0x28] sm:$0xff]  ;;  %1564 = vset.pattern.permute.xlu2 %v1589_v40  ;;  %1563 = vset.pattern.permute.xlu1 %v1589_v40  ;;  %s2052_s11 = sshll.u32 %s2119_s28, 6 }
   0xd   : > { %s315_s10 = scalar_lea.vmem %s2109_s0, %s1529_s29  ;;  %v1742_v38 = vld [vmem:[%s2112_s3 + $0x30] sm:$0xff]  ;;  %v1749_v39 = vld [vmem:[%s2112_s3 + $0x38] sm:$0xff]  ;;  %1562 = vset.pattern.permute.xlu0 %v1589_v40  ;;  %s2058_s14 = scalar_lea.vmem %s2115_s6, %s2052_s11 }
   0xe   : > { %v1649_v0 = vld [vmem:[%s315_s10 + $0x70] sm:$0xff]  ;;  %v1651_v1 = vld [vmem:[%s315_s10 + $0x78] sm:$0xff]  ;;  %v1667_v9 = vld [vmem:[%s315_s10 + $0x60] sm:$0xff]  ;;  %s2067_s16 = scalar_lea.vmem %s2116_s7, %s2052_s11  ;;  %s2096_s19 = scalar_lea.vmem %s2117_s8, %s2052_s11 }
   0xf   : > { %v1653_v2 = vld [vmem:[%s315_s10 + $0x50] sm:$0xff]  ;;  %v369_v3 = vadd.f32 %v1651_v1, %v1649_v0  ;;  %v1657_v4 = vld [vmem:[%s315_s10 + $0x58] sm:$0xff]  ;;  %v1669_v10 = vld [vmem:[%s315_s10 + $0x68] sm:$0xff] }
  0x10   : > { %v363_v5 = vadd.f32 %v1657_v4, %v1653_v2  ;;  %v1661_v6 = vld [vmem:[%s315_s10 + $0x30] sm:$0xff]  ;;  %v1663_v7 = vld [vmem:[%s315_s10 + $0x38] sm:$0xff]  ;;  %v1671_v11 = vld [vmem:[%s315_s10 + $0x40] sm:$0xff]  ;;  %v366_v15 = vadd.f32 %v1669_v10, %v1667_v9 }
  0x11   : > { %370 = vadd.xlane.f32.xlu0 %v369_v3  ;;  %v357_v8 = vadd.f32 %v1663_v7, %v1661_v6  ;;  %v1673_v12 = vld [vmem:[%s315_s10 + $0x48] sm:$0xff]  ;;  %v1675_v13 = vld [vmem:[%s315_s10 + $0x20] sm:$0xff]  ;;  %v1685_v18 = vld [vmem:[%s315_s10 + $0x10] sm:$0xff] }
  0x12   : > { %364 = vadd.xlane.f32.xlu1 %v363_v5  ;;  %v1677_v14 = vld [vmem:[%s315_s10 + $0x28] sm:$0xff]  ;;  %v360_v16 = vadd.f32 %v1673_v12, %v1671_v11  ;;  %v1687_v19 = vld [vmem:[%s315_s10 + $0x18] sm:$0xff]  ;;  %v1689_v20 = vld [vmem:[%s315_s10] sm:$0xff] }
  0x13   : > { %358 = vadd.xlane.f32.xlu2 %v357_v8  ;;  %v354_v17 = vadd.f32 %v1677_v14, %v1675_v13  ;;  %v1691_v21 = vld [vmem:[%s315_s10 + $0x8] sm:$0xff]  ;;  %v351_v22 = vadd.f32 %v1687_v19, %v1685_v18 }
  0x14   : > { %v348_v23 = vadd.f32 %v1691_v21, %v1689_v20 }
  0x19   : > { %367 = vadd.xlane.f32.xlu0 %v366_v15 }
  0x1a   : > { %361 = vadd.xlane.f32.xlu1 %v360_v16 }
  0x1b   : > { %355 = vadd.xlane.f32.xlu2 %v354_v17 }
  0x21   : > { %352 = vadd.xlane.f32.xlu0 %v351_v22 }
  0x22   : > { %349 = vadd.xlane.f32.xlu1 %v348_v23 }
  0x84   : > { %v371_v24 = vpop.xlane.xlu0 %370 }
  0x85   : > { %413 = vmatpush.msra.mxu0 %v371_v24  ;;  %v365_v25 = vpop.xlane.xlu1 %364 }
  0x86   : > { %v359_v26 = vpop.xlane.xlu2 %358 }
  0x8c   : > { %v368_v27 = vpop.xlane.xlu0 %367 }
  0x8d   : > { %414 = vmatpush.msra.mxu0 %v368_v27  ;;  %v362_v28 = vpop.xlane.xlu1 %361 }
  0x8e   : > { %v356_v29 = vpop.xlane.xlu2 %355 }
  0x8f   : > { %415 = vmatpush.msra.mxu0 %v365_v25 }
  0x91   : > { %416 = vmatpush.msra.mxu0 %v362_v28 }
  0x93   : > { %417 = vmatpush.msra.mxu0 %v359_v26 }
  0x94   : > { %v353_v30 = vpop.xlane.xlu0 %352 }
  0x95   : > { %418 = vmatpush.msra.mxu0 %v356_v29  ;;  %v350_v31 = vpop.xlane.xlu1 %349 }
  0x97   : > { %419 = vmatpush.msra.mxu0 %v353_v30 }
  0x99   : > { %420 = vmatpush.msra.mxu0 %v350_v31 }
  0x9a   : > { %1439 = vmatmul.msk.f32.vlgmr.msra.gmra.mxu0 %vm380_vm0, %v1700_v32 }
  0xa2   : > { %1440 = vmatmul.msk.f32.gmra.mxu0 %vm380_vm0, %v1707_v33 }
  0xaa   : > { %1441 = vmatmul.msk.f32.gmra.mxu0 %vm380_vm0, %v1714_v34 }
  0xb2   : > { %1442 = vmatmul.msk.f32.gmra.mxu0 %vm380_vm0, %v1721_v35 }
  0xba   : > { %1443 = vmatmul.msk.f32.gmra.mxu0 %vm380_vm0, %v1728_v36 }
  0xc2   : > { %1444 = vmatmul.msk.f32.gmra.mxu0 %vm380_vm0, %v1735_v37 }
  0xca   : > { %1445 = vmatmul.msk.f32.gmra.mxu0 %vm380_vm0, %v1742_v38 }
  0xd2   : > { %1446 = vmatmul.msk.f32.gmra.mxu0 %vm380_vm0, %v1749_v39 }
 0x117   : > { %v422_v41 = vpop.f32.mrf.mxu0 }
 0x11f   : > { %v425_v42 = vpop.f32.mrf.mxu0 }
 0x127   : > { %v428_v43 = vpop.f32.mrf.mxu0 }
 0x12f   : > { %v431_v44 = vpop.f32.mrf.mxu0 }
 0x137   : > { %v434_v45 = vpop.f32.mrf.mxu0 }
 0x138   : > { %468 = vperm.xlu2 %1564, %v434_v45   ;;  %v723_v45 = vld [vmem:[%s2110_s1 + $0x20] sm:$0xff] }
 0x13f   : > { %v437_v46 = vpop.f32.mrf.mxu0 }
 0x140   : > { %473 = vperm.xlu1 %1563, %v437_v46   ;;  %v724_v46 = vld [vmem:[%s2110_s1 + $0x28] sm:$0xff] }
 0x147   : > { %v440_v47 = vpop.f32.mrf.mxu0 }
 0x148   : > { %458 = vperm.xlu1 %1563, %v428_v43   ;;  %478 = vperm.xlu0 %1562, %v440_v47   ;;  %v789_v43 = vld [vmem:[%s2111_s2 + $0x30] sm:$0xff]  ;;  %v788_v47 = vld [vmem:[%s2111_s2 + $0x28] sm:$0xff] }
 0x14f   : > { %v443_v48 = vpop.f32.mrf.mxu0 }
 0x150   : > { %448 = vperm.xlu1 %1563, %v422_v41   ;;  %483 = vperm.xlu2 %1564, %v443_v48   ;;  %v721_v48 = vld [vmem:[%s2110_s1 + $0x10] sm:$0xff] }
 0x158   : > { %463 = vperm.xlu2 %1564, %v431_v44   ;;  %v790_v44 = vld [vmem:[%s2111_s2 + $0x38] sm:$0xff] }
 0x160   : > { %453 = vperm.xlu2 %1564, %v425_v42  }
 0x192   : > { %v469_v49 = vpop.permute.xlu2 %468 }
 0x1aa   : > { %v484_v50 = vpop.permute.xlu2 %483 }
 0x1ab   : > { %v1754_v51 = vsub.f32 %v1649_v0, %v484_v50  ;;  %v1757_v52 = vsub.f32 %v1651_v1, %v484_v50  ;;  %v722_v50 = vld [vmem:[%s2110_s1 + $0x18] sm:$0xff] }
 0x1ad   : > { %v516_v53 = vmul.f32 %v1754_v51, %v1754_v51  ;;  %v517_v54 = vmul.f32 %v1757_v52, %v1757_v52 }
 0x1af   : > { %v539_v55 = vadd.f32 %v517_v54, %v516_v53 }
 0x1b1   : > { %540 = vadd.xlane.f32.xlu0 %v539_v55 }
 0x1b2   : > { %v474_v56 = vpop.permute.xlu1 %473  ;;  %v464_v57 = vpop.permute.xlu2 %463 }
 0x1b3   : > { %v1764_v58 = vsub.f32 %v1653_v2, %v474_v56  ;;  %v1767_v59 = vsub.f32 %v1657_v4, %v474_v56  ;;  %v1770_v60 = vsub.f32 %v1661_v6, %v464_v57  ;;  %v1773_v61 = vsub.f32 %v1663_v7, %v464_v57 }
 0x1b5   : > { %v512_v62 = vmul.f32 %v1764_v58, %v1764_v58  ;;  %v513_v63 = vmul.f32 %v1767_v59, %v1767_v59  ;;  %v508_v0 = vmul.f32 %v1770_v60, %v1770_v60  ;;  %v509_v1 = vmul.f32 %v1773_v61, %v1773_v61 }
 0x1b7   : > { %v533_v2 = vadd.f32 %v513_v63, %v512_v62  ;;  %v527_v3 = vadd.f32 %v509_v1, %v508_v0 }
 0x1b9   : > { %534 = vadd.xlane.f32.xlu1 %v533_v2  ;;  %528 = vadd.xlane.f32.xlu0 %v527_v3 }
 0x1ba   : > { %v459_v4 = vpop.permute.xlu1 %458  ;;  %v479_v5 = vpop.permute.xlu0 %478 }
 0x1bb   : > { %v1784_v6 = vsub.f32 %v1675_v13, %v459_v4  ;;  %v1787_v7 = vsub.f32 %v1677_v14, %v459_v4  ;;  %v1790_v8 = vsub.f32 %v1667_v9, %v479_v5  ;;  %v1793_v15 = vsub.f32 %v1669_v10, %v479_v5  ;;  %v454_v28 = vpop.permute.xlu2 %453 }
 0x1bc   : > { %v1804_v14 = vsub.f32 %v1671_v11, %v469_v49  ;;  %v1807_v9 = vsub.f32 %v1673_v12, %v469_v49  ;;  %v1824_v30 = vsub.f32 %v1685_v18, %v454_v28  ;;  %v726_v18 = vld [vmem:[%s2110_s1 + $0x38] sm:$0xff]  ;;  %v787_v49 = vld [vmem:[%s2111_s2 + $0x20] sm:$0xff] }
 0x1bd   : > { %v506_v16 = vmul.f32 %v1784_v6, %v1784_v6  ;;  %v507_v17 = vmul.f32 %v1787_v7, %v1787_v7  ;;  %v514_v22 = vmul.f32 %v1790_v8, %v1790_v8  ;;  %v515_v13 = vmul.f32 %v1793_v15, %v1793_v15 }
 0x1be   : > { %v510_v27 = vmul.f32 %v1804_v14, %v1804_v14  ;;  %v511_v11 = vmul.f32 %v1807_v9, %v1807_v9  ;;  %v504_v40 = vmul.f32 %v1824_v30, %v1824_v30 }
 0x1bf   : > { %v524_v10 = vadd.f32 %v507_v17, %v506_v16  ;;  %v536_v23 = vadd.f32 %v515_v13, %v514_v22 }
 0x1c1   : > { %525 = vadd.xlane.f32.xlu1 %v524_v10  ;;  %537 = vadd.xlane.f32.xlu2 %v536_v23 }
 0x1c2   : > { %v449_v24 = vpop.permute.xlu1 %448 }
 0x1c3   : > { %v1810_v25 = vsub.f32 %v1689_v20, %v449_v24  ;;  %v1813_v26 = vsub.f32 %v1691_v21, %v449_v24  ;;  %v1827_v20 = vsub.f32 %v1687_v19, %v454_v28  ;;  %v530_v21 = vadd.f32 %v511_v11, %v510_v27  ;;  %v725_v19 = vld [vmem:[%s2110_s1 + $0x30] sm:$0xff] }
 0x1c5   : > { %v502_v12 = vmul.f32 %v1810_v25, %v1810_v25  ;;  %v503_v29 = vmul.f32 %v1813_v26, %v1813_v26  ;;  %v505_v41 = vmul.f32 %v1827_v20, %v1827_v20 }
 0x1c7   : > { %v518_v31 = vadd.f32 %v503_v29, %v502_v12  ;;  %v521_v42 = vadd.f32 %v505_v41, %v504_v40 }
 0x1c9   : > { %531 = vadd.xlane.f32.xlu2 %v530_v21  ;;  %519 = vadd.xlane.f32.xlu0 %v518_v31 }
 0x1d1   : > { %522 = vadd.xlane.f32.xlu2 %v521_v42 }
 0x1da   : > { %764 = vperm.xlu1 %1563, %v726_v18  }
 0x1dd   : > { %759 = vperm.xlu0 %1562, %v725_v19  }
 0x1e2   : > { %823 = vperm.xlu1 %1563, %v789_v43  }
 0x1e5   : > { %828 = vperm.xlu0 %1562, %v790_v44  }
 0x1e9   : > { %749 = vperm.xlu2 %1564, %v723_v45  }
 0x1ea   : > { %754 = vperm.xlu1 %1563, %v724_v46  }
 0x1ed   : > { %818 = vperm.xlu0 %1562, %v788_v47  }
 0x1f1   : > { %739 = vperm.xlu2 %1564, %v721_v48  }
 0x1f2   : > { %813 = vperm.xlu1 %1563, %v787_v49  }
 0x1fa   : > { %744 = vperm.xlu1 %1563, %v722_v50  }
 0x224   : > { %v541_v53 = vpop.xlane.xlu0 %540 }
 0x225   : > { %550 = vmatpush.msra.mxu1 %v541_v53 }
 0x22c   : > { %v535_v55 = vpop.xlane.xlu1 %534  ;;  %v529_v57 = vpop.xlane.xlu0 %528 }
 0x234   : > { %v538_v54 = vpop.xlane.xlu2 %537  ;;  %v526_v62 = vpop.xlane.xlu1 %525 }
 0x235   : > { %551 = vmatpush.msra.mxu1 %v538_v54 }
 0x237   : > { %552 = vmatpush.msra.mxu1 %v535_v55 }
 0x23c   : > { %v532_v56 = vpop.xlane.xlu2 %531  ;;  %v520_v0 = vpop.xlane.xlu0 %519 }
 0x23d   : > { %553 = vmatpush.msra.mxu1 %v532_v56 }
 0x23f   : > { %554 = vmatpush.msra.mxu1 %v529_v57 }
 0x241   : > { %555 = vmatpush.msra.mxu1 %v526_v62 }
 0x244   : > { %v523_v63 = vpop.xlane.xlu2 %522 }
 0x245   : > { %556 = vmatpush.msra.mxu1 %v523_v63 }
 0x247   : > { %557 = vmatpush.msra.mxu1 %v520_v0 }
 0x248   : > { %1447 = vmatmul.msk.f32.vlgmr.msra.gmra.mxu1 %vm380_vm0, %v1700_v32 }
 0x250   : > { %1448 = vmatmul.msk.f32.gmra.mxu1 %vm380_vm0, %v1707_v33 }
 0x258   : > { %1449 = vmatmul.msk.f32.gmra.mxu1 %vm380_vm0, %v1714_v34 }
 0x260   : > { %1450 = vmatmul.msk.f32.gmra.mxu1 %vm380_vm0, %v1721_v35 }
 0x268   : > { %1451 = vmatmul.msk.f32.gmra.mxu1 %vm380_vm0, %v1728_v36 }
 0x270   : > { %1452 = vmatmul.msk.f32.gmra.mxu1 %vm380_vm0, %v1735_v37 }
 0x278   : > { %1453 = vmatmul.msk.f32.gmra.mxu1 %vm380_vm0, %v1742_v38 }
 0x280   : > { %1454 = vmatmul.msk.f32.gmra.mxu1 %vm380_vm0, %v1749_v39 }
 0x2c5   : > { %v559_v32 = vpop.f32.mrf.mxu1 }
 0x2c6   : > { %v560_v33 = vadd.f32 1e-06, %v559_v32 }
 0x2c8   : > { %1565 = vrsqrt.f32 %v560_v33  ;;  %vm589_vm2 = vweird.f32 %v560_v33 }
 0x2cd   : > { %v562_v1 = vpop.f32.mrf.mxu1 }
 0x2ce   : > { %v1566_v34 = vpop.eup %1565  ;;  %v563_v2 = vadd.f32 1e-06, %v562_v1 }
 0x2cf   : > { %v584_v3 = vmul.f32 %v1566_v34, %v560_v33  ;;  %vm590_vm1 = vweird.f32 %v1566_v34 }
 0x2d0   : > { %1567 = vrsqrt.f32 %v563_v2  ;;  %vm591_vm3 = vmor %vm589_vm2, %vm590_vm1  ;;  %vm599_vm5 = vweird.f32 %v563_v2 }
 0x2d1   : > { %v585_v35 = vmul.f32 %v1566_v34, %v584_v3 }
 0x2d3   : > { %v586_v4 = vmul.f32 0.5, %v585_v35 }
 0x2d5   : > { %v587_v36 = vsub.f32 1.5, %v586_v4  ;;  %v565_v5 = vpop.f32.mrf.mxu1 }
 0x2d6   : > { %v1568_v37 = vpop.eup %1567  ;;  %v566_v16 = vadd.f32 1e-06, %v565_v5 }
 0x2d7   : > { %v594_v17 = vmul.f32 %v1568_v37, %v563_v2  ;;  %v588_v38 = vmul.f32 %v1566_v34, %v587_v36  ;;  %vm600_vm4 = vweird.f32 %v1568_v37 }
 0x2d8   : > { %1569 = vrsqrt.f32 %v566_v16  ;;  %vm601_vm6 = vmor %vm599_vm5, %vm600_vm4  ;;  %vm609_vm8 = vweird.f32 %v566_v16 }
 0x2d9   : > { %v595_v39 = vmul.f32 %v1568_v37, %v594_v17  ;;  %v592_v22 = vsel %vm591_vm3, %v1566_v34, %v588_v38 }
 0x2da   : > { %665 = vperm.xlu0 %1562, %v592_v22  }
 0x2db   : > { %v596_v13 = vmul.f32 0.5, %v595_v39 }
 0x2dd   : > { %v597_v10 = vsub.f32 1.5, %v596_v13  ;;  %v568_v23 = vpop.f32.mrf.mxu1 }
 0x2de   : > { %v1570_v24 = vpop.eup %1569  ;;  %v569_v27 = vadd.f32 1e-06, %v568_v23 }
 0x2df   : > { %v604_v11 = vmul.f32 %v1570_v24, %v566_v16  ;;  %v598_v28 = vmul.f32 %v1568_v37, %v597_v10  ;;  %vm610_vm7 = vweird.f32 %v1570_v24  ;;  %v786_v16 = vld [vmem:[%s2111_s2 + $0x18] sm:$0xff] }
 0x2e0   : > { %1571 = vrsqrt.f32 %v569_v27  ;;  %vm611_vm9 = vmor %vm609_vm8, %vm610_vm7  ;;  %vm619_vm11 = vweird.f32 %v569_v27 }
 0x2e1   : > { %v605_v12 = vmul.f32 %v1570_v24, %v604_v11  ;;  %v602_v29 = vsel %vm601_vm6, %v1568_v37, %v598_v28 }
 0x2e2   : > { %670 = vperm.xlu2 %1564, %v602_v29   ;;  %v785_v29 = vld [vmem:[%s2111_s2 + $0x10] sm:$0xff] }
 0x2e3   : > { %v606_v21 = vmul.f32 0.5, %v605_v12 }
 0x2e5   : > { %v607_v31 = vsub.f32 1.5, %v606_v21  ;;  %v571_v40 = vpop.f32.mrf.mxu1 }
 0x2e6   : > { %v1572_v41 = vpop.eup %1571  ;;  %v572_v42 = vadd.f32 1e-06, %v571_v40 }
 0x2e7   : > { %v614_v18 = vmul.f32 %v1572_v41, %v569_v27  ;;  %v608_v19 = vmul.f32 %v1570_v24, %v607_v31  ;;  %vm620_vm10 = vweird.f32 %v1572_v41  ;;  %v880_v31 = vld [vmem:[%s2114_s5 + $0x8] sm:$0xff] }
 0x2e8   : > { %1573 = vrsqrt.f32 %v572_v42  ;;  %vm621_vm12 = vmor %vm619_vm11, %vm620_vm10  ;;  %vm629_vm14 = vweird.f32 %v572_v42 }
 0x2e9   : > { %v615_v43 = vmul.f32 %v1572_v41, %v614_v18  ;;  %v612_v44 = vsel %vm611_vm9, %v1570_v24, %v608_v19  ;;  %v783_v24 = vld [vmem:[%s2111_s2] sm:$0xff] }
 0x2ea   : > { %675 = vperm.xlu0 %1562, %v612_v44   ;;  %v883_v18 = vld [vmem:[%s2114_s5 + $0x20] sm:$0xff]  ;;  %v886_v44 = vld [vmem:[%s2114_s5 + $0x38] sm:$0xff] }
 0x2eb   : > { %v616_v45 = vmul.f32 0.5, %v615_v43  ;;  %v879_v19 = vld [vmem:[%s2114_s5] sm:$0xff]  ;;  %v784_v43 = vld [vmem:[%s2111_s2 + $0x8] sm:$0xff] }
 0x2ed   : > { %v617_v46 = vsub.f32 1.5, %v616_v45  ;;  %v574_v47 = vpop.f32.mrf.mxu1  ;;  %v882_v45 = vld [vmem:[%s2114_s5 + $0x18] sm:$0xff] }
 0x2ee   : > { %v1574_v48 = vpop.eup %1573  ;;  %v575_v49 = vadd.f32 1e-06, %v574_v47  ;;  %v889_v47 = vld [vmem:[%s2114_s5 + $0x50] sm:$0xff] }
 0x2ef   : > { %v624_v50 = vmul.f32 %v1574_v48, %v572_v42  ;;  %v618_v53 = vmul.f32 %v1572_v41, %v617_v46  ;;  %vm630_vm13 = vweird.f32 %v1574_v48  ;;  %v719_v42 = vld [vmem:[%s2110_s1] sm:$0xff]  ;;  %v881_v46 = vld [vmem:[%s2114_s5 + $0x10] sm:$0xff] }
 0x2f0   : > { %1575 = vrsqrt.f32 %v575_v49  ;;  %vm631_vm15 = vmor %vm629_vm14, %vm630_vm13  ;;  %vm639_vm2 = vweird.f32 %v575_v49 }
 0x2f1   : > { %v625_v54 = vmul.f32 %v1574_v48, %v624_v50  ;;  %v622_v55 = vsel %vm621_vm12, %v1572_v41, %v618_v53  ;;  %v720_v41 = vld [vmem:[%s2110_s1 + $0x8] sm:$0xff] }
 0x2f2   : > { %680 = vperm.xlu2 %1564, %v622_v55   ;;  %v892_v50 = vld [vmem:[%s2114_s5 + $0x68] sm:$0xff]  ;;  %v895_v55 = vld [vmem:[%s2114_s5 + $0x80] sm:$0xff] }
 0x2f3   : > { %v626_v56 = vmul.f32 0.5, %v625_v54  ;;  %v888_v53 = vld [vmem:[%s2114_s5 + $0x48] sm:$0xff]  ;;  %v887_v54 = vld [vmem:[%s2114_s5 + $0x40] sm:$0xff] }
 0x2f5   : > { %v627_v57 = vsub.f32 1.5, %v626_v56  ;;  %v577_v62 = vpop.f32.mrf.mxu1  ;;  %v891_v56 = vld [vmem:[%s2114_s5 + $0x60] sm:$0xff] }
 0x2f6   : > { %v1576_v63 = vpop.eup %1575  ;;  %v578_v0 = vadd.f32 1e-06, %v577_v62  ;;  %v898_v62 = vld [vmem:[%s2114_s5 + $0x98] sm:$0xff] }
 0x2f7   : > { %v634_v32 = vmul.f32 %v1576_v63, %v575_v49  ;;  %v628_v33 = vmul.f32 %v1574_v48, %v627_v57  ;;  %vm640_vm1 = vweird.f32 %v1576_v63  ;;  %v884_v49 = vld [vmem:[%s2114_s5 + $0x28] sm:$0xff]  ;;  %v890_v57 = vld [vmem:[%s2114_s5 + $0x58] sm:$0xff] }
 0x2f8   : > { %1577 = vrsqrt.f32 %v578_v0  ;;  %vm641_vm3 = vmor %vm639_vm2, %vm640_vm1  ;;  %vm649_vm5 = vweird.f32 %v578_v0 }
 0x2f9   : > { %v635_v1 = vmul.f32 %v1576_v63, %v634_v32  ;;  %v632_v34 = vsel %vm631_vm15, %v1574_v48, %v628_v33  ;;  %v885_v48 = vld [vmem:[%s2114_s5 + $0x30] sm:$0xff]  ;;  %v765_v33 = vpop.permute.xlu1 %764 }
 0x2fa   : > { %685 = vperm.xlu0 %1562, %v632_v34   ;;  %v901_v32 = vld [vmem:[%s2114_s5 + $0xb0] sm:$0xff]  ;;  %v760_v34 = vpop.permute.xlu0 %759 }
 0x2fb   : > { %v636_v2 = vmul.f32 0.5, %v635_v1  ;;  %v750_v1 = vpop.permute.xlu2 %749 }
 0x2fd   : > { %v637_v3 = vsub.f32 1.5, %v636_v2  ;;  %v580_v35 = vpop.f32.mrf.mxu1  ;;  %v897_v2 = vld [vmem:[%s2114_s5 + $0x90] sm:$0xff] }
 0x2fe   : > { %v1578_v4 = vpop.eup %1577  ;;  %v581_v36 = vadd.f32 1e-06, %v580_v35 }
 0x2ff   : > { %v644_v5 = vmul.f32 %v1578_v4, %v578_v0  ;;  %v638_v37 = vmul.f32 %v1576_v63, %v637_v3  ;;  %vm650_vm4 = vweird.f32 %v1578_v4  ;;  %v893_v0 = vld [vmem:[%s2114_s5 + $0x70] sm:$0xff]  ;;  %v896_v3 = vld [vmem:[%s2114_s5 + $0x88] sm:$0xff] }
 0x300   : > { %1579 = vrsqrt.f32 %v581_v36  ;;  %vm651_vm6 = vmor %vm649_vm5, %vm650_vm4  ;;  %vm659_vm7 = vweird.f32 %v581_v36 }
 0x301   : > { %v645_v17 = vmul.f32 %v1578_v4, %v644_v5  ;;  %v642_v38 = vsel %vm641_vm3, %v1576_v63, %v638_v37  ;;  %v894_v63 = vld [vmem:[%s2114_s5 + $0x78] sm:$0xff]  ;;  %v824_v35 = vpop.permute.xlu1 %823  ;;  %v900_v5 = vld [vmem:[%s2114_s5 + $0xa8] sm:$0xff]  ;;  %v899_v37 = vld [vmem:[%s2114_s5 + $0xa0] sm:$0xff] }
 0x302   : > { %690 = vperm.xlu2 %1564, %v642_v38   ;;  %808 = vperm.xlu0 %1562, %v786_v16  }
 0x303   : > { %v646_v39 = vmul.f32 0.5, %v645_v17  ;;  %v902_v17 = vld [vmem:[%s2114_s5 + $0xb8] sm:$0xff] }
 0x305   : > { %v647_v22 = vsub.f32 1.5, %v646_v39 }
 0x306   : > { %v1580_v13 = vpop.eup %1579 }
 0x307   : > { %v654_v10 = vmul.f32 %v1580_v13, %v581_v36  ;;  %v648_v23 = vmul.f32 %v1578_v4, %v647_v22  ;;  %vm660_vm8 = vweird.f32 %v1580_v13  ;;  %v829_v36 = vpop.permute.xlu0 %828 }
 0x308   : > { %vm661_vm9 = vmor %vm659_vm7, %vm660_vm8 }
 0x309   : > { %v655_v27 = vmul.f32 %v1580_v13, %v654_v10  ;;  %v652_v11 = vsel %vm651_vm6, %v1578_v4, %v648_v23  ;;  %v740_v4 = vpop.permute.xlu2 %739  ;;  %v755_v38 = vpop.permute.xlu1 %754 }
 0x30a   : > { %695 = vperm.xlu1 %1563, %v652_v11   ;;  %793 = vperm.xlu0 %1562, %v783_v24  }
 0x30b   : > { %v656_v28 = vmul.f32 0.5, %v655_v27 }
 0x30d   : > { %v657_v12 = vsub.f32 1.5, %v656_v28 }
 0x30f   : > { %v658_v21 = vmul.f32 %v1580_v13, %v657_v12  ;;  %v819_v39 = vpop.permute.xlu0 %818 }
 0x311   : > { %v662_v40 = vsel %vm661_vm9, %v1580_v13, %v658_v21  ;;  %v814_v10 = vpop.permute.xlu1 %813 }
 0x312   : > { %803 = vperm.xlu1 %1563, %v785_v29   ;;  %700 = vperm.xlu2 %1564, %v662_v40  }
 0x313   : > { %910 = vperm.xlu0 %1562, %v880_v31  }
 0x319   : > { %v745_v27 = vpop.permute.xlu1 %744 }
 0x31a   : > { %734 = vperm.xlu1 %1563, %v720_v41   ;;  %729 = vperm.xlu2 %1564, %v719_v42  }
 0x31b   : > { %925 = vperm.xlu0 %1562, %v883_v18  }
 0x322   : > { %905 = vperm.xlu1 %1563, %v879_v19   ;;  %798 = vperm.xlu2 %1564, %v784_v43  }
 0x323   : > { %940 = vperm.xlu0 %1562, %v886_v44  }
 0x32a   : > { %920 = vperm.xlu1 %1563, %v882_v45   ;;  %915 = vperm.xlu2 %1564, %v881_v46  }
 0x32b   : > { %955 = vperm.xlu0 %1562, %v889_v47  }
 0x332   : > { %935 = vperm.xlu1 %1563, %v885_v48   ;;  %930 = vperm.xlu2 %1564, %v884_v49  }
 0x333   : > { %970 = vperm.xlu0 %1562, %v892_v50  }
 0x33a   : > { %950 = vperm.xlu1 %1563, %v888_v53   ;;  %945 = vperm.xlu2 %1564, %v887_v54  }
 0x33b   : > { %985 = vperm.xlu0 %1562, %v895_v55  }
 0x33c   : > { %v1966_v16 = vpop.permute.xlu2 %670 }
 0x342   : > { %965 = vperm.xlu1 %1563, %v891_v56   ;;  %960 = vperm.xlu2 %1564, %v890_v57  }
 0x343   : > { %1000 = vperm.xlu0 %1562, %v898_v62  }
 0x34a   : > { %980 = vperm.xlu1 %1563, %v894_v63   ;;  %975 = vperm.xlu2 %1564, %v893_v0  }
 0x34b   : > { %1015 = vperm.xlu0 %1562, %v901_v32  }
 0x34c   : > { %v681_v22 = vpop.permute.xlu2 %680  ;;  %v666_v13 = vpop.permute.xlu0 %665 }
 0x34d   : > { %v710_v56 = vmul.f32 %v681_v22, %v1773_v61  ;;  %v703_v61 = vmul.f32 %v666_v13, %v1810_v25 }
 0x352   : > { %995 = vperm.xlu1 %1563, %v897_v2   ;;  %990 = vperm.xlu2 %1564, %v896_v3  }
 0x35a   : > { %1010 = vperm.xlu1 %1563, %v900_v5   ;;  %1005 = vperm.xlu2 %1564, %v899_v37   ;;  %v706_v5 = vmul.f32 %v1966_v16, %v1827_v20  ;;  %v704_v37 = vmul.f32 %v666_v13, %v1813_v26  ;;  %v1533_v26 = vld [vmem:[%s2113_s4] sm:$0xff] }
 0x35b   : > { %v1537_v13 = vld [vmem:[%s2113_s4 + $0x20] sm:$0xff] }
 0x35c   : > { %v691_v23 = vpop.permute.xlu2 %690  ;;  %v676_v24 = vpop.permute.xlu0 %675 }
 0x35d   : > { %v713_v31 = vmul.f32 %v691_v23, %v1764_v58  ;;  %v714_v44 = vmul.f32 %v691_v23, %v1767_v59  ;;  %v708_v50 = vmul.f32 %v676_v24, %v1787_v7 }
 0x35f   : > { %v777_v47 = vmul.f32 %v755_v38, %v713_v31  ;;  %v778_v53 = vmul.f32 %v755_v38, %v714_v44  ;;  %v772_v32 = vmul.f32 %v740_v4, %v708_v50  ;;  %v1535_v31 = vld [vmem:[%s2113_s4 + $0x10] sm:$0xff]  ;;  %v1544_v44 = vld [vmem:[%s2113_s4 + $0x58] sm:$0xff] }
 0x361   : > { %v841_v0 = vadd.f32 %v819_v39, %v777_v47  ;;  %v842_v7 = vadd.f32 %v819_v39, %v778_v53 }
 0x362   : > { %1020 = vperm.xlu2 %1564, %v902_v17  }
 0x36c   : > { %v701_v11 = vpop.permute.xlu2 %700  ;;  %v686_v28 = vpop.permute.xlu0 %685 }
 0x36d   : > { %v717_v12 = vmul.f32 %v701_v11, %v1754_v51  ;;  %v718_v29 = vmul.f32 %v701_v11, %v1757_v52  ;;  %v711_v21 = vmul.f32 %v686_v28, %v1804_v14  ;;  %v712_v40 = vmul.f32 %v686_v28, %v1807_v9 }
 0x36e   : > { %v707_v52 = vmul.f32 %v676_v24, %v1784_v6 }
 0x36f   : > { %v781_v42 = vmul.f32 %v765_v33, %v717_v12  ;;  %v782_v18 = vmul.f32 %v765_v33, %v718_v29  ;;  %v775_v45 = vmul.f32 %v750_v1, %v711_v21  ;;  %v776_v14 = vmul.f32 %v750_v1, %v712_v40  ;;  %v1534_v29 = vld [vmem:[%s2113_s4 + $0x8] sm:$0xff]  ;;  %v1539_v40 = vld [vmem:[%s2113_s4 + $0x30] sm:$0xff] }
 0x370   : > { %v771_v63 = vmul.f32 %v740_v4, %v707_v52  ;;  %v705_v4 = vmul.f32 %v1966_v16, %v1824_v30  ;;  %v1538_v21 = vld [vmem:[%s2113_s4 + $0x28] sm:$0xff] }
 0x371   : > { %v845_v58 = vadd.f32 %v829_v36, %v781_v42  ;;  %v846_v9 = vadd.f32 %v829_v36, %v782_v18  ;;  %v839_v59 = vadd.f32 %v814_v10, %v775_v45  ;;  %v840_v6 = vadd.f32 %v814_v10, %v776_v14  ;;  %v1540_v42 = vld [vmem:[%s2113_s4 + $0x38] sm:$0xff]  ;;  %v1541_v18 = vld [vmem:[%s2113_s4 + $0x40] sm:$0xff] }
 0x373   : > { %v876_v3 = vpack.c.bf16 %v842_v7, %v840_v6 }
 0x374   : > { %v809_v54 = vpop.permute.xlu0 %808  ;;  %v730_v57 = vpop.permute.xlu2 %729 }
 0x375   : > { %v767_v38 = vmul.f32 %v730_v57, %v703_v61  ;;  %v768_v23 = vmul.f32 %v730_v57, %v704_v37 }
 0x37c   : > { %v696_v41 = vpop.permute.xlu1 %695  ;;  %v794_v39 = vpop.permute.xlu0 %793 }
 0x37d   : > { %v715_v19 = vmul.f32 %v696_v41, %v1790_v8  ;;  %v716_v43 = vmul.f32 %v696_v41, %v1793_v15  ;;  %v709_v8 = vmul.f32 %v681_v22, %v1770_v60  ;;  %v774_v60 = vmul.f32 %v745_v27, %v710_v56  ;;  %v799_v25 = vpop.permute.xlu2 %798  ;;  %v1536_v41 = vld [vmem:[%s2113_s4 + $0x18] sm:$0xff] }
 0x37e   : > { %v831_v11 = vadd.f32 %v794_v39, %v767_v38  ;;  %v832_v30 = vadd.f32 %v794_v39, %v768_v23 }
 0x37f   : > { %v779_v46 = vmul.f32 %v760_v34, %v715_v19  ;;  %v780_v51 = vmul.f32 %v760_v34, %v716_v43  ;;  %v773_v33 = vmul.f32 %v745_v27, %v709_v8  ;;  %v875_v34 = vpack.c.bf16 %v841_v0, %v839_v59  ;;  %v1542_v19 = vld [vmem:[%s2113_s4 + $0x48] sm:$0xff]  ;;  %v1543_v43 = vld [vmem:[%s2113_s4 + $0x50] sm:$0xff] }
 0x380   : > { %v838_v36 = vadd.f32 %v809_v54, %v774_v60 }
 0x381   : > { %v843_v48 = vadd.f32 %v824_v35, %v779_v46  ;;  %v844_v49 = vadd.f32 %v824_v35, %v780_v51  ;;  %v837_v35 = vadd.f32 %v809_v54, %v773_v33 }
 0x383   : > { %v877_v15 = vpack.c.bf16 %v845_v58, %v843_v48  ;;  %v878_v55 = vpack.c.bf16 %v846_v9, %v844_v49 }
 0x384   : > { %v804_v62 = vpop.permute.xlu1 %803 }
 0x385   : > { %1123 = vmatpush.bf16.msrb.mxu0 %v877_v15  ;;  %1545 = vmatpush.bf16.msra.mxu2 %v877_v15  ;;  %v835_v1 = vadd.f32 %v804_v62, %v771_v63  ;;  %v836_v2 = vadd.f32 %v804_v62, %v772_v32  ;;  %v916_v46 = vpop.permute.xlu2 %915  ;;  %v911_v51 = vpop.permute.xlu0 %910 }
 0x386   : > { %1192 = vmatpush.bf16.msrb.mxu1 %v878_v55  ;;  %1549 = vmatpush.bf16.msra.mxu3 %v878_v55 }
 0x387   : > { %v873_v17 = vpack.c.bf16 %v837_v35, %v835_v1  ;;  %v874_v10 = vpack.c.bf16 %v838_v36, %v836_v2 }
 0x389   : > { %1124 = vmatpush.bf16.msrb.mxu0 %v875_v34  ;;  %1546 = vmatpush.bf16.msra.mxu2 %v875_v34 }
 0x38a   : > { %1193 = vmatpush.bf16.msrb.mxu1 %v876_v3  ;;  %1550 = vmatpush.bf16.msra.mxu3 %v876_v3 }
 0x38c   : > { %v735_v22 = vpop.permute.xlu1 %734 }
 0x38d   : > { %v769_v24 = vmul.f32 %v735_v22, %v705_v4  ;;  %v770_v27 = vmul.f32 %v735_v22, %v706_v5  ;;  %1125 = vmatpush.bf16.msrb.mxu0 %v873_v17  ;;  %1547 = vmatpush.bf16.msra.mxu2 %v873_v17  ;;  %v2049_v47 = vpop.permute.xlu2 %930  ;;  %v926_v49 = vpop.permute.xlu0 %925 }
 0x38e   : > { %1194 = vmatpush.bf16.msrb.mxu1 %v874_v10  ;;  %1551 = vmatpush.bf16.msra.mxu3 %v874_v10 }
 0x38f   : > { %v833_v28 = vadd.f32 %v799_v25, %v769_v24  ;;  %v834_v12 = vadd.f32 %v799_v25, %v770_v27 }
 0x391   : > { %v871_v20 = vpack.c.bf16 %v833_v28, %v831_v11  ;;  %v872_v16 = vpack.c.bf16 %v834_v12, %v832_v30 }
 0x393   : > { %1126 = vmatpush.bf16.msrb.mxu0 %v871_v20  ;;  %1548 = vmatpush.bf16.msra.mxu2 %v871_v20 }
 0x394   : > { %1195 = vmatpush.bf16.msrb.mxu1 %v872_v16  ;;  %1552 = vmatpush.bf16.msra.mxu3 %v872_v16  ;;  %v906_v45 = vpop.permute.xlu1 %905 }
 0x395   : > { %v946_v54 = vpop.permute.xlu2 %945  ;;  %v2069_v0 = vpop.permute.xlu0 %940 }
 0x396   : > { %1503 = vmatmul.msk.bf16.vlgmr.msrb.gmra.mxu0 %vm380_vm0, %v1533_v26  ;;  %1507 = vmatmul.msk.bf16.vlgmr.msra.gmra.mxu2 %vm380_vm0, %v1537_v13 }
 0x397   : > { %1515 = vmatmul.msk.bf16.vlgmr.msrb.gmra.mxu1 %vm380_vm0, %v1533_v26  ;;  %1519 = vmatmul.msk.bf16.vlgmr.msra.gmra.mxu3 %vm380_vm0, %v1537_v13 }
 0x39c   : > { %v921_v52 = vpop.permute.xlu1 %920 }
 0x39d   : > { %v956_v5 = vpop.permute.xlu0 %955  ;;  %v961_v11 = vpop.permute.xlu2 %960 }
 0x3a4   : > { %v2060_v50 = vpop.permute.xlu1 %935 }
 0x3a6   : > { %1504 = vmatmul.msk.bf16.gmra.mxu0 %vm380_vm0, %v1534_v29  ;;  %1508 = vmatmul.msk.bf16.gmra.mxu2 %vm380_vm0, %v1538_v21 }
 0x3a7   : > { %1516 = vmatmul.msk.bf16.gmra.mxu1 %vm380_vm0, %v1534_v29  ;;  %1520 = vmatmul.msk.bf16.gmra.mxu3 %vm380_vm0, %v1538_v21 }
 0x3ac   : > { %v951_v7 = vpop.permute.xlu1 %950 }
 0x3b6   : > { %1505 = vmatmul.msk.bf16.gmra.mxu0 %vm380_vm0, %v1535_v31  ;;  %1509 = vmatmul.msk.bf16.gmra.mxu2 %vm380_vm0, %v1539_v40 }
 0x3b7   : > { %1517 = vmatmul.msk.bf16.gmra.mxu1 %vm380_vm0, %v1535_v31  ;;  %1521 = vmatmul.msk.bf16.gmra.mxu3 %vm380_vm0, %v1539_v40  ;;  %v966_v40 = vpop.permute.xlu1 %965 }
 0x3c6   : > { %1506 = vmatmul.msk.bf16.gmra.mxu0 %vm380_vm0, %v1536_v41  ;;  %1510 = vmatmul.msk.bf16.gmra.mxu2 %vm380_vm0, %v1540_v42 }
 0x3c7   : > { %1518 = vmatmul.msk.bf16.gmra.mxu1 %vm380_vm0, %v1536_v41  ;;  %1522 = vmatmul.msk.bf16.gmra.mxu3 %vm380_vm0, %v1540_v42 }
 0x3d6   : > { %1511 = vmatmul.msk.bf16.gmra.mxu2 %vm380_vm0, %v1541_v18 }
 0x3d7   : > { %1523 = vmatmul.msk.bf16.gmra.mxu3 %vm380_vm0, %v1541_v18 }
 0x3e6   : > { %1512 = vmatmul.msk.bf16.gmra.mxu2 %vm380_vm0, %v1542_v19 }
 0x3e7   : > { %1524 = vmatmul.msk.bf16.gmra.mxu3 %vm380_vm0, %v1542_v19 }
 0x3f6   : > { %1513 = vmatmul.msk.bf16.gmra.mxu2 %vm380_vm0, %v1543_v43 }
 0x3f7   : > { %1525 = vmatmul.msk.bf16.gmra.mxu3 %vm380_vm0, %v1543_v43 }
 0x406   : > { %1514 = vmatmul.msk.bf16.gmra.mxu2 %vm380_vm0, %v1544_v44 }
 0x407   : > { %1526 = vmatmul.msk.bf16.gmra.mxu3 %vm380_vm0, %v1544_v44 }
 0x413   : > { %v1128_v14 = vpop.f32.mrf.mxu0 }
 0x414   : > { %v1129_v48 = vadd.f32 %v1128_v14, %v906_v45  ;;  %v1197_v58 = vpop.f32.mrf.mxu1  ;;  %v971_v14 = vpop.permute.xlu0 %970 }
 0x415   : > { %v1198_v9 = vadd.f32 %v1197_v58, %v906_v45 }
 0x417   : > { %v1257_v53 = vpack.c.bf16 %v1198_v9, %v1129_v48 }
 0x419   : > { %1265 = vst [vmem:[%s2058_s14] sm:$0xff] %v1257_v53  ;;  %v1148_v8 = vpop.f32.mrf.mxu2 }
 0x41a   : > { %v1149_v15 = vadd.f32 %v1148_v8, %v946_v54  ;;  %v1217_v55 = vpop.f32.mrf.mxu3 }
 0x41b   : > { %v1218_v59 = vadd.f32 %v1217_v55, %v946_v54  ;;  %v1130_v56 = vpop.f32.mrf.mxu0 }
 0x41c   : > { %v1131_v57 = vadd.f32 %v1130_v56, %v911_v51  ;;  %v1199_v62 = vpop.f32.mrf.mxu1 }
 0x41d   : > { %v1273_v6 = vpack.c.bf16 %v1218_v59, %v1149_v15  ;;  %v1200_v63 = vadd.f32 %v1199_v62, %v911_v51  ;;  %v976_v59 = vpop.permute.xlu2 %975 }
 0x41f   : > { %1281 = vst [vmem:[%s2067_s16] sm:$0xff] %v1273_v6  ;;  %v1258_v32 = vpack.c.bf16 %v1200_v63, %v1131_v57 }
 0x421   : > { %1266 = vst [vmem:[%s2058_s14 + $0x8] sm:$0xff] %v1258_v32  ;;  %v1150_v33 = vpop.f32.mrf.mxu2 }
 0x422   : > { %v1151_v1 = vadd.f32 %v1150_v33, %v951_v7  ;;  %v1219_v34 = vpop.f32.mrf.mxu3 }
 0x423   : > { %v1220_v60 = vadd.f32 %v1219_v34, %v951_v7  ;;  %v1133_v2 = vpop.f32.mrf.mxu0  ;;  %v981_v34 = vpop.permute.xlu1 %980 }
 0x424   : > { %v1134_v3 = vadd.f32 %v1133_v2, %v916_v46  ;;  %v1202_v35 = vpop.f32.mrf.mxu1 }
 0x425   : > { %v1274_v61 = vpack.c.bf16 %v1220_v60, %v1151_v1  ;;  %v1203_v36 = vadd.f32 %v1202_v35, %v916_v46 }
 0x427   : > { %1282 = vst [vmem:[%s2067_s16 + $0x8] sm:$0xff] %v1274_v61  ;;  %v1259_v4 = vpack.c.bf16 %v1203_v36, %v1134_v3  ;;  %v986_v36 = vpop.permute.xlu0 %985 }
 0x429   : > { %1267 = vst [vmem:[%s2058_s14 + $0x10] sm:$0xff] %v1259_v4  ;;  %v1153_v37 = vpop.f32.mrf.mxu2 }
 0x42a   : > { %v1154_v17 = vadd.f32 %v1153_v37, %v956_v5  ;;  %v1222_v38 = vpop.f32.mrf.mxu3 }
 0x42b   : > { %v1223_v39 = vadd.f32 %v1222_v38, %v956_v5  ;;  %v1135_v22 = vpop.f32.mrf.mxu0  ;;  %v991_v38 = vpop.permute.xlu2 %990 }
 0x42c   : > { %v1136_v10 = vadd.f32 %v1135_v22, %v921_v52  ;;  %v1204_v23 = vpop.f32.mrf.mxu1 }
 0x42d   : > { %v1275_v24 = vpack.c.bf16 %v1223_v39, %v1154_v17  ;;  %v1205_v27 = vadd.f32 %v1204_v23, %v921_v52 }
 0x42f   : > { %1283 = vst [vmem:[%s2067_s16 + $0x10] sm:$0xff] %v1275_v24  ;;  %v1260_v25 = vpack.c.bf16 %v1205_v27, %v1136_v10  ;;  %v996_v27 = vpop.permute.xlu1 %995 }
 0x431   : > { %1268 = vst [vmem:[%s2058_s14 + $0x18] sm:$0xff] %v1260_v25  ;;  %v1155_v30 = vpop.f32.mrf.mxu2 }
 0x432   : > { %v1156_v28 = vadd.f32 %v1155_v30, %v961_v11  ;;  %v1224_v12 = vpop.f32.mrf.mxu3 }
 0x433   : > { %v1225_v20 = vadd.f32 %v1224_v12, %v961_v11  ;;  %v1138_v16 = vpop.f32.mrf.mxu0 }
 0x434   : > { %v1139_v26 = vadd.f32 %v1138_v16, %v926_v49  ;;  %v1207_v13 = vpop.f32.mrf.mxu1 }
 0x435   : > { %v1276_v29 = vpack.c.bf16 %v1225_v20, %v1156_v28  ;;  %v1208_v21 = vadd.f32 %v1207_v13, %v926_v49  ;;  %v1001_v20 = vpop.permute.xlu0 %1000 }
 0x437   : > { %1284 = vst [vmem:[%s2067_s16 + $0x18] sm:$0xff] %v1276_v29  ;;  %v1261_v31 = vpack.c.bf16 %v1208_v21, %v1139_v26 }
 0x439   : > { %1269 = vst [vmem:[%s2058_s14 + $0x20] sm:$0xff] %v1261_v31  ;;  %v1158_v41 = vpop.f32.mrf.mxu2  ;;  %v1006_v31 = vpop.permute.xlu2 %1005 }
 0x43a   : > { %v1159_v42 = vadd.f32 %v1158_v41, %v966_v40  ;;  %v1227_v18 = vpop.f32.mrf.mxu3 }
 0x43b   : > { %v1228_v19 = vadd.f32 %v1227_v18, %v966_v40  ;;  %v1140_v43 = vpop.f32.mrf.mxu0 }
 0x43c   : > { %v1141_v44 = vadd.f32 %v1140_v43, %v2049_v47  ;;  %v1209_v45 = vpop.f32.mrf.mxu1  ;;  %v1011_v43 = vpop.permute.xlu1 %1010 }
 0x43d   : > { %v1277_v46 = vpack.c.bf16 %v1228_v19, %v1159_v42  ;;  %v1210_v51 = vadd.f32 %v1209_v45, %v2049_v47 }
 0x43f   : > { %1285 = vst [vmem:[%s2067_s16 + $0x20] sm:$0xff] %v1277_v46  ;;  %v1262_v52 = vpack.c.bf16 %v1210_v51, %v1141_v44 }
 0x441   : > { %1270 = vst [vmem:[%s2058_s14 + $0x28] sm:$0xff] %v1262_v52  ;;  %v1160_v48 = vpop.f32.mrf.mxu2 }
 0x442   : > { %v1161_v58 = vadd.f32 %v1160_v48, %v971_v14  ;;  %v1229_v49 = vpop.f32.mrf.mxu3 }
 0x443   : > { %v1230_v9 = vadd.f32 %v1229_v49, %v971_v14  ;;  %v1143_v53 = vpop.f32.mrf.mxu0  ;;  %v1016_v14 = vpop.permute.xlu0 %1015 }
 0x444   : > { %v1144_v54 = vadd.f32 %v1143_v53, %v2060_v50  ;;  %v1212_v8 = vpop.f32.mrf.mxu1 }
 0x445   : > { %v1278_v15 = vpack.c.bf16 %v1230_v9, %v1161_v58  ;;  %v1213_v55 = vadd.f32 %v1212_v8, %v2060_v50 }
 0x447   : > { %1286 = vst [vmem:[%s2067_s16 + $0x28] sm:$0xff] %v1278_v15  ;;  %v1263_v47 = vpack.c.bf16 %v1213_v55, %v1144_v54  ;;  %v1021_v54 = vpop.permute.xlu2 %1020 }
 0x449   : > { %1271 = vst [vmem:[%s2058_s14 + $0x30] sm:$0xff] %v1263_v47  ;;  %v1163_v56 = vpop.f32.mrf.mxu2 }
 0x44a   : > { %v1164_v57 = vadd.f32 %v1163_v56, %v976_v59  ;;  %v1232_v62 = vpop.f32.mrf.mxu3 }
 0x44b   : > { %v1233_v6 = vadd.f32 %v1232_v62, %v976_v59  ;;  %v1145_v63 = vpop.f32.mrf.mxu0 }
 0x44c   : > { %v1146_v32 = vadd.f32 %v1145_v63, %v2069_v0  ;;  %v1214_v7 = vpop.f32.mrf.mxu1 }
 0x44d   : > { %v1279_v33 = vpack.c.bf16 %v1233_v6, %v1164_v57  ;;  %v1215_v1 = vadd.f32 %v1214_v7, %v2069_v0 }
 0x44f   : > { %1287 = vst [vmem:[%s2067_s16 + $0x30] sm:$0xff] %v1279_v33  ;;  %v1264_v50 = vpack.c.bf16 %v1215_v1, %v1146_v32 }
 0x451   : > { %1272 = vst [vmem:[%s2058_s14 + $0x38] sm:$0xff] %v1264_v50  ;;  %v1165_v60 = vpop.f32.mrf.mxu2 }
 0x452   : > { %v1166_v2 = vadd.f32 %v1165_v60, %v981_v34  ;;  %v1234_v3 = vpop.f32.mrf.mxu3 }
 0x453   : > { %v1235_v35 = vadd.f32 %v1234_v3, %v981_v34 }
 0x455   : > { %v1280_v61 = vpack.c.bf16 %v1235_v35, %v1166_v2 }
 0x457   : > { %1288 = vst [vmem:[%s2067_s16 + $0x38] sm:$0xff] %v1280_v61 }
 0x459   : > { %v1168_v4 = vpop.f32.mrf.mxu2 }
 0x45a   : > { %v1169_v5 = vadd.f32 %v1168_v4, %v986_v36  ;;  %v1237_v37 = vpop.f32.mrf.mxu3 }
 0x45b   : > { %v1238_v17 = vadd.f32 %v1237_v37, %v986_v36 }
 0x45d   : > { %v1289_v0 = vpack.c.bf16 %v1238_v17, %v1169_v5 }
 0x45f   : > { %1297 = vst [vmem:[%s2096_s19] sm:$0xff] %v1289_v0 }
 0x461   : > { %v1170_v39 = vpop.f32.mrf.mxu2 }
 0x462   : > { %v1171_v22 = vadd.f32 %v1170_v39, %v991_v38  ;;  %v1239_v10 = vpop.f32.mrf.mxu3 }
 0x463   : > { %v1240_v23 = vadd.f32 %v1239_v10, %v991_v38 }
 0x465   : > { %v1290_v24 = vpack.c.bf16 %v1240_v23, %v1171_v22 }
 0x467   : > { %1298 = vst [vmem:[%s2096_s19 + $0x8] sm:$0xff] %v1290_v24 }
 0x469   : > { %v1173_v25 = vpop.f32.mrf.mxu2 }
 0x46a   : > { %v1174_v11 = vadd.f32 %v1173_v25, %v996_v27  ;;  %v1242_v30 = vpop.f32.mrf.mxu3 }
 0x46b   : > { %v1243_v28 = vadd.f32 %v1242_v30, %v996_v27 }
 0x46d   : > { %v1291_v12 = vpack.c.bf16 %v1243_v28, %v1174_v11 }
 0x46f   : > { %1299 = vst [vmem:[%s2096_s19 + $0x10] sm:$0xff] %v1291_v12 }
 0x471   : > { %v1175_v16 = vpop.f32.mrf.mxu2 }
 0x472   : > { %v1176_v26 = vadd.f32 %v1175_v16, %v1001_v20  ;;  %v1244_v13 = vpop.f32.mrf.mxu3 }
 0x473   : > { %v1245_v29 = vadd.f32 %v1244_v13, %v1001_v20 }
 0x475   : > { %v1292_v21 = vpack.c.bf16 %v1245_v29, %v1176_v26 }
 0x477   : > { %1300 = vst [vmem:[%s2096_s19 + $0x18] sm:$0xff] %v1292_v21 }
 0x479   : > { %v1178_v40 = vpop.f32.mrf.mxu2 }
 0x47a   : > { %v1179_v41 = vadd.f32 %v1178_v40, %v1006_v31  ;;  %v1247_v42 = vpop.f32.mrf.mxu3 }
 0x47b   : > { %v1248_v18 = vadd.f32 %v1247_v42, %v1006_v31 }
 0x47d   : > { %v1293_v19 = vpack.c.bf16 %v1248_v18, %v1179_v41 }
 0x47f   : > { %1301 = vst [vmem:[%s2096_s19 + $0x20] sm:$0xff] %v1293_v19 }
 0x481   : > { %v1180_v44 = vpop.f32.mrf.mxu2 }
 0x482   : > { %v1181_v45 = vadd.f32 %v1180_v44, %v1011_v43  ;;  %v1249_v46 = vpop.f32.mrf.mxu3 }
 0x483   : > { %v1250_v51 = vadd.f32 %v1249_v46, %v1011_v43 }
 0x485   : > { %v1294_v52 = vpack.c.bf16 %v1250_v51, %v1181_v45 }
 0x487   : > { %1302 = vst [vmem:[%s2096_s19 + $0x28] sm:$0xff] %v1294_v52 }
 0x489   : > { %v1183_v48 = vpop.f32.mrf.mxu2 }
 0x48a   : > { %v1184_v58 = vadd.f32 %v1183_v48, %v1016_v14  ;;  %v1252_v49 = vpop.f32.mrf.mxu3 }
 0x48b   : > { %v1253_v9 = vadd.f32 %v1252_v49, %v1016_v14 }
 0x48d   : > { %v1295_v53 = vpack.c.bf16 %v1253_v9, %v1184_v58 }
 0x48f   : > { %1303 = vst [vmem:[%s2096_s19 + $0x30] sm:$0xff] %v1295_v53 }
 0x491   : > { %v1185_v8 = vpop.f32.mrf.mxu2 }
 0x492   : > { %v1186_v15 = vadd.f32 %v1185_v8, %v1021_v54  ;;  %v1254_v55 = vpop.f32.mrf.mxu3 }
 0x493   : > { %v1255_v47 = vadd.f32 %v1254_v55, %v1021_v54 }
 0x495   : > { %v1296_v59 = vpack.c.bf16 %v1255_v47, %v1186_v15 }
 0x497   : > { %1304 = vst [vmem:[%s2096_s19 + $0x38] sm:$0xff] %v1296_v59 }
 0x498 PF: > { %s19_s27 = sadd.s32 1, %s1587_s27  }
 0x499   : > { %p16_p4 = scmp.ge.s32.totalorder %s19_s27, 4  }
 0x49b   :  { %18 = sbr.rel (!%p16_p4) target bundleno = 1 (0x1), region = 98 }

// kernel: spatial_self_attention.3
= control target key start
LH: loop header
LB: loop body
LE: loop exit
PB: predicated region body
PF: predicated region fallthrough
CT: control target
= control target key end

     0   :  { %s3739_s0 = inlined_call_operand.vmem [shape: bf16[2,64,256], index: 0, kind: input, shape index: {}]   ;;  %s3740_s1 = inlined_call_operand.vmem [shape: bf16[2,64,256], index: 1, kind: input, shape index: {}]   ;;  %s3741_s2 = inlined_call_operand.vmem [shape: bf16[2,64,256], index: 2, kind: input, shape index: {}]   ;;  %s3742_s3 = inlined_call_operand.vmem [shape: f32[2,64,256], index: 3, kind: input, shape index: {}]   ;;  %s3743_s4 = inlined_call_operand.vmem [shape: bf16[64,64], index: 4, kind: input, shape index: {}]   ;;  %s3744_s5 = inlined_call_operand.vmem [shape: f32[64,1], index: 5, kind: input, shape index: {}]   ;;  %s3745_s6 = inlined_call_operand.vmem [shape: f32[2,64,256], index: 6, kind: output, shape index: {}]  }
   0x1   :  { %3750 = sst [smem:[#allocation15_spill]] %s3745_s6 }
   0x2   :  { %s2747_s21 = smov 0   ;;  %s2749_s22 = smov 0  }
   0x3   :  { %s2751_s23 = smov 0   ;;  %s2753_s24 = smov 0  }
   0x4   :  { %s2755_s25 = smov 0   ;;  %s2757_s26 = smov 0  }
   0x5   :  { %s2759_s27 = smov 0   ;;  %s2761_s28 = smov 0  }
   0x6   :  { %s2763_s29 = smov 0   ;;  %s2765_s30 = smov 0  }
   0x7   :  { %s2767_s7 = smov 0  }
   0x8 LB: > { %3751 = sst [smem:[#allocation11_spill]] %s2686_s26  ;;  %s28_s8 = sadd.s32 1, %s2694_s28  ;;  %s2706_s7 = sphi %s2767_s7, %s16_s7   ;;  %s2702_s30 = sphi %s2765_s30, %s3823_s30   ;;  %s2698_s29 = sphi %s2763_s29, %s3822_s29   ;;  %s2694_s28 = sphi %s2761_s28, %s3821_s28   ;;  %s2690_s27 = sphi %s2759_s27, %s3820_s27   ;;  %s2686_s26 = sphi %s2757_s26, %s3819_s26   ;;  %s2682_s25 = sphi %s2755_s25, %s3818_s25   ;;  %s2678_s24 = sphi %s2753_s24, %s3817_s24   ;;  %s2674_s23 = sphi %s2751_s23, %s3816_s23   ;;  %s2670_s22 = sphi %s2749_s22, %s3815_s22   ;;  %s2666_s21 = sphi %s2747_s21, %s3814_s21  }
   0x9   : > { %p29_p0 = scmp.ge.s32.totalorder %s28_s8, 2  ;;  %s31_s9 = sadd.s32 1, %s2698_s29 }
   0xa   : > { %p51_p1 = scmp.ne.s32.totalorder %s2678_s24, %s2674_s23  ;;  %p52_p2 = scmp.eq.s32.totalorder %s2706_s7, 0 }
   0xb   : > { %s3825_s8 = smov (%p29_p0, %s28_s8), 0  ;;  %s3827_s9 = smov (!%p29_p0, %s31_s9), %s2698_s29 }
   0xc   : > { %3752 = sst [smem:[#allocation12_spill]] %s3825_s8  ;;  %p33_p3 = scmp.ge.s32.totalorder %s3827_s9, 2 }
   0xd   : > { %s35_s10 = sadd.s32 1, %s2702_s30  ;;  %s2246_s11 = sadd.s32 4294967295, %s2706_s7  }
   0xe   : > { %p2815_p4 = por %p52_p2, %p51_p1  ;;  %s3829_s9 = smov (%p33_p3, %s3827_s9), 0 }
   0xf   : > { %3754 = sst [smem:[#allocation13_spill]] %s3829_s9  ;;  %s3831_s10 = smov (!%p33_p3, %s35_s10), %s2702_s30 }
  0x10   : > { %s68_s13 = ssub.s32 %s2694_s28, %s3825_s8  ;;  %p79_p5 = scmp.ne.s32.totalorder %s2670_s22, %s2666_s21 }
  0x11   : > { %p37_p6 = scmp.ge.s32.totalorder %s3831_s10, 2  ;;  %p209_p7 = scmp.eq.s32.totalorder %s2246_s11, 7 }
  0x12   : > { %s40_s14 = ssub.s32 %s2698_s29, %s3829_s9  ;;  %p2828_p8 = por %p79_p5, %p52_p2 }
  0x13   : > { %s3833_s10 = smov (%p37_p6, %s3831_s10), 0  ;;  %s44_s16 = sadd.s32 1, %s2678_s24 }
  0x14   : > { %3756 = sst [smem:[#allocation14_spill]] %s3833_s10  ;;  %p2838_p9 = por %p209_p7, %p51_p1 }
  0x15   : > { %s39_s18 = ssub.s32 %s2702_s30, %s3833_s10  ;;  %s72_s19 = sadd.s32 1, %s2670_s22 }
  0x16   : > { %s41_s20 = sor.u32 %s40_s14, %s39_s18  ;;  %s69_s8 = sor.u32 %s68_s13, %s39_s18 }
  0x17   : > { %p42_p10 = scmp.eq.s32.totalorder %s41_s20, 0  ;;  %p70_p11 = scmp.eq.s32.totalorder %s69_s8, 0 }
  0x18   : > { %p2249_p12 = scmp.ge.s32.totalorder %s2706_s7, 8 }
  0x19   : > { %s2846_s11 = scalar_select %p42_p10, %s2678_s24, %s44_s16  }
  0x1a   : > { %s2849_s9 = scalar_select %p70_p11, %s2670_s22, %s72_s19  }
  0x1b   : > { %237 = sbr.rel (%p2249_p12) target bundleno = 88 (0x58), region = 24 }
  0x20   : > { %240 = sbr.rel (!%p2815_p4) target bundleno = 46 (0x2e), region = 28  ;;  %s242_s6 = sand.u32 (%p2815_p4), 1, %s2678_s24  }
  0x21   : > { %s2251_s10 = sshll.u32 (%p2815_p4), %s2702_s30, 4  ;;  %s2250_s26 = sshll.u32 (%p2815_p4), %s242_s6, 5 }
  0x22   : > { %s246_s14 = sadd.s32 (%p2815_p4), %s2698_s29, %s2251_s10  ;;  %s244_s19 = scalar_lea.vmem (%p2815_p4), [#allocation6], %s2250_s26 }
  0x23   : > { %s2252_s13 = sshll.u32 (%p2815_p4), %s246_s14, 2 }
  0x24   : > { %s248_s16 = scalar_lea.vmem (%p2815_p4), %s3739_s0, %s2252_s13 }
  0x25   : > { %v265_v0 = vld [vmem:[%s248_s16] sm:$0xf]  ;;  %v267_v1 = vld [vmem:[%s248_s16 + $0x8] sm:$0xf]  ;;  %v269_v2 = vld [vmem:[%s248_s16 + $0x10] sm:$0xf] }
  0x26   : > { %266 = vst [vmem:[%s244_s19] sm:$0xf] %v265_v0  ;;  %v271_v3 = vld [vmem:[%s248_s16 + $0x18] sm:$0xf]  ;;  %v273_v4 = vld [vmem:[%s248_s16 + $0x20] sm:$0xf] }
  0x27   : > { %268 = vst [vmem:[%s244_s19 + $0x4] sm:$0xf] %v267_v1  ;;  %v275_v5 = vld [vmem:[%s248_s16 + $0x28] sm:$0xf]  ;;  %v277_v6 = vld [vmem:[%s248_s16 + $0x30] sm:$0xf] }
  0x28   : > { %270 = vst [vmem:[%s244_s19 + $0x8] sm:$0xf] %v269_v2  ;;  %v279_v7 = vld [vmem:[%s248_s16 + $0x38] sm:$0xf] }
  0x29   : > { %272 = vst [vmem:[%s244_s19 + $0xc] sm:$0xf] %v271_v3 }
  0x2a   : > { %274 = vst [vmem:[%s244_s19 + $0x10] sm:$0xf] %v273_v4 }
  0x2b   : > { %276 = vst [vmem:[%s244_s19 + $0x14] sm:$0xf] %v275_v5 }
  0x2c   : > { %278 = vst [vmem:[%s244_s19 + $0x18] sm:$0xf] %v277_v6 }
  0x2d   : > { %280 = vst [vmem:[%s244_s19 + $0x1c] sm:$0xf] %v279_v7 }
  0x2e PF: > { %320 = sbr.rel (!%p2828_p8) target bundleno = 60 (0x3c), region = 69  ;;  %s322_s6 = sand.u32 (%p2828_p8), 1, %s2670_s22  }
  0x2f   : > { %s2254_s26 = sshll.u32 (%p2828_p8), %s2702_s30, 4  ;;  %s2253_s10 = sshll.u32 (%p2828_p8), %s322_s6, 5 }
  0x30   : > { %s326_s20 = sadd.s32 (%p2828_p8), %s2694_s28, %s2254_s26  ;;  %s324_s16 = scalar_lea.vmem (%p2828_p8), [#allocation7], %s2253_s10 }
  0x31   : > { %s2255_s14 = sshll.u32 (%p2828_p8), %s326_s20, 2 }
  0x32   : > { %s328_s8 = scalar_lea.vmem (%p2828_p8), %s3740_s1, %s2255_s14 }
  0x33   : > { %v345_v8 = vld [vmem:[%s328_s8] sm:$0xf]  ;;  %v347_v9 = vld [vmem:[%s328_s8 + $0x8] sm:$0xf]  ;;  %v349_v10 = vld [vmem:[%s328_s8 + $0x10] sm:$0xf] }
  0x34   : > { %346 = vst [vmem:[%s324_s16] sm:$0xf] %v345_v8  ;;  %v351_v11 = vld [vmem:[%s328_s8 + $0x18] sm:$0xf]  ;;  %v353_v12 = vld [vmem:[%s328_s8 + $0x20] sm:$0xf] }
  0x35   : > { %348 = vst [vmem:[%s324_s16 + $0x4] sm:$0xf] %v347_v9  ;;  %v355_v13 = vld [vmem:[%s328_s8 + $0x28] sm:$0xf]  ;;  %v357_v14 = vld [vmem:[%s328_s8 + $0x30] sm:$0xf] }
  0x36   : > { %350 = vst [vmem:[%s324_s16 + $0x8] sm:$0xf] %v349_v10  ;;  %v359_v15 = vld [vmem:[%s328_s8 + $0x38] sm:$0xf] }
  0x37   : > { %352 = vst [vmem:[%s324_s16 + $0xc] sm:$0xf] %v351_v11 }
  0x38   : > { %354 = vst [vmem:[%s324_s16 + $0x10] sm:$0xf] %v353_v12 }
  0x39   : > { %356 = vst [vmem:[%s324_s16 + $0x14] sm:$0xf] %v355_v13 }
  0x3a   : > { %358 = vst [vmem:[%s324_s16 + $0x18] sm:$0xf] %v357_v14 }
  0x3b   : > { %360 = vst [vmem:[%s324_s16 + $0x1c] sm:$0xf] %v359_v15 }
  0x3c PF: > { %400 = sbr.rel (!%p2828_p8) target bundleno = 74 (0x4a), region = 110  ;;  %s402_s19 = sand.u32 (%p2828_p8), 1, %s2670_s22  }
  0x3d   : > { %s2257_s6 = sshll.u32 (%p2828_p8), %s2702_s30, 4  ;;  %s2256_s26 = sshll.u32 (%p2828_p8), %s402_s19, 5 }
  0x3e   : > { %s406_s10 = sadd.s32 (%p2828_p8), %s2694_s28, %s2257_s6  ;;  %s404_s8 = scalar_lea.vmem (%p2828_p8), [#allocation8], %s2256_s26 }
  0x3f   : > { %s2258_s20 = sshll.u32 (%p2828_p8), %s406_s10, 2 }
  0x40   : > { %s408_s18 = scalar_lea.vmem (%p2828_p8), %s3741_s2, %s2258_s20 }
  0x41   : > { %v425_v16 = vld [vmem:[%s408_s18] sm:$0xf]  ;;  %v427_v17 = vld [vmem:[%s408_s18 + $0x8] sm:$0xf]  ;;  %v429_v18 = vld [vmem:[%s408_s18 + $0x10] sm:$0xf] }
  0x42   : > { %426 = vst [vmem:[%s404_s8] sm:$0xf] %v425_v16  ;;  %v431_v19 = vld [vmem:[%s408_s18 + $0x18] sm:$0xf]  ;;  %v433_v20 = vld [vmem:[%s408_s18 + $0x20] sm:$0xf] }
  0x43   : > { %428 = vst [vmem:[%s404_s8 + $0x4] sm:$0xf] %v427_v17  ;;  %v435_v21 = vld [vmem:[%s408_s18 + $0x28] sm:$0xf]  ;;  %v437_v22 = vld [vmem:[%s408_s18 + $0x30] sm:$0xf] }
  0x44   : > { %430 = vst [vmem:[%s404_s8 + $0x8] sm:$0xf] %v429_v18  ;;  %v439_v23 = vld [vmem:[%s408_s18 + $0x38] sm:$0xf] }
  0x45   : > { %432 = vst [vmem:[%s404_s8 + $0xc] sm:$0xf] %v431_v19 }
  0x46   : > { %434 = vst [vmem:[%s404_s8 + $0x10] sm:$0xf] %v433_v20 }
  0x47   : > { %436 = vst [vmem:[%s404_s8 + $0x14] sm:$0xf] %v435_v21 }
  0x48   : > { %438 = vst [vmem:[%s404_s8 + $0x18] sm:$0xf] %v437_v22 }
  0x49   : > { %440 = vst [vmem:[%s404_s8 + $0x1c] sm:$0xf] %v439_v23 }
  0x4a PF: > { %480 = sbr.rel (!%p2815_p4) target bundleno = 88 (0x58), region = 151  ;;  %s482_s15 = sand.u32 (%p2815_p4), 1, %s2678_s24  }
  0x4b   : > { %s2260_s16 = sshll.u32 (%p2815_p4), %s2702_s30, 4  ;;  %s2259_s19 = sshll.u32 (%p2815_p4), %s482_s15, 6 }
  0x4c   : > { %s486_s6 = sadd.s32 (%p2815_p4), %s2698_s29, %s2260_s16  ;;  %s484_s13 = scalar_lea.vmem (%p2815_p4), [#allocation9], %s2259_s19 }
  0x4d   : > { %s2261_s26 = sshll.u32 (%p2815_p4), %s486_s6, 3 }
  0x4e   : > { %s488_s14 = scalar_lea.vmem (%p2815_p4), %s3742_s3, %s2261_s26 }
  0x4f   : > { %v531_v24 = vld [vmem:[%s488_s14] sm:$0xff]  ;;  %v533_v25 = vld [vmem:[%s488_s14 + $0x10] sm:$0xff] }
  0x50   : > { %v535_v26 = vld [vmem:[%s488_s14 + $0x20] sm:$0xff]  ;;  %532 = vst [vmem:[%s484_s13] sm:$0xff] %v531_v24  ;;  %v537_v27 = vld [vmem:[%s488_s14 + $0x30] sm:$0xff] }
  0x51   : > { %534 = vst [vmem:[%s484_s13 + $0x8] sm:$0xff] %v533_v25  ;;  %v539_v28 = vld [vmem:[%s488_s14 + $0x40] sm:$0xff]  ;;  %v541_v29 = vld [vmem:[%s488_s14 + $0x50] sm:$0xff] }
  0x52   : > { %536 = vst [vmem:[%s484_s13 + $0x10] sm:$0xff] %v535_v26  ;;  %v543_v30 = vld [vmem:[%s488_s14 + $0x60] sm:$0xff]  ;;  %v545_v31 = vld [vmem:[%s488_s14 + $0x70] sm:$0xff] }
  0x53   : > { %538 = vst [vmem:[%s484_s13 + $0x18] sm:$0xff] %v537_v27 }
  0x54   : > { %540 = vst [vmem:[%s484_s13 + $0x20] sm:$0xff] %v539_v28 }
  0x55   : > { %542 = vst [vmem:[%s484_s13 + $0x28] sm:$0xff] %v541_v29 }
  0x56   : > { %544 = vst [vmem:[%s484_s13 + $0x30] sm:$0xff] %v543_v30 }
  0x57   : > { %546 = vst [vmem:[%s484_s13 + $0x38] sm:$0xff] %v545_v31 }
  0x58 PF: > { %p2262_p13 = scmp.ge.s32.totalorder %s2706_s7, 1  ;;  %p551_p0 = scmp.lt.s32.totalorder %s2706_s7, 9 }
  0x5a   : > { %p552_p1 = pnand %p2262_p13, %p551_p0 }
  0x5b   : > { %s558_s12 = sand.u32 (!%p552_p1), 1, %s2674_s23   ;;  %s565_s18 = sand.u32 (!%p552_p1), 1, %s2666_s21  }
  0x5c   : > { %555 = sbr.rel (%p552_p1) target bundleno = 1584 (0x630), region = 189  ;;  %s2263_s8 = sshll.u32 (!%p552_p1), %s558_s12, 5 }
  0x5d   : > { %s2264_s15 = sshll.u32 (!%p552_p1), %s565_s18, 5  ;;  %s2266_s16 = sshll.u32 (!%p552_p1), %s558_s12, 6 }
  0x5e   : > { %s560_s19 = scalar_lea.vmem (!%p552_p1), [#allocation6], %s2263_s8  ;;  %s2888_s6 = scalar_lea.vmem (!%p552_p1), [#allocation7], %s2264_s15 }
  0x5f   : > { %s2890_s26 = scalar_lea.vmem (!%p552_p1), [#allocation8], %s2264_s15  ;;  %s2892_s10 = scalar_lea.vmem (!%p552_p1), [#allocation9], %s2266_s16 }
  0x60   : > { %s2894_s20 = scalar_lea.vmem (!%p552_p1), [#allocation10], %s2266_s16  ;;  %p2268_p2 = scmp.ne.s32.totalorder (!%p552_p1), %s2682_s25, 0 }
  0x62   : > { %623 = sbr.rel (%p2268_p2) target bundleno = 394 (0x18a), region = 209 }
  0x67   : > { %v2388_v32 = vld [vmem:[%s560_s19] sm:$0xff]   ;;  %v2403_v35 = vld [vmem:[%s560_s19 + $0x8] sm:$0xff]   ;;  %v2404_v38 = vld [vmem:[%s560_s19 + $0x10] sm:$0xff]   ;;  %vm688_vm0 = vcmask 519168   ;;  %vm705_vm1 = vcmask 7168   ;;  %v2708_v4 = vmov -inf  }
  0x68   : > { %v2389_v33 = vunpack.c.l.bf16 %v2388_v32  ;;  %v2390_v34 = vunpack.c.h.bf16 %v2388_v32  ;;  %v2393_v36 = vunpack.c.l.bf16 %v2403_v35  ;;  %v2394_v37 = vunpack.c.h.bf16 %v2403_v35  ;;  %v2405_v41 = vld [vmem:[%s560_s19 + $0x18] sm:$0xff]   ;;  %706 = vst.msk [vmem:[#allocation4] sm:$0xff] %vm705_vm1, %v2708_v4 }
  0x69   : > { %v2397_v39 = vunpack.c.l.bf16 %v2404_v38  ;;  %v2398_v40 = vunpack.c.h.bf16 %v2404_v38  ;;  %v2401_v42 = vunpack.c.l.bf16 %v2405_v41  ;;  %v2402_v43 = vunpack.c.h.bf16 %v2405_v41  ;;  %707 = vst.msk [vmem:[#allocation4 + $0x8] sm:$0xff] %vm705_vm1, %v2708_v4 }
  0x6a   : > { %640 = vxpose.xlu0.b32.start [1/8] (short) %v2389_v33, 128  ;;  %708 = vst.msk [vmem:[#allocation4 + $0x10] sm:$0xff] %vm705_vm1, %v2708_v4  ;;  %v2709_v9 = vmov 0.0   ;;  %vm738_vm2 = vcmask 523264  }
  0x6b   : > { %709 = vst.msk [vmem:[#allocation4 + $0x18] sm:$0xff] %vm705_vm1, %v2708_v4 }
  0x6c   : > { %710 = vst.msk [vmem:[#allocation4 + $0x20] sm:$0xff] %vm705_vm1, %v2708_v4 }
  0x6d   : > { %711 = vst.msk [vmem:[#allocation4 + $0x28] sm:$0xff] %vm705_vm1, %v2708_v4 }
  0x6e   : > { %712 = vst.msk [vmem:[#allocation4 + $0x30] sm:$0xff] %vm705_vm1, %v2708_v4 }
  0x6f   : > { %713 = vst.msk [vmem:[#allocation4 + $0x38] sm:$0xff] %vm705_vm1, %v2708_v4 }
  0x70   : > { %714 = vst.msk [vmem:[#allocation4 + $0x40] sm:$0xff] %vm705_vm1, %v2708_v4 }
  0x71   : > { %715 = vst.msk [vmem:[#allocation4 + $0x48] sm:$0xff] %vm705_vm1, %v2708_v4 }
  0x72   : > { %641 = vxpose.xlu0.b32.cont [2/8] (short) %v2390_v34, 128  ;;  %716 = vst.msk [vmem:[#allocation4 + $0x50] sm:$0xff] %vm705_vm1, %v2708_v4 }
  0x73   : > { %717 = vst.msk [vmem:[#allocation4 + $0x58] sm:$0xff] %vm705_vm1, %v2708_v4 }
  0x74   : > { %718 = vst.msk [vmem:[#allocation4 + $0x60] sm:$0xff] %vm705_vm1, %v2708_v4 }
  0x75   : > { %719 = vst.msk [vmem:[#allocation4 + $0x68] sm:$0xff] %vm705_vm1, %v2708_v4 }
  0x76   : > { %720 = vst.msk [vmem:[#allocation4 + $0x70] sm:$0xff] %vm705_vm1, %v2708_v4 }
  0x77   : > { %721 = vst.msk [vmem:[#allocation4 + $0x78] sm:$0xff] %vm705_vm1, %v2708_v4 }
  0x78   : > { %722 = vst.msk [vmem:[#allocation5] sm:$0xff] %vm705_vm1, %v2709_v9 }
  0x79   : > { %723 = vst.msk [vmem:[#allocation5 + $0x8] sm:$0xff] %vm705_vm1, %v2709_v9 }
  0x7a   : > { %642 = vxpose.xlu0.b32.cont [3/8] (short) %v2393_v36, 128  ;;  %724 = vst.msk [vmem:[#allocation5 + $0x10] sm:$0xff] %vm705_vm1, %v2709_v9 }
  0x7b   : > { %725 = vst.msk [vmem:[#allocation5 + $0x18] sm:$0xff] %vm705_vm1, %v2709_v9 }
  0x7c   : > { %726 = vst.msk [vmem:[#allocation5 + $0x20] sm:$0xff] %vm705_vm1, %v2709_v9 }
  0x7d   : > { %727 = vst.msk [vmem:[#allocation5 + $0x28] sm:$0xff] %vm705_vm1, %v2709_v9 }
  0x7e   : > { %728 = vst.msk [vmem:[#allocation5 + $0x30] sm:$0xff] %vm705_vm1, %v2709_v9 }
  0x7f   : > { %729 = vst.msk [vmem:[#allocation5 + $0x38] sm:$0xff] %vm705_vm1, %v2709_v9 }
  0x80   : > { %730 = vst.msk [vmem:[#allocation5 + $0x40] sm:$0xff] %vm705_vm1, %v2709_v9 }
  0x81   : > { %731 = vst.msk [vmem:[#allocation5 + $0x48] sm:$0xff] %vm705_vm1, %v2709_v9 }
  0x82   : > { %643 = vxpose.xlu0.b32.cont [4/8] (short) %v2394_v37, 128  ;;  %732 = vst.msk [vmem:[#allocation5 + $0x50] sm:$0xff] %vm705_vm1, %v2709_v9 }
  0x83   : > { %733 = vst.msk [vmem:[#allocation5 + $0x58] sm:$0xff] %vm705_vm1, %v2709_v9 }
  0x84   : > { %734 = vst.msk [vmem:[#allocation5 + $0x60] sm:$0xff] %vm705_vm1, %v2709_v9 }
  0x85   : > { %735 = vst.msk [vmem:[#allocation5 + $0x68] sm:$0xff] %vm705_vm1, %v2709_v9 }
  0x86   : > { %736 = vst.msk [vmem:[#allocation5 + $0x70] sm:$0xff] %vm705_vm1, %v2709_v9 }
  0x87   : > { %737 = vst.msk [vmem:[#allocation5 + $0x78] sm:$0xff] %vm705_vm1, %v2709_v9 }
  0x88   : > { %739 = vst.msk [vmem:[#allocation3] sm:$0xff] %vm738_vm2, %v2709_v9 }
  0x89   : > { %740 = vst.msk [vmem:[#allocation3 + $0x8] sm:$0xff] %vm738_vm2, %v2709_v9 }
  0x8a   : > { %644 = vxpose.xlu0.b32.cont [5/8] (short) %v2397_v39, 128  ;;  %741 = vst.msk [vmem:[#allocation3 + $0x10] sm:$0xff] %vm738_vm2, %v2709_v9 }
  0x8b   : > { %742 = vst.msk [vmem:[#allocation3 + $0x18] sm:$0xff] %vm738_vm2, %v2709_v9 }
  0x8c   : > { %743 = vst.msk [vmem:[#allocation3 + $0x20] sm:$0xff] %vm738_vm2, %v2709_v9 }
  0x8d   : > { %744 = vst.msk [vmem:[#allocation3 + $0x28] sm:$0xff] %vm738_vm2, %v2709_v9 }
  0x8e   : > { %745 = vst.msk [vmem:[#allocation3 + $0x30] sm:$0xff] %vm738_vm2, %v2709_v9 }
  0x8f   : > { %746 = vst.msk [vmem:[#allocation3 + $0x38] sm:$0xff] %vm738_vm2, %v2709_v9 }
  0x90   : > { %747 = vst.msk [vmem:[#allocation3 + $0x40] sm:$0xff] %vm738_vm2, %v2709_v9 }
  0x91   : > { %748 = vst.msk [vmem:[#allocation3 + $0x48] sm:$0xff] %vm738_vm2, %v2709_v9 }
  0x92   : > { %645 = vxpose.xlu0.b32.cont [6/8] (short) %v2398_v40, 128  ;;  %749 = vst.msk [vmem:[#allocation3 + $0x50] sm:$0xff] %vm738_vm2, %v2709_v9 }
  0x93   : > { %750 = vst.msk [vmem:[#allocation3 + $0x58] sm:$0xff] %vm738_vm2, %v2709_v9 }
  0x94   : > { %751 = vst.msk [vmem:[#allocation3 + $0x60] sm:$0xff] %vm738_vm2, %v2709_v9 }
  0x95   : > { %752 = vst.msk [vmem:[#allocation3 + $0x68] sm:$0xff] %vm738_vm2, %v2709_v9 }
  0x96   : > { %753 = vst.msk [vmem:[#allocation3 + $0x70] sm:$0xff] %vm738_vm2, %v2709_v9 }
  0x97   : > { %754 = vst.msk [vmem:[#allocation3 + $0x78] sm:$0xff] %vm738_vm2, %v2709_v9 }
  0x9a   : > { %646 = vxpose.xlu0.b32.cont [7/8] (short) %v2401_v42, 128 }
  0xa2   : > { %647 = vxpose.xlu0.b32.end [8/8] (short) %v2402_v43, 128 }
 0x10e   : > { %v656_v44 = vpop.trf.xlu0 }
 0x10f   : > { %v672_v45 = vpack.c.bf16 %v656_v44, %v656_v44 }
 0x111   : > { %689 = vst.msk [vmem:[#allocation2] sm:$0xf] %vm688_vm0, %v672_v45 }
 0x116   : > { %v657_v46 = vpop.trf.xlu0 }
 0x117   : > { %v673_v47 = vpack.c.bf16 %v657_v46, %v657_v46 }
 0x119   : > { %690 = vst.msk [vmem:[#allocation2 + $0x4] sm:$0xf] %vm688_vm0, %v673_v47 }
 0x11e   : > { %v658_v48 = vpop.trf.xlu0 }
 0x11f   : > { %v674_v49 = vpack.c.bf16 %v658_v48, %v658_v48 }
 0x121   : > { %691 = vst.msk [vmem:[#allocation2 + $0x8] sm:$0xf] %vm688_vm0, %v674_v49 }
 0x126   : > { %v659_v50 = vpop.trf.xlu0 }
 0x127   : > { %v675_v51 = vpack.c.bf16 %v659_v50, %v659_v50 }
 0x129   : > { %692 = vst.msk [vmem:[#allocation2 + $0xc] sm:$0xf] %vm688_vm0, %v675_v51 }
 0x12e   : > { %v660_v52 = vpop.trf.xlu0 }
 0x12f   : > { %v676_v53 = vpack.c.bf16 %v660_v52, %v660_v52 }
 0x131   : > { %693 = vst.msk [vmem:[#allocation2 + $0x10] sm:$0xf] %vm688_vm0, %v676_v53 }
 0x136   : > { %v661_v54 = vpop.trf.xlu0 }
 0x137   : > { %v677_v55 = vpack.c.bf16 %v661_v54, %v661_v54 }
 0x139   : > { %694 = vst.msk [vmem:[#allocation2 + $0x14] sm:$0xf] %vm688_vm0, %v677_v55 }
 0x13e   : > { %v662_v56 = vpop.trf.xlu0 }
 0x13f   : > { %v678_v57 = vpack.c.bf16 %v662_v56, %v662_v56 }
 0x141   : > { %695 = vst.msk [vmem:[#allocation2 + $0x18] sm:$0xf] %vm688_vm0, %v678_v57 }
 0x146   : > { %v663_v58 = vpop.trf.xlu0 }
 0x147   : > { %v679_v59 = vpack.c.bf16 %v663_v58, %v663_v58 }
 0x149   : > { %696 = vst.msk [vmem:[#allocation2 + $0x1c] sm:$0xf] %vm688_vm0, %v679_v59 }
 0x14e   : > { %v664_v60 = vpop.trf.xlu0 }
 0x14f   : > { %v680_v61 = vpack.c.bf16 %v664_v60, %v664_v60 }
 0x151   : > { %697 = vst.msk [vmem:[#allocation2 + $0x20] sm:$0xf] %vm688_vm0, %v680_v61 }
 0x156   : > { %v665_v62 = vpop.trf.xlu0 }
 0x157   : > { %v681_v63 = vpack.c.bf16 %v665_v62, %v665_v62 }
 0x159   : > { %698 = vst.msk [vmem:[#allocation2 + $0x24] sm:$0xf] %vm688_vm0, %v681_v63 }
 0x15e   : > { %v666_v0 = vpop.trf.xlu0 }
 0x15f   : > { %v682_v1 = vpack.c.bf16 %v666_v0, %v666_v0 }
 0x161   : > { %699 = vst.msk [vmem:[#allocation2 + $0x28] sm:$0xf] %vm688_vm0, %v682_v1 }
 0x166   : > { %v667_v2 = vpop.trf.xlu0 }
 0x167   : > { %v683_v3 = vpack.c.bf16 %v667_v2, %v667_v2 }
 0x169   : > { %700 = vst.msk [vmem:[#allocation2 + $0x2c] sm:$0xf] %vm688_vm0, %v683_v3 }
 0x16e   : > { %v668_v5 = vpop.trf.xlu0 }
 0x16f   : > { %v684_v6 = vpack.c.bf16 %v668_v5, %v668_v5 }
 0x171   : > { %701 = vst.msk [vmem:[#allocation2 + $0x30] sm:$0xf] %vm688_vm0, %v684_v6 }
 0x176   : > { %v669_v7 = vpop.trf.xlu0 }
 0x177   : > { %v685_v8 = vpack.c.bf16 %v669_v7, %v669_v7 }
 0x179   : > { %702 = vst.msk [vmem:[#allocation2 + $0x34] sm:$0xf] %vm688_vm0, %v685_v8 }
 0x17e   : > { %v670_v10 = vpop.trf.xlu0 }
 0x17f   : > { %v686_v11 = vpack.c.bf16 %v670_v10, %v670_v10 }
 0x181   : > { %703 = vst.msk [vmem:[#allocation2 + $0x38] sm:$0xf] %vm688_vm0, %v686_v11 }
 0x186   : > { %v671_v12 = vpop.trf.xlu0 }
 0x187   : > { %v687_v13 = vpack.c.bf16 %v671_v12, %v671_v12 }
 0x189   : > { %704 = vst.msk [vmem:[#allocation2 + $0x3c] sm:$0xf] %vm688_vm0, %v687_v13 }
 0x18a PF: > { %v2378_v14 = vld [vmem:[%s2888_s6 + $0x18] sm:$0xff]  ;;  %v2377_v15 = vld [vmem:[%s2888_s6 + $0x10] sm:$0xff]  ;;  %v2376_v16 = vld [vmem:[%s2888_s6 + $0x8] sm:$0xff]  ;;  %vm3749_vm3 = vcmask 523264   ;;  %v2710_v42 = vmov 0   ;;  %vm1237_vm4 = vcmask 7168  }
 0x18b   : > { %872 = vmatpush.bf16.msra.mxu0 %v2378_v14  ;;  %2406 = vmatpush.bf16.msra.mxu3 %v2378_v14  ;;  %v2375_v17 = vld [vmem:[%s2888_s6] sm:$0xff]  ;;  %v2368_v19 = vld [vmem:[#allocation2 + $0x8] sm:$0xff]  ;;  %v2369_v21 = vld [vmem:[#allocation2 + $0x10] sm:$0xff]  ;;  %p2341_p3 = scmp.ne.s32.totalorder %s2682_s25, 1 }
 0x18c   : > { %v2367_v18 = vld [vmem:[#allocation2] sm:$0xff]  ;;  %v2372_v20 = vld [vmem:[#allocation2 + $0x28] sm:$0xff]  ;;  %v2373_v22 = vld [vmem:[#allocation2 + $0x30] sm:$0xff]  ;;  %2518 = vset.pattern.permute.xlu1 %v2710_v42  ;;  %2519 = vset.pattern.permute.xlu2 %v2710_v42 }
 0x18d   : > { %v2370_v23 = vld [vmem:[#allocation2 + $0x18] sm:$0xff]  ;;  %v2371_v25 = vld [vmem:[#allocation2 + $0x20] sm:$0xff]  ;;  %2520 = vset.pattern.permute.xlu0 %v2710_v42  ;;  %v3031_v47 = vld [vmem:[#allocation4 + $0x8] sm:$0xff] }
 0x18e   : > { %v3021_v43 = vld [vmem:[#allocation4] sm:$0xff]  ;;  %v3041_v51 = vld [vmem:[#allocation4 + $0x10] sm:$0xff]  ;;  %v3051_v55 = vld [vmem:[#allocation4 + $0x18] sm:$0xff] }
 0x18f   : > { %873 = vmatpush.bf16.msra.mxu0 %v2377_v15  ;;  %2407 = vmatpush.bf16.msra.mxu3 %v2377_v15  ;;  %v3060_v59 = vld [vmem:[#allocation4 + $0x20] sm:$0xff]  ;;  %v3069_v63 = vld [vmem:[#allocation4 + $0x28] sm:$0xff]  ;;  %v3076_v2 = vld [vmem:[#allocation4 + $0x30] sm:$0xff] }
 0x190   : > { %v2374_v24 = vld [vmem:[#allocation2 + $0x38] sm:$0xff]  ;;  %v3092_v9 = vld [vmem:[#allocation4 + $0x40] sm:$0xff]  ;;  %v3094_v10 = vld [vmem:[#allocation4 + $0x50] sm:$0xff] }
 0x191   : > { %v3085_v6 = vld [vmem:[#allocation4 + $0x38] sm:$0xff] }
 0x192   : > { %v2382_v15 = vld [vmem:[%s2890_s26 + $0x18] sm:$0xff] }
 0x193   : > { %874 = vmatpush.bf16.msra.mxu0 %v2376_v16  ;;  %2408 = vmatpush.bf16.msra.mxu3 %v2376_v16  ;;  %v3108_v16 = vld [vmem:[#allocation4 + $0x48] sm:$0xff] }
 0x194   : > { %1298 = vmatpush.bf16.xpose.msra.mxu1 %v2382_v15  ;;  %2410 = vmatpush.bf16.xpose.msra.mxu2 %v2382_v15 }
 0x197   : > { %875 = vmatpush.bf16.msra.mxu0 %v2375_v17  ;;  %2409 = vmatpush.bf16.msra.mxu3 %v2375_v17  ;;  %v3110_v17 = vld [vmem:[#allocation4 + $0x58] sm:$0xff] }
 0x19a   : > { %2317 = vmatmul.msk.bf16.vlgmr.msra.gmra.mxu0 %vm3749_vm3, %v2367_v18  ;;  %2322 = vmatmul.msk.bf16.vlgmr.msra.gmra.mxu3 %vm3749_vm3, %v2372_v20  ;;  %v3112_v18 = vld [vmem:[#allocation4 + $0x68] sm:$0xff] }
 0x1aa   : > { %2318 = vmatmul.msk.bf16.gmra.mxu0 %vm3749_vm3, %v2368_v19  ;;  %2323 = vmatmul.msk.bf16.gmra.mxu3 %vm3749_vm3, %v2373_v22 }
 0x1ba   : > { %2319 = vmatmul.msk.bf16.gmra.mxu0 %vm3749_vm3, %v2369_v21  ;;  %2324 = vmatmul.msk.bf16.gmra.mxu3 %vm3749_vm3, %v2374_v24 }
 0x1ca   : > { %2320 = vmatmul.msk.bf16.gmra.mxu0 %vm3749_vm3, %v2370_v23 }
 0x1da   : > { %2321 = vmatmul.msk.bf16.gmra.mxu0 %vm3749_vm3, %v2371_v25  ;;  %v2381_v25 = vld [vmem:[%s2890_s26 + $0x10] sm:$0xff] }
 0x1db   : > { %1299 = vmatpush.bf16.xpose.msra.mxu1 %v2381_v25  ;;  %2411 = vmatpush.bf16.xpose.msra.mxu2 %v2381_v25 }
 0x217   : > { %v2973_v26 = vpop.f32.mrf.mxu0 }
 0x218   : > { %933 = vmax.xlane.f32.xlu0 %v2973_v26 }
 0x21d   : > { %v2988_v31 = vpop.f32.mrf.mxu3 }
 0x21f   : > { %v2976_v27 = vpop.f32.mrf.mxu0 }
 0x220   : > { %935 = vmax.xlane.f32.xlu0 %v2976_v27 }
 0x225   : > { %v2993_v33 = vpop.f32.mrf.mxu3 }
 0x227   : > { %v2979_v28 = vpop.f32.mrf.mxu0 }
 0x228   : > { %937 = vmax.xlane.f32.xlu1 %v2979_v28 }
 0x22d   : > { %v3000_v36 = vpop.f32.mrf.mxu3 }
 0x22f   : > { %v2982_v29 = vpop.f32.mrf.mxu0 }
 0x230   : > { %939 = vmax.xlane.f32.xlu1 %v2982_v29 }
 0x235   : > { %v3007_v38 = vpop.f32.mrf.mxu3 }
 0x237   : > { %v2985_v30 = vpop.f32.mrf.mxu0 }
 0x238   : > { %941 = vmax.xlane.f32.xlu2 %v2985_v30 }
 0x23d   : > { %v3014_v40 = vpop.f32.mrf.mxu3 }
 0x23f   : > { %v2990_v32 = vpop.f32.mrf.mxu0 }
 0x240   : > { %943 = vmax.xlane.f32.xlu2 %v2990_v32 }
 0x245   : > { %v3018_v41 = vpop.f32.mrf.mxu3 }
 0x247   : > { %v2995_v34 = vpop.f32.mrf.mxu0 }
 0x248   : > { %945 = vmax.xlane.f32.xlu0 %v2995_v34 }
 0x24f   : > { %v2998_v35 = vpop.f32.mrf.mxu0 }
 0x250   : > { %947 = vmax.xlane.f32.xlu1 %v2998_v35 }
 0x257   : > { %v3003_v37 = vpop.f32.mrf.mxu0 }
 0x258   : > { %949 = vmax.xlane.f32.xlu2 %v3003_v37  ;;  %953 = vmax.xlane.f32.xlu1 %v2988_v31 }
 0x25f   : > { %v3009_v39 = vpop.f32.mrf.mxu0 }
 0x260   : > { %951 = vmax.xlane.f32.xlu0 %v3009_v39  ;;  %955 = vmax.xlane.f32.xlu2 %v2993_v33 }
 0x261   : > { %959 = vmax.xlane.f32.xlu1 %v3007_v38 }
 0x268   : > { %957 = vmax.xlane.f32.xlu0 %v3000_v36  ;;  %961 = vmax.xlane.f32.xlu2 %v3014_v40 }
 0x270   : > { %963 = vmax.xlane.f32.xlu0 %v3018_v41 }
 0x28b   : > { %v934_v44 = vpop.xlane.xlu0 %933 }
 0x28c   : > { %v3024_v45 = vmax.f32 %v3021_v43, %v934_v44  ;;  %v3131_v44 = vld [vmem:[#allocation4 + $0x60] sm:$0xff] }
 0x28e   : > { %v981_v46 = vsub.f32 %v3021_v43, %v3024_v45  ;;  %1487 = vst.msk [vmem:[#allocation4] sm:$0xff] %vm1237_vm4, %v3024_v45  ;;  %1031 = vperm.xlu1 %2518, %v3024_v45  }
 0x293   : > { %v936_v48 = vpop.xlane.xlu0 %935 }
 0x294   : > { %v3034_v49 = vmax.f32 %v3031_v47, %v936_v48  ;;  %v3133_v48 = vld [vmem:[#allocation4 + $0x70] sm:$0xff] }
 0x296   : > { %v982_v50 = vsub.f32 %v3031_v47, %v3034_v49  ;;  %1488 = vst.msk [vmem:[#allocation4 + $0x8] sm:$0xff] %vm1237_vm4, %v3034_v49  ;;  %1036 = vperm.xlu2 %2519, %v3034_v49   ;;  %v997_v47 = vmul.f32 1.442695, %v981_v46 }
 0x29b   : > { %v938_v52 = vpop.xlane.xlu1 %937 }
 0x29c   : > { %v3044_v53 = vmax.f32 %v3041_v51, %v938_v52 }
 0x29e   : > { %v983_v54 = vsub.f32 %v3041_v51, %v3044_v53  ;;  %1489 = vst.msk [vmem:[#allocation4 + $0x10] sm:$0xff] %vm1237_vm4, %v3044_v53  ;;  %1041 = vperm.xlu0 %2520, %v3044_v53  }
 0x2a0   : > { %v1001_v25 = vmul.f32 1.442695, %v983_v54 }
 0x2a3   : > { %v940_v56 = vpop.xlane.xlu1 %939 }
 0x2a4   : > { %v3054_v57 = vmax.f32 %v3051_v55, %v940_v56 }
 0x2a6   : > { %v984_v58 = vsub.f32 %v3051_v55, %v3054_v57  ;;  %1490 = vst.msk [vmem:[#allocation4 + $0x18] sm:$0xff] %vm1237_vm4, %v3054_v57 }
 0x2a8   : > { %v1003_v46 = vmul.f32 1.442695, %v984_v58 }
 0x2ab   : > { %v942_v60 = vpop.xlane.xlu2 %941 }
 0x2ac   : > { %v3063_v61 = vmax.f32 %v3060_v59, %v942_v60 }
 0x2ae   : > { %v985_v62 = vsub.f32 %v3060_v59, %v3063_v61  ;;  %1491 = vst.msk [vmem:[#allocation4 + $0x20] sm:$0xff] %vm1237_vm4, %v3063_v61 }
 0x2b3   : > { %v944_v0 = vpop.xlane.xlu2 %943 }
 0x2b4   : > { %v3072_v1 = vmax.f32 %v3069_v63, %v944_v0 }
 0x2b6   : > { %1492 = vst.msk [vmem:[#allocation4 + $0x28] sm:$0xff] %vm1237_vm4, %v3072_v1 }
 0x2bb   : > { %v946_v3 = vpop.xlane.xlu0 %945 }
 0x2bc   : > { %v3079_v4 = vmax.f32 %v3076_v2, %v946_v3 }
 0x2be   : > { %v987_v5 = vsub.f32 %v3076_v2, %v3079_v4  ;;  %1493 = vst.msk [vmem:[#allocation4 + $0x30] sm:$0xff] %vm1237_vm4, %v3079_v4 }
 0x2c3   : > { %v948_v7 = vpop.xlane.xlu1 %947 }
 0x2c4   : > { %v3088_v8 = vmax.f32 %v3085_v6, %v948_v7  ;;  %v2380_v7 = vld [vmem:[%s2890_s26 + $0x8] sm:$0xff] }
 0x2c5   : > { %1300 = vmatpush.bf16.xpose.msra.mxu1 %v2380_v7  ;;  %2412 = vmatpush.bf16.xpose.msra.mxu2 %v2380_v7 }
 0x2c6   : > { %1494 = vst.msk [vmem:[#allocation4 + $0x38] sm:$0xff] %vm1237_vm4, %v3088_v8  ;;  %v988_v43 = vsub.f32 %v3085_v6, %v3088_v8 }
 0x2cb   : > { %v950_v11 = vpop.xlane.xlu2 %949  ;;  %v954_v12 = vpop.xlane.xlu1 %953 }
 0x2cc   : > { %v3097_v13 = vmax.f32 %v3092_v9, %v950_v11  ;;  %v3100_v14 = vmax.f32 %v3094_v10, %v954_v12  ;;  %v3150_v11 = vld [vmem:[#allocation4 + $0x78] sm:$0xff] }
 0x2ce   : > { %1495 = vst.msk [vmem:[#allocation4 + $0x40] sm:$0xff] %vm1237_vm4, %v3097_v13  ;;  %1071 = vperm.xlu2 %2519, %v3097_v13   ;;  %v989_v6 = vsub.f32 %v3092_v9, %v3097_v13  ;;  %v991_v55 = vsub.f32 %v3094_v10, %v3100_v14 }
 0x2cf   : > { %1497 = vst.msk [vmem:[#allocation4 + $0x50] sm:$0xff] %vm1237_vm4, %v3100_v14 }
 0x2d0   : > { %v1017_v9 = vmul.f32 1.442695, %v991_v55 }
 0x2d3   : > { %v952_v19 = vpop.xlane.xlu0 %951  ;;  %v956_v20 = vpop.xlane.xlu2 %955 }
 0x2d4   : > { %v3115_v21 = vmax.f32 %v3108_v16, %v952_v19  ;;  %v976_v22 = vmax.f32 %v3110_v17, %v956_v20  ;;  %v960_v23 = vpop.xlane.xlu1 %959  ;;  %v2379_v20 = vld [vmem:[%s2890_s26] sm:$0xff] }
 0x2d5   : > { %v3119_v24 = vmax.f32 %v3112_v18, %v960_v23  ;;  %1301 = vmatpush.bf16.xpose.msra.mxu1 %v2379_v20  ;;  %2413 = vmatpush.bf16.xpose.msra.mxu2 %v2379_v20  ;;  %v999_v23 = vmul.f32 1.442695, %v982_v50  ;;  %v1005_v50 = vmul.f32 1.442695, %v985_v62  ;;  %v1011_v62 = vmul.f32 1.442695, %v988_v43 }
 0x2d6   : > { %1496 = vst.msk [vmem:[#allocation4 + $0x48] sm:$0xff] %vm1237_vm4, %v3115_v21  ;;  %1046 = vperm.xlu2 %2519, %v3054_v57   ;;  %1076 = vperm.xlu1 %2518, %v3115_v21   ;;  %v992_v54 = vsub.f32 %v3110_v17, %v976_v22 }
 0x2d7   : > { %1498 = vst.msk [vmem:[#allocation4 + $0x58] sm:$0xff] %vm1237_vm4, %v976_v22  ;;  %v994_v42 = vsub.f32 %v3112_v18, %v3119_v24  ;;  %2521 = vpow2.f32 %v999_v23 }
 0x2d8   : > { %1500 = vst.msk [vmem:[#allocation4 + $0x68] sm:$0xff] %vm1237_vm4, %v3119_v24  ;;  %2523 = vpow2.f32 %v1001_v25  ;;  %v1019_v59 = vmul.f32 1.442695, %v992_v54 }
 0x2d9   : > { %2525 = vpow2.f32 %v997_v47 }
 0x2db   : > { %v958_v52 = vpop.xlane.xlu0 %957  ;;  %v962_v56 = vpop.xlane.xlu2 %961 }
 0x2dc   : > { %v3136_v60 = vmax.f32 %v3131_v44, %v958_v52  ;;  %v3139_v0 = vmax.f32 %v3133_v48, %v962_v56  ;;  %v986_v52 = vsub.f32 %v3069_v63, %v3072_v1 }
 0x2dd   : > { %v3180_v51 = vpop.eup %2521 }
 0x2de   : > { %1499 = vst.msk [vmem:[#allocation4 + $0x60] sm:$0xff] %vm1237_vm4, %v3136_v60  ;;  %1086 = vperm.xlu2 %2519, %v976_v22   ;;  %1081 = vperm.xlu1 %2518, %v3100_v14   ;;  %v995_v3 = vsub.f32 %v3133_v48, %v3139_v0  ;;  %v1007_v49 = vmul.f32 1.442695, %v986_v52  ;;  %v3182_v53 = vpop.eup %2523  ;;  %v1013_v22 = vmul.f32 1.442695, %v989_v6 }
 0x2df   : > { %1091 = vperm.xlu0 %2520, %v3136_v60   ;;  %1501 = vst.msk [vmem:[#allocation4 + $0x70] sm:$0xff] %vm1237_vm4, %v3139_v0 }
 0x2e0   : > { %2527 = vpow2.f32 %v1007_v49 }
 0x2e1   : > { %2529 = vpow2.f32 %v1005_v50 }
 0x2e2   : > { %2531 = vpow2.f32 %v1003_v46 }
 0x2e3   : > { %v964_v12 = vpop.xlane.xlu0 %963  ;;  %2533 = vpow2.f32 %v1019_v59 }
 0x2e4   : > { %v3153_v15 = vmax.f32 %v3150_v11, %v964_v12  ;;  %2535 = vpow2.f32 %v1011_v62 }
 0x2e6   : > { %1096 = vperm.xlu2 %2519, %v3119_v24   ;;  %1051 = vperm.xlu1 %2518, %v3063_v61   ;;  %v996_v19 = vsub.f32 %v3150_v11, %v3153_v15  ;;  %1502 = vst.msk [vmem:[#allocation4 + $0x78] sm:$0xff] %vm1237_vm4, %v3153_v15  ;;  %v3193_v61 = vpop.eup %2525  ;;  %v1344_v24 = vld [vmem:[#allocation3 + $0x8] sm:$0xff] }
 0x2e7   : > { %1101 = vperm.xlu0 %2520, %v3139_v0  }
 0x2ee   : > { %1056 = vperm.xlu1 %2518, %v3072_v1   ;;  %1106 = vperm.xlu2 %2519, %v3153_v15   ;;  %v3196_v1 = vpop.eup %2527 }
 0x2ef   : > { %1066 = vperm.xlu0 %2520, %v3088_v8   ;;  %v3198_v17 = vpop.eup %2529  ;;  %v1009_v8 = vmul.f32 1.442695, %v987_v5 }
 0x2f0   : > { %v1037_v45 = vpop.permute.xlu2 %1036  ;;  %v3211_v7 = vpop.eup %2531 }
 0x2f1   : > { %v1110_v63 = vsub.f32 %v2976_v27, %v1037_v45  ;;  %v3213_v13 = vpop.eup %2533 }
 0x2f2   : > { %v3215_v12 = vpop.eup %2535 }
 0x2f3   : > { %v1127_v27 = vmul.f32 1.442695, %v1110_v63 }
 0x2f5   : > { %2537 = vpow2.f32 %v1127_v27 }
 0x2f6   : > { %1061 = vperm.xlu1 %2518, %v3079_v4   ;;  %1366 = vperm.xlu2 %2519, %v3180_v51  }
 0x2f7   : > { %1371 = vperm.xlu0 %2520, %v3182_v53  }
 0x2fb   : > { %v3222_v2 = vpop.eup %2537 }
 0x2fe   : > { %1361 = vperm.xlu1 %2518, %v3193_v61   ;;  %1386 = vperm.xlu2 %2519, %v3196_v1  }
 0x2ff   : > { %1381 = vperm.xlu0 %2520, %v3198_v17  }
 0x300   : > { %v1032_v57 = vpop.permute.xlu1 %1031 }
 0x301   : > { %v1109_v58 = vsub.f32 %v2973_v26, %v1032_v57  ;;  %v993_v26 = vsub.f32 %v3131_v44, %v3136_v60  ;;  %v990_v44 = vsub.f32 %v3108_v16, %v3115_v21 }
 0x303   : > { %v1125_v56 = vmul.f32 1.442695, %v1109_v58  ;;  %v1021_v5 = vmul.f32 1.442695, %v993_v26  ;;  %v1015_v60 = vmul.f32 1.442695, %v990_v44 }
 0x305   : > { %2539 = vpow2.f32 %v1125_v56 }
 0x306   : > { %2541 = vpow2.f32 %v1009_v8  ;;  %1376 = vperm.xlu1 %2518, %v3211_v7   ;;  %1416 = vperm.xlu2 %2519, %v3213_v13  }
 0x307   : > { %2543 = vpow2.f32 %v1013_v22  ;;  %1396 = vperm.xlu0 %2520, %v3215_v12  }
 0x308   : > { %2545 = vpow2.f32 %v1017_v9 }
 0x309   : > { %2547 = vpow2.f32 %v1021_v5 }
 0x30a   : > { %2549 = vpow2.f32 %v1015_v60 }
 0x30b   : > { %v2540_v4 = vpop.eup %2539 }
 0x30c   : > { %v3224_v10 = vpop.eup %2541  ;;  %v1254_v14 = vpack.c.bf16 %v3222_v2, %v2540_v4 }
 0x30d   : > { %v3227_v20 = vpop.eup %2543 }
 0x30e   : > { %v3229_v23 = vpop.eup %2545  ;;  %1302 = vmatmul.bf16.vlgmr.msra.gmra.mxu1 %v1254_v14  ;;  %1391 = vperm.xlu1 %2518, %v3224_v10  }
 0x30f   : > { %1411 = vperm.xlu0 %2520, %v3229_v23   ;;  %1401 = vperm.xlu2 %2519, %v3227_v20   ;;  %v3236_v25 = vpop.eup %2547 }
 0x310   : > { %v3239_v52 = vpop.eup %2549  ;;  %v1042_v47 = vpop.permute.xlu0 %1041 }
 0x311   : > { %v1111_v50 = vsub.f32 %v2979_v28, %v1042_v47 }
 0x313   : > { %v1129_v16 = vmul.f32 1.442695, %v1111_v50 }
 0x315   : > { %2551 = vpow2.f32 %v1129_v16 }
 0x316   : > { %1421 = vperm.xlu1 %2518, %v3236_v25  }
 0x31b   : > { %v2552_v45 = vpop.eup %2551 }
 0x31e   : > { %1406 = vperm.xlu1 %2518, %v3239_v52  }
 0x328   : > { %v1072_v49 = vpop.permute.xlu2 %1071 }
 0x329   : > { %v1117_v28 = vsub.f32 %v3003_v37, %v1072_v49 }
 0x32b   : > { %v1141_v27 = vmul.f32 1.442695, %v1117_v28 }
 0x330   : > { %v1047_v21 = vpop.permute.xlu2 %1046 }
 0x331   : > { %v1112_v54 = vsub.f32 %v2982_v29, %v1047_v21 }
 0x333   : > { %v1131_v43 = vmul.f32 1.442695, %v1112_v54 }
 0x335   : > { %2553 = vpow2.f32 %v1131_v43 }
 0x338   : > { %1189 = vadd.xlane.f32.xlu2 %v2540_v4  ;;  %v1087_v46 = vpop.permute.xlu2 %1086 }
 0x339   : > { %v1120_v59 = vsub.f32 %v2993_v33, %v1087_v46  ;;  %1193 = vadd.xlane.f32.xlu0 %v2552_v45 }
 0x33b   : > { %v2554_v62 = vpop.eup %2553  ;;  %v1147_v63 = vmul.f32 1.442695, %v1120_v59 }
 0x33c   : > { %v1255_v6 = vpack.c.bf16 %v2554_v62, %v2552_v45 }
 0x33d   : > { %2555 = vpow2.f32 %v1147_v63 }
 0x33e   : > { %1307 = vmatmul.bf16.gmra.mxu1 %v1255_v6  ;;  %2557 = vpow2.f32 %v1141_v27 }
 0x340   : > { %v1097_v29 = vpop.permute.xlu2 %1096 }
 0x341   : > { %v1122_v16 = vsub.f32 %v3007_v38, %v1097_v29 }
 0x343   : > { %v2556_v55 = vpop.eup %2555 }
 0x344   : > { %1211 = vadd.xlane.f32.xlu2 %v2556_v55  ;;  %v2558_v9 = vpop.eup %2557 }
 0x348   : > { %v1077_v57 = vpop.permute.xlu1 %1076  ;;  %v1107_v26 = vpop.permute.xlu2 %1106 }
 0x349   : > { %v1118_v58 = vsub.f32 %v3009_v39, %v1077_v57  ;;  %v1124_v60 = vsub.f32 %v3018_v41, %v1107_v26  ;;  %v1151_v41 = vmul.f32 1.442695, %v1122_v16  ;;  %v1159_v16 = vld [vmem:[#allocation5 + $0x10] sm:$0xff] }
 0x34b   : > { %v1143_v8 = vmul.f32 1.442695, %v1118_v58  ;;  %v1155_v47 = vmul.f32 1.442695, %v1124_v60 }
 0x34c   : > { %1195 = vadd.xlane.f32.xlu2 %v2554_v62 }
 0x34d   : > { %2559 = vpow2.f32 %v1143_v8 }
 0x350   : > { %v1082_v33 = vpop.permute.xlu1 %1081  ;;  %v1367_v26 = vpop.permute.xlu2 %1366 }
 0x351   : > { %v1119_v22 = vsub.f32 %v2988_v31, %v1082_v33  ;;  %v1092_v56 = vpop.permute.xlu0 %1091  ;;  %v1440_v11 = vmul.f32 %v1367_v26, %v1344_v24 }
 0x352   : > { %v1121_v4 = vsub.f32 %v3000_v36, %v1092_v56  ;;  %v1023_v56 = vmul.f32 1.442695, %v994_v42 }
 0x353   : > { %v2560_v5 = vpop.eup %2559  ;;  %v1145_v37 = vmul.f32 1.442695, %v1119_v22 }
 0x354   : > { %v1149_v14 = vmul.f32 1.442695, %v1121_v4  ;;  %v1258_v44 = vpack.c.bf16 %v2560_v5, %v2558_v9 }
 0x355   : > { %2561 = vpow2.f32 %v1145_v37 }
 0x356   : > { %2563 = vpow2.f32 %v1149_v14  ;;  %1322 = vmatmul.bf16.vlgmr.msra.gmra.mxu2 %v1258_v44 }
 0x357   : > { %2565 = vpow2.f32 %v1155_v47 }
 0x358   : > { %v1052_v39 = vpop.permute.xlu1 %1051  ;;  %v3272_v42 = vpop.permute.xlu2 %1386 }
 0x359   : > { %v1102_v49 = vpop.permute.xlu0 %1101  ;;  %v1113_v36 = vsub.f32 %v2985_v30, %v1052_v39 }
 0x35a   : > { %v1123_v50 = vsub.f32 %v3014_v40, %v1102_v49 }
 0x35b   : > { %v2562_v31 = vpop.eup %2561  ;;  %v1133_v43 = vmul.f32 1.442695, %v1113_v36 }
 0x35c   : > { %v2564_v21 = vpop.eup %2563  ;;  %v1153_v54 = vmul.f32 1.442695, %v1123_v50  ;;  %1209 = vadd.xlane.f32.xlu1 %v2562_v31  ;;  %v1259_v38 = vpack.c.bf16 %v2556_v55, %v2562_v31  ;;  %v1157_v31 = vld [vmem:[#allocation5] sm:$0xff] }
 0x35d   : > { %1213 = vadd.xlane.f32.xlu0 %v2564_v21  ;;  %v2566_v59 = vpop.eup %2565  ;;  %v1173_v36 = vmul.f32 %v3193_v61, %v1157_v31 }
 0x35e   : > { %2567 = vpow2.f32 %v1153_v54 }
 0x35f   : > { %2569 = vpow2.f32 %v1151_v41  ;;  %v1175_v41 = vmul.f32 %v3182_v53, %v1159_v16  ;;  %v1160_v53 = vld [vmem:[#allocation5 + $0x18] sm:$0xff] }
 0x360   : > { %v1057_v45 = vpop.permute.xlu1 %1056  ;;  %2571 = vpow2.f32 %v1133_v43  ;;  %v3278_v39 = vpop.permute.xlu2 %1416 }
 0x361   : > { %v1114_v46 = vsub.f32 %v2990_v32, %v1057_v45  ;;  %v1067_v27 = vpop.permute.xlu0 %1066 }
 0x362   : > { %v1116_v58 = vsub.f32 %v2998_v35, %v1067_v27  ;;  %v1025_v35 = vmul.f32 1.442695, %v995_v3 }
 0x363   : > { %v1135_v62 = vmul.f32 1.442695, %v1114_v46 }
 0x364   : > { %v2568_v40 = vpop.eup %2567  ;;  %1191 = vadd.xlane.f32.xlu1 %v3222_v2  ;;  %v1139_v2 = vmul.f32 1.442695, %v1116_v58 }
 0x365   : > { %2573 = vpow2.f32 %v1135_v62  ;;  %1219 = vadd.xlane.f32.xlu0 %v2566_v59  ;;  %1217 = vadd.xlane.f32.xlu2 %v2568_v40  ;;  %v2570_v63 = vpop.eup %2569  ;;  %v1261_v22 = vpack.c.bf16 %v2566_v59, %v2568_v40  ;;  %v1168_v62 = vld [vmem:[#allocation5 + $0x58] sm:$0xff] }
 0x366   : > { %1327 = vmatmul.bf16.gmra.mxu2 %v1259_v38  ;;  %v2572_v28 = vpop.eup %2571  ;;  %v1260_v8 = vpack.c.bf16 %v2570_v63, %v2564_v21  ;;  %v1184_v40 = vmul.f32 %v3213_v13, %v1168_v62  ;;  %v1345_v38 = vld [vmem:[#allocation3 + $0x10] sm:$0xff] }
 0x368   : > { %v1062_v30 = vpop.permute.xlu1 %1061 }
 0x369   : > { %v1115_v6 = vsub.f32 %v2995_v34, %v1062_v30  ;;  %v1372_v4 = vpop.permute.xlu0 %1371  ;;  %v1402_v49 = vpop.permute.xlu2 %1401 }
 0x36b   : > { %v2574_v29 = vpop.eup %2573  ;;  %v1137_v32 = vmul.f32 1.442695, %v1115_v6  ;;  %v1441_v6 = vmul.f32 %v1372_v4, %v1345_v38 }
 0x36c   : > { %1215 = vadd.xlane.f32.xlu1 %v2570_v63  ;;  %v1256_v57 = vpack.c.bf16 %v2574_v29, %v2572_v28 }
 0x36d   : > { %2575 = vpow2.f32 %v1137_v32  ;;  %1199 = vadd.xlane.f32.xlu2 %v2574_v29  ;;  %v1176_v29 = vmul.f32 %v3211_v7, %v1160_v53  ;;  %v1346_v32 = vld [vmem:[#allocation3 + $0x18] sm:$0xff]  ;;  %v1347_v53 = vld [vmem:[#allocation3 + $0x20] sm:$0xff] }
 0x36e   : > { %1312 = vmatmul.bf16.gmra.mxu1 %v1256_v57  ;;  %2577 = vpow2.f32 %v1139_v2 }
 0x36f   : > { %2579 = vpow2.f32 %v1025_v35 }
 0x370   : > { %v1362_v37 = vpop.permute.xlu1 %1361  ;;  %2581 = vpow2.f32 %v1023_v56 }
 0x371   : > { %v3274_v3 = vpop.permute.xlu0 %1381 }
 0x373   : > { %v2576_v55 = vpop.eup %2575 }
 0x374   : > { %1197 = vadd.xlane.f32.xlu1 %v2572_v28  ;;  %1201 = vadd.xlane.f32.xlu0 %v2576_v55  ;;  %v2578_v34 = vpop.eup %2577 }
 0x375   : > { %1205 = vadd.xlane.f32.xlu2 %v2558_v9  ;;  %v1257_v33 = vpack.c.bf16 %v2578_v34, %v2576_v55  ;;  %v1343_v9 = vld [vmem:[#allocation3] sm:$0xff]  ;;  %v3266_v48 = vpop.eup %2579 }
 0x376   : > { %1332 = vmatmul.bf16.gmra.mxu2 %v1260_v8  ;;  %v1439_v14 = vmul.f32 %v1362_v37, %v1343_v9  ;;  %v3270_v18 = vpop.eup %2581  ;;  %v1158_v9 = vld [vmem:[#allocation5 + $0x8] sm:$0xff]  ;;  %v1171_v37 = vld [vmem:[#allocation5 + $0x70] sm:$0xff] }
 0x377   : > { %v1187_v24 = vmul.f32 %v3266_v48, %v1171_v37 }
 0x378   : > { %v1377_v21 = vpop.permute.xlu1 %1376 }
 0x379   : > { %v3280_v47 = vpop.permute.xlu0 %1396  ;;  %v1442_v2 = vmul.f32 %v1377_v21, %v1346_v32 }
 0x37c   : > { %1207 = vadd.xlane.f32.xlu0 %v2560_v5  ;;  %1203 = vadd.xlane.f32.xlu1 %v2578_v34  ;;  %v1027_v5 = vmul.f32 1.442695, %v996_v19  ;;  %v1167_v34 = vld [vmem:[#allocation5 + $0x50] sm:$0xff] }
 0x37d   : > { %v1183_v35 = vmul.f32 %v3229_v23, %v1167_v34  ;;  %v1443_v34 = vmul.f32 %v3274_v3, %v1347_v53 }
 0x37e   : > { %1317 = vmatmul.bf16.gmra.mxu1 %v1257_v33  ;;  %2583 = vpow2.f32 %v1027_v5  ;;  %v1169_v33 = vld [vmem:[#allocation5 + $0x60] sm:$0xff]  ;;  %v1172_v5 = vld [vmem:[#allocation5 + $0x78] sm:$0xff] }
 0x37f   : > { %v1185_v56 = vmul.f32 %v3236_v25, %v1169_v33 }
 0x380   : > { %v3288_v59 = vpop.permute.xlu1 %1391 }
 0x381   : > { %v3282_v50 = vpop.permute.xlu0 %1411 }
 0x384   : > { %v2584_v19 = vpop.eup %2583 }
 0x385   : > { %v1188_v23 = vmul.f32 %v2584_v19, %v1172_v5 }
 0x386   : > { %1337 = vmatmul.bf16.gmra.mxu2 %v1261_v22 }
 0x388   : > { %v3292_v27 = vpop.permute.xlu1 %1421 }
 0x38b   : > { %v1303_v44 = vpop.f32.mrf.mxu1 }
 0x38c   : > { %v1455_v0 = vadd.f32 %v1439_v14, %v1303_v44  ;;  %v1351_v14 = vld [vmem:[#allocation3 + $0x40] sm:$0xff]  ;;  %v1174_v44 = vmul.f32 %v3180_v51, %v1158_v9  ;;  %v1162_v51 = vld [vmem:[#allocation5 + $0x28] sm:$0xff] }
 0x38d   : > { %1431 = vperm.xlu2 %2519, %v3266_v48  }
 0x38e   : > { %1471 = vst.msk [vmem:[#allocation3] sm:$0xff] %vm3749_vm3, %v1455_v0 }
 0x390   : > { %1426 = vperm.xlu0 %2520, %v3270_v18   ;;  %v1407_v8 = vpop.permute.xlu1 %1406 }
 0x393   : > { %v1305_v15 = vpop.f32.mrf.mxu1 }
 0x394   : > { %v1456_v60 = vadd.f32 %v1440_v11, %v1305_v15  ;;  %v1447_v11 = vmul.f32 %v1402_v49, %v1351_v14  ;;  %v1178_v49 = vmul.f32 %v3196_v1, %v1162_v51 }
 0x395   : > { %1436 = vperm.xlu1 %2518, %v2584_v19  }
 0x396   : > { %1472 = vst.msk [vmem:[#allocation3 + $0x8] sm:$0xff] %vm3749_vm3, %v1456_v60 }
 0x3ab   : > { %v1190_v54 = vpop.xlane.xlu2 %1189 }
 0x3ac   : > { %v1221_v43 = vadd.f32 %v1190_v54, %v1173_v36  ;;  %v1194_v45 = vpop.xlane.xlu0 %1193  ;;  %v1170_v54 = vld [vmem:[#allocation5 + $0x68] sm:$0xff] }
 0x3ad   : > { %v1223_v46 = vadd.f32 %v1194_v45, %v1175_v41  ;;  %v1352_v41 = vld [vmem:[#allocation3 + $0x48] sm:$0xff]  ;;  %v1186_v48 = vmul.f32 %v3270_v18, %v1170_v54 }
 0x3ae   : > { %1238 = vst.msk [vmem:[#allocation5] sm:$0xff] %vm1237_vm4, %v1221_v43  ;;  %v1448_v43 = vmul.f32 %v1407_v8, %v1352_v41 }
 0x3af   : > { %1240 = vst.msk [vmem:[#allocation5 + $0x10] sm:$0xff] %vm1237_vm4, %v1223_v46 }
 0x3b7   : > { %v1212_v30 = vpop.xlane.xlu2 %1211 }
 0x3b8   : > { %v1232_v63 = vadd.f32 %v1212_v30, %v1184_v40  ;;  %v1161_v30 = vld [vmem:[#allocation5 + $0x20] sm:$0xff] }
 0x3b9   : > { %v1177_v18 = vmul.f32 %v3198_v17, %v1161_v30 }
 0x3ba   : > { %1249 = vst.msk [vmem:[#allocation5 + $0x58] sm:$0xff] %vm1237_vm4, %v1232_v63  ;;  %v1163_v63 = vld [vmem:[#allocation5 + $0x30] sm:$0xff] }
 0x3bb   : > { %v1308_v61 = vpop.f32.mrf.mxu1  ;;  %v1179_v1 = vmul.f32 %v3224_v10, %v1163_v63  ;;  %v1164_v10 = vld [vmem:[#allocation5 + $0x38] sm:$0xff] }
 0x3bc   : > { %v1457_v28 = vadd.f32 %v1441_v6, %v1308_v61  ;;  %v1165_v6 = vld [vmem:[#allocation5 + $0x40] sm:$0xff]  ;;  %v1353_v61 = vld [vmem:[#allocation3 + $0x50] sm:$0xff] }
 0x3be   : > { %1473 = vst.msk [vmem:[#allocation3 + $0x10] sm:$0xff] %vm3749_vm3, %v1457_v28 }
 0x3bf   : > { %v1196_v57 = vpop.xlane.xlu2 %1195 }
 0x3c0   : > { %v1224_v58 = vadd.f32 %v1196_v57, %v1176_v29  ;;  %v1181_v29 = vmul.f32 %v3227_v20, %v1165_v6  ;;  %v1449_v57 = vmul.f32 %v3282_v50, %v1353_v61  ;;  %v1180_v50 = vmul.f32 %v3215_v12, %v1164_v10 }
 0x3c2   : > { %1241 = vst.msk [vmem:[#allocation5 + $0x18] sm:$0xff] %vm1237_vm4, %v1224_v58 }
 0x3c3   : > { %v1310_v13 = vpop.f32.mrf.mxu1 }
 0x3c4   : > { %v1458_v55 = vadd.f32 %v1442_v2, %v1310_v13 }
 0x3c6   : > { %1474 = vst.msk [vmem:[#allocation3 + $0x18] sm:$0xff] %vm3749_vm3, %v1458_v55 }
 0x3cf   : > { %v1210_v22 = vpop.xlane.xlu1 %1209 }
 0x3d0   : > { %v1231_v26 = vadd.f32 %v1210_v22, %v1183_v35  ;;  %v1214_v7 = vpop.xlane.xlu0 %1213  ;;  %v1166_v35 = vld [vmem:[#allocation5 + $0x48] sm:$0xff]  ;;  %v1354_v22 = vld [vmem:[#allocation3 + $0x58] sm:$0xff] }
 0x3d1   : > { %v1233_v4 = vadd.f32 %v1214_v7, %v1185_v56  ;;  %v1182_v3 = vmul.f32 %v3239_v52, %v1166_v35  ;;  %v1348_v56 = vld [vmem:[#allocation3 + $0x28] sm:$0xff]  ;;  %v1355_v52 = vld [vmem:[#allocation3 + $0x60] sm:$0xff] }
 0x3d2   : > { %1248 = vst.msk [vmem:[#allocation5 + $0x50] sm:$0xff] %vm1237_vm4, %v1231_v26  ;;  %v1444_v14 = vmul.f32 %v3272_v42, %v1348_v56 }
 0x3d3   : > { %1250 = vst.msk [vmem:[#allocation5 + $0x60] sm:$0xff] %vm1237_vm4, %v1233_v4  ;;  %v1450_v4 = vmul.f32 %v3278_v39, %v1354_v22  ;;  %v1451_v39 = vmul.f32 %v3292_v27, %v1355_v52  ;;  %v1357_v27 = vld [vmem:[#allocation3 + $0x70] sm:$0xff] }
 0x3d7   : > { %v1192_v0 = vpop.xlane.xlu1 %1191 }
 0x3d8   : > { %v1222_v15 = vadd.f32 %v1192_v0, %v1174_v44  ;;  %v1218_v25 = vpop.xlane.xlu2 %1217  ;;  %v1220_v60 = vpop.xlane.xlu0 %1219 }
 0x3d9   : > { %v1235_v31 = vadd.f32 %v1218_v25, %v1187_v24  ;;  %v1236_v16 = vadd.f32 %v1220_v60, %v1188_v23  ;;  %v1323_v21 = vpop.f32.mrf.mxu2  ;;  %v1349_v24 = vld [vmem:[#allocation3 + $0x30] sm:$0xff]  ;;  %v1350_v60 = vld [vmem:[#allocation3 + $0x38] sm:$0xff] }
 0x3da   : > { %1239 = vst.msk [vmem:[#allocation5 + $0x8] sm:$0xff] %vm1237_vm4, %v1222_v15  ;;  %v1463_v36 = vadd.f32 %v1447_v11, %v1323_v21  ;;  %v1445_v11 = vmul.f32 %v3288_v59, %v1349_v24  ;;  %v1446_v21 = vmul.f32 %v3280_v47, %v1350_v60 }
 0x3db   : > { %1252 = vst.msk [vmem:[#allocation5 + $0x70] sm:$0xff] %vm1237_vm4, %v1235_v31  ;;  %v1356_v31 = vld [vmem:[#allocation3 + $0x68] sm:$0xff] }
 0x3dc   : > { %1253 = vst.msk [vmem:[#allocation5 + $0x78] sm:$0xff] %vm1237_vm4, %v1236_v16 }
 0x3dd   : > { %1479 = vst.msk [vmem:[#allocation3 + $0x40] sm:$0xff] %vm3749_vm3, %v1463_v36 }
 0x3df   : > { %v1216_v19 = vpop.xlane.xlu1 %1215 }
 0x3e0   : > { %v1234_v45 = vadd.f32 %v1216_v19, %v1186_v48  ;;  %v1200_v46 = vpop.xlane.xlu2 %1199 }
 0x3e1   : > { %v1226_v62 = vadd.f32 %v1200_v46, %v1178_v49  ;;  %v1325_v40 = vpop.f32.mrf.mxu2 }
 0x3e2   : > { %1251 = vst.msk [vmem:[#allocation5 + $0x68] sm:$0xff] %vm1237_vm4, %v1234_v45  ;;  %v1464_v38 = vadd.f32 %v1448_v43, %v1325_v40  ;;  %v1358_v45 = vld [vmem:[#allocation3 + $0x78] sm:$0xff] }
 0x3e3   : > { %1243 = vst.msk [vmem:[#allocation5 + $0x28] sm:$0xff] %vm1237_vm4, %v1226_v62 }
 0x3e4   : > { %1480 = vst.msk [vmem:[#allocation3 + $0x48] sm:$0xff] %vm3749_vm3, %v1464_v38 }
 0x3e7   : > { %v1198_v28 = vpop.xlane.xlu1 %1197  ;;  %v1202_v32 = vpop.xlane.xlu0 %1201 }
 0x3e8   : > { %v1225_v58 = vadd.f32 %v1198_v28, %v1177_v18  ;;  %v1206_v2 = vpop.xlane.xlu2 %1205  ;;  %v1227_v13 = vadd.f32 %v1202_v32, %v1179_v1 }
 0x3e9   : > { %v1229_v55 = vadd.f32 %v1206_v2, %v1181_v29  ;;  %v1328_v8 = vpop.f32.mrf.mxu2 }
 0x3ea   : > { %1242 = vst.msk [vmem:[#allocation5 + $0x20] sm:$0xff] %vm1237_vm4, %v1225_v58  ;;  %v1465_v33 = vadd.f32 %v1449_v57, %v1328_v8 }
 0x3eb   : > { %1246 = vst.msk [vmem:[#allocation5 + $0x40] sm:$0xff] %vm1237_vm4, %v1229_v55  ;;  %v1313_v17 = vpop.f32.mrf.mxu1 }
 0x3ec   : > { %1244 = vst.msk [vmem:[#allocation5 + $0x30] sm:$0xff] %vm1237_vm4, %v1227_v13  ;;  %v1459_v20 = vadd.f32 %v1443_v34, %v1313_v17 }
 0x3ed   : > { %1481 = vst.msk [vmem:[#allocation3 + $0x50] sm:$0xff] %vm3749_vm3, %v1465_v33 }
 0x3ee   : > { %1475 = vst.msk [vmem:[#allocation3 + $0x20] sm:$0xff] %vm3749_vm3, %v1459_v20 }
 0x3ef   : > { %v1204_v26 = vpop.xlane.xlu1 %1203  ;;  %v1208_v7 = vpop.xlane.xlu0 %1207 }
 0x3f0   : > { %v1228_v9 = vadd.f32 %v1204_v26, %v1180_v50  ;;  %v1230_v37 = vadd.f32 %v1208_v7, %v1182_v3  ;;  %v1432_v48 = vpop.permute.xlu2 %1431 }
 0x3f1   : > { %v1330_v5 = vpop.f32.mrf.mxu2  ;;  %v1453_v59 = vmul.f32 %v1432_v48, %v1357_v27 }
 0x3f2   : > { %1245 = vst.msk [vmem:[#allocation5 + $0x38] sm:$0xff] %vm1237_vm4, %v1228_v9  ;;  %v1466_v44 = vadd.f32 %v1450_v4, %v1330_v5 }
 0x3f3   : > { %1247 = vst.msk [vmem:[#allocation5 + $0x48] sm:$0xff] %vm1237_vm4, %v1230_v37  ;;  %v1315_v0 = vpop.f32.mrf.mxu1 }
 0x3f4   : > { %1482 = vst.msk [vmem:[#allocation3 + $0x58] sm:$0xff] %vm3749_vm3, %v1466_v44  ;;  %v1460_v12 = vadd.f32 %v1444_v14, %v1315_v0 }
 0x3f6   : > { %1476 = vst.msk [vmem:[#allocation3 + $0x28] sm:$0xff] %vm3749_vm3, %v1460_v12 }
 0x3f9   : > { %v1333_v23 = vpop.f32.mrf.mxu2 }
 0x3fa   : > { %v1467_v15 = vadd.f32 %v1451_v39, %v1333_v23 }
 0x3fb   : > { %v1318_v42 = vpop.f32.mrf.mxu1 }
 0x3fc   : > { %1483 = vst.msk [vmem:[#allocation3 + $0x60] sm:$0xff] %vm3749_vm3, %v1467_v15  ;;  %v1461_v25 = vadd.f32 %v1445_v11, %v1318_v42 }
 0x3fe   : > { %1477 = vst.msk [vmem:[#allocation3 + $0x30] sm:$0xff] %vm3749_vm3, %v1461_v25 }
 0x401   : > { %v1335_v16 = vpop.f32.mrf.mxu2 }
 0x402   : > { %v1427_v36 = vpop.permute.xlu0 %1426 }
 0x403   : > { %v1452_v54 = vmul.f32 %v1427_v36, %v1356_v31  ;;  %v1320_v51 = vpop.f32.mrf.mxu1 }
 0x404   : > { %v1462_v41 = vadd.f32 %v1446_v21, %v1320_v51 }
 0x405   : > { %v1468_v19 = vadd.f32 %v1452_v54, %v1335_v16 }
 0x406   : > { %1478 = vst.msk [vmem:[#allocation3 + $0x38] sm:$0xff] %vm3749_vm3, %v1462_v41 }
 0x407   : > { %1484 = vst.msk [vmem:[#allocation3 + $0x68] sm:$0xff] %vm3749_vm3, %v1468_v19  ;;  %v1437_v46 = vpop.permute.xlu1 %1436 }
 0x408   : > { %v1454_v62 = vmul.f32 %v1437_v46, %v1358_v45 }
 0x409   : > { %v1338_v49 = vpop.f32.mrf.mxu2 }
 0x40a   : > { %v1469_v43 = vadd.f32 %v1453_v59, %v1338_v49 }
 0x40c   : > { %1485 = vst.msk [vmem:[#allocation3 + $0x70] sm:$0xff] %vm3749_vm3, %v1469_v43 }
 0x410   : > { %1506 = sbr.rel (%p2341_p3) target bundleno = 1567 (0x61f), region = 213 }
 0x411   : > { %v1340_v47 = vpop.f32.mrf.mxu2 }
 0x412   : > { %v1470_v40 = vadd.f32 %v1454_v62, %v1340_v47 }
 0x414   : > { %1486 = vst.msk [vmem:[#allocation3 + $0x78] sm:$0xff] %vm3749_vm3, %v1470_v40 }
 0x415   : > { %v1527_v38 = vld [vmem:[#allocation5 + $0x20] sm:$0xff]  ;;  %v3341_v30 = vld [vmem:[#allocation5 + $0x10] sm:$0xff]  ;;  %v2711_v6 = vmov 0   ;;  %v3346_v1 = vld [vmem:[#allocation5 + $0x28] sm:$0xff] }
 0x416   : > { %v3343_v63 = vld [vmem:[#allocation5] sm:$0xff]  ;;  %2587 = vset.pattern.permute.xlu2 %v2711_v6  ;;  %2586 = vset.pattern.permute.xlu1 %v2711_v6  ;;  %2588 = vrcp.f32 %v1527_v38  ;;  %v1604_v61 = vand.u32 2147483647, %v1527_v38  ;;  %v1606_v18 = vand.u32 2147483648, %v1527_v38  ;;  %v1576_v53 = vand.u32 2147483647, %v3341_v30 }
 0x417   : > { %2585 = vset.pattern.permute.xlu0 %v2711_v6  ;;  %2590 = vrcp.f32 %v3341_v30  ;;  %v1578_v28 = vand.u32 2147483648, %v3341_v30  ;;  %v3351_v29 = vld [vmem:[#allocation5 + $0x18] sm:$0xff]  ;;  %vm1600_vm5 = vweird.f32 %v1527_v38  ;;  %v1548_v32 = vand.u32 2147483647, %v3343_v63  ;;  %v3358_v2 = vld [vmem:[#allocation5 + $0x8] sm:$0xff]  ;;  %v3379_v3 = vld [vmem:[#allocation5 + $0x40] sm:$0xff] }
 0x418   : > { %2592 = vrcp.f32 %v3343_v63  ;;  %vm1572_vm6 = vweird.f32 %v3341_v30  ;;  %v1550_v57 = vand.u32 2147483648, %v3343_v63  ;;  %v1620_v58 = vand.u32 2147483648, %v3346_v1  ;;  %v3479_v13 = vld [vmem:[#allocation5 + $0x30] sm:$0xff] }
 0x419   : > { %2594 = vrcp.f32 %v3346_v1  ;;  %vm3360_vm7 = vcmp.eq.f32.partialorder %v1604_v61, 8.507059e+37  ;;  %v1607_v55 = vor.u32 1.1754944e-38, %v1606_v18  ;;  %vm1544_vm8 = vweird.f32 %v3343_v63  ;;  %v3462_v18 = vld [vmem:[#allocation5 + $0x38] sm:$0xff] }
 0x41a   : > { %2596 = vrcp.f32 %v3351_v29  ;;  %vm3366_vm9 = vcmp.eq.f32.partialorder %v1576_v53, 8.507059e+37  ;;  %v1579_v33 = vor.u32 1.1754944e-38, %v1578_v28  ;;  %vm1614_vm10 = vweird.f32 %v3346_v1 }
 0x41b   : > { %v1618_v17 = vand.u32 2147483647, %v3346_v1  ;;  %v1592_v10 = vand.u32 2147483648, %v3351_v29  ;;  %vm3373_vm11 = vcmp.eq.f32.partialorder %v1548_v32, 8.507059e+37  ;;  %v1590_v50 = vand.u32 2147483647, %v3351_v29 }
 0x41c   : > { %v2589_v8 = vpop.eup %2588  ;;  %2598 = vrcp.f32 %v3358_v2  ;;  %v1551_v7 = vor.u32 1.1754944e-38, %v1550_v57  ;;  %v3382_v4 = vor.u32 1.1754944e-38, %v1620_v58  ;;  %vm1586_vm12 = vweird.f32 %v3351_v29 }
 0x41d   : > { %v2591_v35 = vpop.eup %2590  ;;  %v1596_v20 = vmul.f32 %v2589_v8, %v1527_v38  ;;  %vm1601_vm13 = vweird.f32 %v2589_v8  ;;  %v3389_v44 = vor.u32 1.1754944e-38, %v1592_v10  ;;  %2600 = vrcp.f32 %v3379_v3 }
 0x41e   : > { %v2593_v56 = vpop.eup %2592  ;;  %v1568_v26 = vmul.f32 %v2591_v35, %v3341_v30  ;;  %vm1573_vm15 = vweird.f32 %v2591_v35  ;;  %vm3396_vm1 = vcmp.eq.f32.partialorder %v1618_v17, 8.507059e+37  ;;  %vm3400_vm2 = vcmp.eq.f32.partialorder %v1590_v50, 8.507059e+37  ;;  %vm3406_vm4 = vmor %vm1600_vm5, %vm1601_vm13  ;;  %v3488_v17 = vld [vmem:[#allocation5 + $0x58] sm:$0xff] }
 0x41f   : > { %v1597_v9 = vsub.f32 1.0, %v1596_v20  ;;  %v1540_v37 = vmul.f32 %v2593_v56, %v3343_v63  ;;  %v3387_v5 = vpop.eup %2594  ;;  %vm1545_vm0 = vweird.f32 %v2593_v56  ;;  %v1562_v25 = vand.u32 2147483647, %v3358_v2  ;;  %vm3417_vm3 = vmor %vm1572_vm6, %vm1573_vm15 }
 0x420   : > { %v1569_v14 = vsub.f32 1.0, %v1568_v26  ;;  %v3392_v0 = vpop.eup %2596  ;;  %v1610_v24 = vmul.f32 %v3387_v5, %v3346_v1  ;;  %v1564_v60 = vand.u32 2147483648, %v3358_v2  ;;  %vm1615_vm5 = vweird.f32 %v3387_v5  ;;  %vm3425_vm13 = vmor %vm1544_vm8, %vm1545_vm0 }
 0x421   : > { %v1598_v12 = vmul.f32 %v2589_v8, %v1597_v9  ;;  %v1541_v52 = vsub.f32 1.0, %v1540_v37  ;;  %v1582_v42 = vmul.f32 %v3392_v0, %v3351_v29  ;;  %vm1587_vm14 = vweird.f32 %v3392_v0  ;;  %vm3442_vm8 = vmor %vm1614_vm10, %vm1615_vm5 }
 0x422   : > { %v1570_v15 = vmul.f32 %v2591_v35, %v1569_v14  ;;  %v2599_v31 = vpop.eup %2598  ;;  %v1611_v54 = vsub.f32 1.0, %v1610_v24  ;;  %v1565_v57 = vor.u32 1.1754944e-38, %v1564_v60  ;;  %v1662_v34 = vand.u32 2147483648, %v3379_v3 }
 0x423   : > { %v1599_v16 = vadd.f32 %v2589_v8, %v1598_v12  ;;  %v1542_v36 = vmul.f32 %v2593_v56, %v1541_v52  ;;  %v1583_v27 = vsub.f32 1.0, %v1582_v42  ;;  %v1554_v48 = vmul.f32 %v2599_v31, %v3358_v2  ;;  %v3434_v43 = vpop.eup %2600 }
 0x424   : > { %v1571_v51 = vadd.f32 %v2591_v35, %v1570_v15  ;;  %v1612_v49 = vmul.f32 %v3387_v5, %v1611_v54  ;;  %vm1559_vm6 = vweird.f32 %v2599_v31  ;;  %v1652_v61 = vmul.f32 %v3434_v43, %v3379_v3 }
 0x425   : > { %v1603_v19 = vsel %vm3406_vm4, %v2589_v8, %v1599_v16  ;;  %v1543_v59 = vadd.f32 %v2593_v56, %v1542_v36  ;;  %v1584_v47 = vmul.f32 %v3392_v0, %v1583_v27  ;;  %v1555_v40 = vsub.f32 1.0, %v1554_v48  ;;  %v3539_v16 = vld [vmem:[#allocation5 + $0x70] sm:$0xff] }
 0x426   : > { %v1608_v45 = vsel %vm3360_vm7, %v1607_v55, %v1603_v19  ;;  %v1575_v46 = vsel %vm3417_vm3, %v2591_v35, %v1571_v51  ;;  %v1613_v63 = vadd.f32 %v3387_v5, %v1612_v49  ;;  %vm3456_vm3 = vmor %vm1586_vm12, %vm1587_vm14  ;;  %vm1656_vm7 = vweird.f32 %v3379_v3  ;;  %v3545_v19 = vld [vmem:[#allocation5 + $0x68] sm:$0xff] }
 0x427   : > { %1785 = vperm.xlu2 %2587, %v1608_v45   ;;  %v1580_v38 = vsel %vm3366_vm9, %v1579_v33, %v1575_v46  ;;  %v1547_v30 = vsel %vm3425_vm13, %v2593_v56, %v1543_v59  ;;  %v1585_v53 = vadd.f32 %v3392_v0, %v1584_v47  ;;  %v1556_v28 = vmul.f32 %v2599_v31, %v1555_v40 }
 0x428   : > { %1775 = vperm.xlu1 %2586, %v1580_v38   ;;  %v1552_v1 = vsel %vm3373_vm11, %v1551_v7, %v1547_v30  ;;  %v1617_v29 = vsel %vm3442_vm8, %v3387_v5, %v1613_v63  ;;  %vm3778_vm9 = vweird.f32 %v3358_v2  ;;  %v1653_v58 = vsub.f32 1.0, %v1652_v61 }
 0x429   : > { %1765 = vperm.xlu0 %2585, %v1552_v1   ;;  %vm3474_vm10 = vmor %vm3778_vm9, %vm1559_vm6  ;;  %vm1657_vm11 = vweird.f32 %v3434_v43  ;;  %v1589_v55 = vsel %vm3456_vm3, %v3392_v0, %v1585_v53  ;;  %v1557_v8 = vadd.f32 %v2599_v31, %v1556_v28  ;;  %2602 = vrcp.f32 %v3462_v18  ;;  %v1905_v28 = vld [vmem:[%s3744_s5 + $0x10] sm:$0xff] }
 0x42a   : > { %vm1563_vm12 = vcmp.eq.f32.partialorder %v1562_v25, 8.507059e+37  ;;  %v1654_v2 = vmul.f32 %v3434_v43, %v1653_v58  ;;  %v1660_v33 = vand.u32 2147483647, %v3379_v3  ;;  %v1622_v10 = vsel %vm3396_vm1, %v3382_v4, %v1617_v29  ;;  %vm3500_vm14 = vmor %vm1656_vm7, %vm1657_vm11  ;;  %v3509_v4 = vld [vmem:[#allocation5 + $0x50] sm:$0xff] }
 0x42b   : > { %v1594_v35 = vsel %vm3400_vm2, %v3389_v44, %v1589_v55  ;;  %v1561_v20 = vsel %vm3474_vm10, %v2599_v31, %v1557_v8  ;;  %2604 = vrcp.f32 %v3479_v13  ;;  %v1646_v56 = vand.u32 2147483647, %v3462_v18  ;;  %v3517_v44 = vld [vmem:[#allocation5 + $0x48] sm:$0xff] }
 0x42c   : > { %v1655_v50 = vadd.f32 %v3434_v43, %v1654_v2  ;;  %v1648_v26 = vand.u32 2147483648, %v3462_v18  ;;  %v1632_v7 = vand.u32 2147483647, %v3479_v13  ;;  %v1566_v9 = vsel %vm1563_vm12, %v1565_v57, %v1561_v20  ;;  %v1904_v57 = vld [vmem:[%s3744_s5 + $0x8] sm:$0xff] }
 0x42d   : > { %v1663_v37 = vor.u32 1.1754944e-38, %v1662_v34  ;;  %v1634_v3 = vand.u32 2147483648, %v3479_v13  ;;  %2606 = vrcp.f32 %v3488_v17  ;;  %vm1661_vm15 = vcmp.eq.f32.partialorder %v1660_v33, 8.507059e+37 }
 0x42e   : > { %v1659_v5 = vsel %vm3500_vm14, %v3434_v43, %v1655_v50  ;;  %v1702_v14 = vand.u32 2147483647, %v3488_v17  ;;  %vm1642_vm0 = vweird.f32 %v3462_v18  ;;  %vm1628_vm1 = vweird.f32 %v3479_v13  ;;  %v1535_v50 = vld [vmem:[#allocation5 + $0x60] sm:$0xff] }
 0x42f   : > { %1790 = vperm.xlu2 %2587, %v1622_v10   ;;  %v2603_v0 = vpop.eup %2602  ;;  %v1704_v12 = vand.u32 2147483648, %v3488_v17  ;;  %2608 = vrcp.f32 %v3509_v4  ;;  %vm3524_vm2 = vcmp.eq.f32.partialorder %v1646_v56, 8.507059e+37  ;;  %v1649_v39 = vor.u32 1.1754944e-38, %v1648_v26 }
 0x430   : > { %1780 = vperm.xlu1 %2586, %v1594_v35   ;;  %v1638_v52 = vmul.f32 %v2603_v0, %v3462_v18  ;;  %vm3528_vm4 = vcmp.eq.f32.partialorder %v1632_v7, 8.507059e+37  ;;  %v1664_v15 = vsel %vm1661_vm15, %v1663_v37, %v1659_v5  ;;  %v1635_v42 = vor.u32 1.1754944e-38, %v1634_v3 }
 0x431   : > { %1770 = vperm.xlu0 %2585, %v1566_v9   ;;  %v2605_v11 = vpop.eup %2604  ;;  %vm1698_vm5 = vweird.f32 %v3488_v17  ;;  %2610 = vrcp.f32 %v3517_v44  ;;  %vm1643_vm13 = vweird.f32 %v2603_v0  ;;  %vm3535_vm6 = vcmp.eq.f32.partialorder %v1702_v14, 8.507059e+37  ;;  %v1538_v14 = vld [vmem:[#allocation5 + $0x78] sm:$0xff] }
 0x432   : > { %v1639_v25 = vsub.f32 1.0, %v1638_v52  ;;  %v1624_v60 = vmul.f32 %v2605_v11, %v3479_v13  ;;  %v1705_v36 = vor.u32 1.1754944e-38, %v1704_v12  ;;  %vm1684_vm8 = vweird.f32 %v3509_v4  ;;  %vm3550_vm7 = vmor %vm1642_vm0, %vm1643_vm13 }
 0x433   : > { %v2607_v21 = vpop.eup %2606  ;;  %v1688_v54 = vand.u32 2147483647, %v3509_v4  ;;  %v1690_v51 = vand.u32 2147483648, %v3509_v4  ;;  %vm1629_vm3 = vweird.f32 %v2605_v11  ;;  %v1674_v43 = vand.u32 2147483647, %v3517_v44 }
 0x434   : > { %v1640_v41 = vmul.f32 %v2603_v0, %v1639_v25  ;;  %v1625_v27 = vsub.f32 1.0, %v1624_v60  ;;  %v1694_v48 = vmul.f32 %v2607_v21, %v3488_v17  ;;  %vm1699_vm9 = vweird.f32 %v2607_v21  ;;  %vm3561_vm10 = vmor %vm1628_vm1, %vm1629_vm3 }
 0x435   : > { %v2609_v59 = vpop.eup %2608  ;;  %v1676_v45 = vand.u32 2147483648, %v3517_v44  ;;  %2612 = vrcp.f32 %v3539_v16  ;;  %vm3565_vm12 = vcmp.eq.f32.partialorder %v1688_v54, 8.507059e+37  ;;  %vm1670_vm14 = vweird.f32 %v3517_v44  ;;  %vm3578_vm15 = vmor %vm1698_vm5, %vm1699_vm9 }
 0x436   : > { %v1641_v46 = vadd.f32 %v2603_v0, %v1640_v41  ;;  %v1626_v62 = vmul.f32 %v2605_v11, %v1625_v27  ;;  %v1695_v47 = vsub.f32 1.0, %v1694_v48  ;;  %v1680_v40 = vmul.f32 %v2609_v59, %v3509_v4 }
 0x437   : > { %1805 = vperm.xlu2 %2587, %v1664_v15   ;;  %v2611_v38 = vpop.eup %2610  ;;  %vm1685_vm11 = vweird.f32 %v2609_v59  ;;  %2614 = vrcp.f32 %v3545_v19  ;;  %v1691_v29 = vor.u32 1.1754944e-38, %v1690_v51  ;;  %vm3583_vm0 = vcmp.eq.f32.partialorder %v1674_v43, 8.507059e+37 }
 0x438   : > { %v1645_v6 = vsel %vm3550_vm7, %v2603_v0, %v1641_v46  ;;  %v1627_v61 = vadd.f32 %v2605_v11, %v1626_v62  ;;  %v1696_v18 = vmul.f32 %v2607_v21, %v1695_v47  ;;  %v1681_v1 = vsub.f32 1.0, %v1680_v40  ;;  %vm3594_vm1 = vmor %vm1684_vm8, %vm1685_vm11  ;;  %v1903_v47 = vld [vmem:[%s3744_s5] sm:$0xff] }
 0x439   : > { %v1650_v53 = vsel %vm3524_vm2, %v1649_v39, %v1645_v6  ;;  %v1666_v32 = vmul.f32 %v2611_v38, %v3517_v44  ;;  %v1677_v8 = vor.u32 1.1754944e-38, %v1676_v45  ;;  %vm1671_vm2 = vweird.f32 %v2611_v38 }
 0x43a   : > { %1800 = vperm.xlu1 %2586, %v1650_v53   ;;  %v1631_v58 = vsel %vm3561_vm10, %v2605_v11, %v1627_v61  ;;  %v1697_v13 = vadd.f32 %v2607_v21, %v1696_v18  ;;  %v1682_v55 = vmul.f32 %v2609_v59, %v1681_v1  ;;  %vm1740_vm5 = vweird.f32 %v3539_v16  ;;  %vm3612_vm13 = vmor %vm1670_vm14, %vm1671_vm2 }
 0x43b   : > { %v2613_v34 = vpop.eup %2612  ;;  %v1636_v2 = vsel %vm3528_vm4, %v1635_v42, %v1631_v58  ;;  %v1667_v17 = vsub.f32 1.0, %v1666_v32  ;;  %v1744_v22 = vand.u32 2147483647, %v3539_v16  ;;  %v1746_v4 = vand.u32 2147483648, %v3539_v16  ;;  %v1907_v32 = vld [vmem:[%s3744_s5 + $0x20] sm:$0xff]  ;;  %v1909_v58 = vld [vmem:[%s3744_s5 + $0x30] sm:$0xff] }
 0x43c   : > { %1795 = vperm.xlu0 %2585, %v1636_v2   ;;  %v1701_v10 = vsel %vm3578_vm15, %v2607_v21, %v1697_v13  ;;  %v1683_v35 = vadd.f32 %v2609_v59, %v1682_v55  ;;  %v1736_v20 = vmul.f32 %v2613_v34, %v3539_v16  ;;  %vm1726_vm4 = vweird.f32 %v3545_v19  ;;  %v1906_v13 = vld [vmem:[%s3744_s5 + $0x18] sm:$0xff]  ;;  %v1908_v55 = vld [vmem:[%s3744_s5 + $0x28] sm:$0xff] }
 0x43d   : > { %v2615_v56 = vpop.eup %2614  ;;  %v1706_v26 = vsel %vm3535_vm6, %v1705_v36, %v1701_v10  ;;  %v1668_v7 = vmul.f32 %v2611_v38, %v1667_v17  ;;  %vm1741_vm8 = vweird.f32 %v2613_v34  ;;  %v1732_v52 = vand.u32 2147483648, %v3545_v19  ;;  %v1508_v17 = vld [vmem:[#allocation3 + $0x8] sm:$0xff] }
 0x43e   : > { %v1687_v9 = vsel %vm3594_vm1, %v2609_v59, %v1683_v35  ;;  %v1737_v3 = vsub.f32 1.0, %v1736_v20  ;;  %v1722_v5 = vmul.f32 %v2615_v56, %v3545_v19  ;;  %2616 = vrcp.f32 %v1535_v50  ;;  %vm3625_vm3 = vmor %vm1740_vm5, %vm1741_vm8  ;;  %v1509_v20 = vld [vmem:[#allocation3 + $0x10] sm:$0xff] }
 0x43f   : > { %1820 = vperm.xlu2 %2587, %v1706_v26   ;;  %v1692_v0 = vsel %vm3565_vm12, %v1691_v29, %v1687_v9  ;;  %v1669_v12 = vadd.f32 %v2611_v38, %v1668_v7  ;;  %vm1727_vm6 = vweird.f32 %v2615_v56  ;;  %v1730_v44 = vand.u32 2147483647, %v3545_v19 }
 0x440   : > { %v1738_v24 = vmul.f32 %v2613_v34, %v1737_v3  ;;  %v1723_v39 = vsub.f32 1.0, %v1722_v5  ;;  %v1747_v15 = vor.u32 1.1754944e-38, %v1746_v4  ;;  %2618 = vrcp.f32 %v1538_v14  ;;  %vm1728_vm9 = vmor %vm1726_vm4, %vm1727_vm6  ;;  %v1511_v4 = vld [vmem:[#allocation3 + $0x20] sm:$0xff]  ;;  %v1512_v3 = vld [vmem:[#allocation3 + $0x28] sm:$0xff] }
 0x441   : > { %v1673_v23 = vsel %vm3612_vm13, %v2611_v38, %v1669_v12  ;;  %vm1745_vm7 = vcmp.eq.f32.partialorder %v1744_v22, 8.507059e+37  ;;  %v1733_v31 = vor.u32 1.1754944e-38, %v1732_v52  ;;  %vm1731_vm10 = vcmp.eq.f32.partialorder %v1730_v44, 8.507059e+37  ;;  %v1513_v12 = vld [vmem:[#allocation3 + $0x30] sm:$0xff] }
 0x442   : > { %1815 = vperm.xlu1 %2586, %v1692_v0   ;;  %v1678_v42 = vsel %vm3583_vm0, %v1677_v8, %v1673_v23  ;;  %v1739_v25 = vadd.f32 %v2613_v34, %v1738_v24  ;;  %v1724_v60 = vmul.f32 %v2615_v56, %v1723_v39  ;;  %vm1712_vm11 = vweird.f32 %v1535_v50  ;;  %v1910_v8 = vld [vmem:[%s3744_s5 + $0x38] sm:$0xff]  ;;  %v1515_v23 = vld [vmem:[#allocation3 + $0x40] sm:$0xff] }
 0x443   : > { %v1718_v59 = vand.u32 2147483648, %v1535_v50  ;;  %v1716_v19 = vand.u32 2147483647, %v1535_v50  ;;  %vm1754_vm15 = vweird.f32 %v1538_v14  ;;  %v1760_v30 = vand.u32 2147483648, %v1538_v14  ;;  %v1514_v39 = vld [vmem:[#allocation3 + $0x38] sm:$0xff] }
 0x444   : > { %1810 = vperm.xlu0 %2585, %v1678_v42   ;;  %v1743_v16 = vsel %vm3625_vm3, %v2613_v34, %v1739_v25  ;;  %v1725_v21 = vadd.f32 %v2615_v56, %v1724_v60  ;;  %v2617_v36 = vpop.eup %2616  ;;  %v1758_v61 = vand.u32 2147483647, %v1538_v14  ;;  %v1507_v34 = vld [vmem:[#allocation3] sm:$0xff]  ;;  %v1516_v25 = vld [vmem:[#allocation3 + $0x48] sm:$0xff]  ;;  %vm3805_vm4 = vcmask 523264  }
 0x445   : > { %v1748_v54 = vsel %vm1745_vm7, %v1747_v15, %v1743_v16  ;;  %v1708_v41 = vmul.f32 %v2617_v36, %v1535_v50  ;;  %vm1713_vm12 = vweird.f32 %v2617_v36  ;;  %v1719_v62 = vor.u32 1.1754944e-38, %v1718_v59  ;;  %v1517_v16 = vld [vmem:[#allocation3 + $0x50] sm:$0xff]  ;;  %vm3806_vm13 = vmmov %vm3805_vm4 }
 0x446   : > { %v1729_v51 = vsel %vm1728_vm9, %v2615_v56, %v1725_v21  ;;  %v2619_v27 = vpop.eup %2618  ;;  %vm1714_vm14 = vmor %vm1712_vm11, %vm1713_vm12  ;;  %vm1717_vm0 = vcmp.eq.f32.partialorder %v1716_v19, 8.507059e+37  ;;  %v1761_v1 = vor.u32 1.1754944e-38, %v1760_v30  ;;  %vm1759_vm5 = vcmp.eq.f32.partialorder %v1758_v61, 8.507059e+37  ;;  %v1510_v56 = vld [vmem:[#allocation3 + $0x18] sm:$0xff] }
 0x447   : > { %1835 = vperm.xlu2 %2587, %v1748_v54   ;;  %v1734_v48 = vsel %vm1731_vm10, %v1733_v31, %v1729_v51  ;;  %v1709_v49 = vsub.f32 1.0, %v1708_v41  ;;  %v1750_v43 = vmul.f32 %v2619_v27, %v1538_v14  ;;  %vm1755_vm1 = vweird.f32 %v2619_v27  ;;  %vm3807_vm8 = vmmov %vm3805_vm4 }
 0x448   : > { %vm1756_vm2 = vmor %vm1754_vm15, %vm1755_vm1 }
 0x449   : > { %v1710_v45 = vmul.f32 %v2617_v36, %v1709_v49  ;;  %v1751_v46 = vsub.f32 1.0, %v1750_v43  ;;  %v1520_v49 = vld [vmem:[#allocation3 + $0x68] sm:$0xff]  ;;  %v1521_v43 = vld [vmem:[#allocation3 + $0x70] sm:$0xff]  ;;  %vm3808_vm6 = vmmov %vm3805_vm4 }
 0x44a   : > { %1830 = vperm.xlu1 %2586, %v1734_v48  }
 0x44b   : > { %v1711_v40 = vadd.f32 %v2617_v36, %v1710_v45  ;;  %v1752_v38 = vmul.f32 %v2619_v27, %v1751_v46 }
 0x44d   : > { %v1715_v63 = vsel %vm1714_vm14, %v2617_v36, %v1711_v40  ;;  %v1753_v6 = vadd.f32 %v2619_v27, %v1752_v38  ;;  %v1518_v36 = vld [vmem:[#allocation3 + $0x58] sm:$0xff] }
 0x44e   : > { %v1720_v18 = vsel %vm1717_vm0, %v1719_v62, %v1715_v63 }
 0x44f   : > { %1913 = vperm.xlu2 %2587, %v1903_v47   ;;  %1825 = vperm.xlu0 %2585, %v1720_v18   ;;  %v1757_v53 = vsel %vm1756_vm2, %v2619_v27, %v1753_v6  ;;  %v1519_v27 = vld [vmem:[#allocation3 + $0x60] sm:$0xff]  ;;  %v1522_v47 = vld [vmem:[#allocation3 + $0x78] sm:$0xff] }
 0x450   : > { %v1762_v29 = vsel %vm1759_vm5, %v1761_v1, %v1757_v53 }
 0x457   : > { %1923 = vperm.xlu2 %2587, %v1905_v28   ;;  %1840 = vperm.xlu0 %2585, %v1762_v29  }
 0x45f   : > { %1933 = vperm.xlu2 %2587, %v1907_v32   ;;  %1918 = vperm.xlu0 %2585, %v1904_v57  }
 0x467   : > { %1943 = vperm.xlu2 %2587, %v1909_v58   ;;  %1928 = vperm.xlu0 %2585, %v1906_v13   ;;  %v2383_v58 = vld [vmem:[%s3743_s4] sm:$0xff]  ;;  %v2384_v13 = vld [vmem:[%s3743_s4 + $0x8] sm:$0xff] }
 0x46f   : > { %1938 = vperm.xlu0 %2585, %v1908_v55   ;;  %v2385_v55 = vld [vmem:[%s3743_s4 + $0x10] sm:$0xff] }
 0x477   : > { %1948 = vperm.xlu0 %2585, %v1910_v8   ;;  %v2386_v8 = vld [vmem:[%s3743_s4 + $0x18] sm:$0xff] }
 0x481   : > { %v1786_v9 = vpop.permute.xlu2 %1785 }
 0x482   : > { %v1847_v37 = vmul.f32 %v1786_v9, %v1511_v4 }
 0x489   : > { %v1791_v5 = vpop.permute.xlu2 %1790 }
 0x48a   : > { %v1848_v14 = vmul.f32 %v1791_v5, %v1512_v3  ;;  %v2016_v5 = vld [vmem:[%s2892_s10 + $0x20] sm:$0xff] }
 0x491   : > { %v1806_v11 = vpop.permute.xlu2 %1805 }
 0x492   : > { %v1851_v15 = vmul.f32 %v1806_v11, %v1515_v23  ;;  %v2015_v23 = vld [vmem:[%s2892_s10 + $0x18] sm:$0xff] }
 0x499   : > { %v1821_v54 = vpop.permute.xlu2 %1820 }
 0x49a   : > { %v1776_v22 = vpop.permute.xlu1 %1775  ;;  %v1854_v51 = vmul.f32 %v1821_v54, %v1518_v36  ;;  %v2017_v36 = vld [vmem:[%s2892_s10 + $0x28] sm:$0xff] }
 0x49b   : > { %v1766_v2 = vpop.permute.xlu0 %1765  ;;  %v1845_v50 = vmul.f32 %v1776_v22, %v1509_v20  ;;  %v2012_v20 = vld [vmem:[%s2892_s10] sm:$0xff] }
 0x49c   : > { %v1843_v33 = vmul.f32 %v1766_v2, %v1507_v34 }
 0x49e   : > { %1859 = vxpose.xlu1.b32.start [1/16] (narrow) %v1843_v33, 64 }
 0x4a1   : > { %v1836_v45 = vpop.permute.xlu2 %1835 }
 0x4a2   : > { %v1781_v26 = vpop.permute.xlu1 %1780  ;;  %v1857_v46 = vmul.f32 %v1836_v45, %v1521_v43 }
 0x4a3   : > { %v1771_v10 = vpop.permute.xlu0 %1770  ;;  %v1846_v7 = vmul.f32 %v1781_v26, %v1510_v56 }
 0x4a4   : > { %v1844_v35 = vmul.f32 %v1771_v10, %v1508_v17 }
 0x4a6   : > { %1860 = vxpose.xlu1.b32.cont [2/16] (narrow) %v1844_v35, 64 }
 0x4a9   : > { %v1914_v34 = vpop.permute.xlu2 %1913 }
 0x4ac   : > { %v1801_v24 = vpop.permute.xlu1 %1800 }
 0x4ad   : > { %v1850_v44 = vmul.f32 %v1801_v24, %v1514_v39  ;;  %v2013_v39 = vld [vmem:[%s2892_s10 + $0x8] sm:$0xff] }
 0x4ae   : > { %1861 = vxpose.xlu1.b32.cont [3/16] (narrow) %v1845_v50, 64  ;;  %v1796_v0 = vpop.permute.xlu0 %1795  ;;  %v2014_v50 = vld [vmem:[%s2892_s10 + $0x10] sm:$0xff] }
 0x4af   : > { %v1849_v52 = vmul.f32 %v1796_v0, %v1513_v12  ;;  %v2018_v0 = vld [vmem:[%s2892_s10 + $0x30] sm:$0xff] }
 0x4b1   : > { %v1924_v33 = vpop.permute.xlu2 %1923 }
 0x4b4   : > { %v1816_v31 = vpop.permute.xlu1 %1815 }
 0x4b5   : > { %v1853_v21 = vmul.f32 %v1816_v31, %v1517_v16 }
 0x4b6   : > { %1862 = vxpose.xlu1.b32.cont [4/16] (narrow) %v1846_v7, 64  ;;  %v1811_v42 = vpop.permute.xlu0 %1810 }
 0x4b7   : > { %v1852_v60 = vmul.f32 %v1811_v42, %v1516_v25 }
 0x4b9   : > { %v1934_v10 = vpop.permute.xlu2 %1933 }
 0x4bc   : > { %v1831_v59 = vpop.permute.xlu1 %1830 }
 0x4bd   : > { %v1856_v19 = vmul.f32 %v1831_v59, %v1520_v49 }
 0x4be   : > { %1863 = vxpose.xlu1.b32.cont [5/16] (narrow) %v1847_v37, 64 }
 0x4c1   : > { %v1826_v41 = vpop.permute.xlu0 %1825  ;;  %v1944_v37 = vpop.permute.xlu2 %1943 }
 0x4c2   : > { %v1855_v48 = vmul.f32 %v1826_v41, %v1519_v27 }
 0x4c6   : > { %1864 = vxpose.xlu1.b32.cont [6/16] (narrow) %v1848_v14, 64 }
 0x4c9   : > { %v1841_v62 = vpop.permute.xlu0 %1840 }
 0x4ca   : > { %v1858_v40 = vmul.f32 %v1841_v62, %v1522_v47 }
 0x4ce   : > { %1865 = vxpose.xlu1.b32.cont [7/16] (narrow) %v1849_v52, 64 }
 0x4d1   : > { %v1919_v2 = vpop.permute.xlu0 %1918 }
 0x4d6   : > { %1866 = vxpose.xlu1.b32.cont [8/16] (narrow) %v1850_v44, 64 }
 0x4d9   : > { %v1929_v17 = vpop.permute.xlu0 %1928 }
 0x4de   : > { %1867 = vxpose.xlu1.b32.cont [9/16] (narrow) %v1851_v15, 64 }
 0x4e1   : > { %v1939_v9 = vpop.permute.xlu0 %1938 }
 0x4e6   : > { %1868 = vxpose.xlu1.b32.cont [10/16] (narrow) %v1852_v60, 64 }
 0x4e9   : > { %v1949_v16 = vpop.permute.xlu0 %1948 }
 0x4ee   : > { %1869 = vxpose.xlu1.b32.cont [11/16] (narrow) %v1853_v21, 64 }
 0x4f6   : > { %1870 = vxpose.xlu1.b32.cont [12/16] (narrow) %v1854_v51, 64  ;;  %v2019_v51 = vld [vmem:[%s2892_s10 + $0x38] sm:$0xff] }
 0x4fe   : > { %1871 = vxpose.xlu1.b32.cont [13/16] (narrow) %v1855_v48, 64 }
 0x506   : > { %1872 = vxpose.xlu1.b32.cont [14/16] (narrow) %v1856_v19, 64 }
 0x50e   : > { %1873 = vxpose.xlu1.b32.cont [15/16] (narrow) %v1857_v46, 64 }
 0x516   : > { %1874 = vxpose.xlu1.b32.end [16/16] (narrow) %v1858_v40, 64 }
 0x542   : > { %v1875_v38 = vpop.trf.xlu1 }
 0x54a   : > { %v1876_v30 = vpop.trf.xlu1 }
 0x54b   : > { %v1891_v57 = vpack.c.bf16 %v1876_v30, %v1875_v38 }
 0x552   : > { %v1877_v63 = vpop.trf.xlu1 }
 0x55a   : > { %v1878_v6 = vpop.trf.xlu1 }
 0x55b   : > { %v1892_v32 = vpack.c.bf16 %v1878_v6, %v1877_v63 }
 0x562   : > { %v1879_v61 = vpop.trf.xlu1 }
 0x56a   : > { %v1880_v18 = vpop.trf.xlu1 }
 0x56b   : > { %v1893_v29 = vpack.c.bf16 %v1880_v18, %v1879_v61 }
 0x572   : > { %v1881_v1 = vpop.trf.xlu1 }
 0x57a   : > { %v1882_v53 = vpop.trf.xlu1 }
 0x57b   : > { %v1894_v28 = vpack.c.bf16 %v1882_v53, %v1881_v1 }
 0x57d   : > { %1987 = vmatpush.bf16.msra.mxu0 %v1894_v28  ;;  %2414 = vmatpush.bf16.msra.mxu1 %v1894_v28 }
 0x57e   : > { %2415 = vmatpush.bf16.msra.mxu2 %v1894_v28  ;;  %2416 = vmatpush.bf16.msra.mxu3 %v1894_v28 }
 0x581   : > { %1988 = vmatpush.bf16.msra.mxu0 %v1893_v29  ;;  %2417 = vmatpush.bf16.msra.mxu1 %v1893_v29 }
 0x582   : > { %2418 = vmatpush.bf16.msra.mxu2 %v1893_v29  ;;  %2419 = vmatpush.bf16.msra.mxu3 %v1893_v29 }
 0x585   : > { %1989 = vmatpush.bf16.msra.mxu0 %v1892_v32  ;;  %2420 = vmatpush.bf16.msra.mxu1 %v1892_v32 }
 0x586   : > { %2421 = vmatpush.bf16.msra.mxu2 %v1892_v32  ;;  %2422 = vmatpush.bf16.msra.mxu3 %v1892_v32 }
 0x589   : > { %1990 = vmatpush.bf16.msra.mxu0 %v1891_v57  ;;  %2423 = vmatpush.bf16.msra.mxu1 %v1891_v57 }
 0x58a   : > { %2424 = vmatpush.bf16.msra.mxu2 %v1891_v57  ;;  %2425 = vmatpush.bf16.msra.mxu3 %v1891_v57 }
 0x58c   : > { %2358 = vmatmul.msk.bf16.vlgmr.msra.gmra.mxu0 %vm3805_vm4, %v2383_v58  ;;  %2359 = vmatmul.msk.bf16.vlgmr.msra.gmra.mxu1 %vm3806_vm13, %v2384_v13 }
 0x58d   : > { %2360 = vmatmul.msk.bf16.vlgmr.msra.gmra.mxu2 %vm3807_vm8, %v2385_v55  ;;  %2361 = vmatmul.msk.bf16.vlgmr.msra.gmra.mxu3 %vm3808_vm6, %v2386_v8 }
 0x609   : > { %v1992_v35 = vpop.f32.mrf.mxu0  ;;  %v1997_v22 = vpop.f32.mrf.mxu1 }
 0x60a   : > { %v1993_v56 = vadd.f32 %v1992_v35, %v1914_v34  ;;  %v1998_v26 = vadd.f32 %v1997_v22, %v1924_v33 }
 0x60c   : > { %v2020_v7 = vadd.f32 %v2012_v20, %v1993_v56  ;;  %v2022_v4 = vadd.f32 %v2014_v50, %v1998_v26 }
 0x60e   : > { %2028 = vst [vmem:[%s2894_s20] sm:$0xff] %v2020_v7 }
 0x60f   : > { %2030 = vst [vmem:[%s2894_s20 + $0x10] sm:$0xff] %v2022_v4 }
 0x610   : > { %v2002_v3 = vpop.f32.mrf.mxu2  ;;  %v2007_v14 = vpop.f32.mrf.mxu3 }
 0x611   : > { %v2003_v12 = vadd.f32 %v2002_v3, %v1934_v10  ;;  %v2008_v52 = vadd.f32 %v2007_v14, %v1944_v37  ;;  %v1994_v24 = vpop.f32.mrf.mxu0  ;;  %v1999_v44 = vpop.f32.mrf.mxu1 }
 0x612   : > { %v1995_v11 = vadd.f32 %v1994_v24, %v1919_v2  ;;  %v2000_v15 = vadd.f32 %v1999_v44, %v1929_v17 }
 0x613   : > { %v2024_v42 = vadd.f32 %v2016_v5, %v2003_v12  ;;  %v2026_v25 = vadd.f32 %v2018_v0, %v2008_v52 }
 0x614   : > { %v2021_v60 = vadd.f32 %v2013_v39, %v1995_v11  ;;  %v2023_v31 = vadd.f32 %v2015_v23, %v2000_v15 }
 0x615   : > { %2032 = vst [vmem:[%s2894_s20 + $0x20] sm:$0xff] %v2024_v42 }
 0x616   : > { %2034 = vst [vmem:[%s2894_s20 + $0x30] sm:$0xff] %v2026_v25 }
 0x617   : > { %2029 = vst [vmem:[%s2894_s20 + $0x8] sm:$0xff] %v2021_v60 }
 0x618   : > { %2031 = vst [vmem:[%s2894_s20 + $0x18] sm:$0xff] %v2023_v31  ;;  %v2004_v21 = vpop.f32.mrf.mxu2  ;;  %v2009_v54 = vpop.f32.mrf.mxu3 }
 0x619   : > { %v2005_v41 = vadd.f32 %v2004_v21, %v1939_v9  ;;  %v2010_v27 = vadd.f32 %v2009_v54, %v1949_v16 }
 0x61b   : > { %v2025_v48 = vadd.f32 %v2017_v36, %v2005_v41  ;;  %v2027_v59 = vadd.f32 %v2019_v51, %v2010_v27 }
 0x61d   : > { %2033 = vst [vmem:[%s2894_s20 + $0x28] sm:$0xff] %v2025_v48 }
 0x61e   : > { %2035 = vst [vmem:[%s2894_s20 + $0x38] sm:$0xff] %v2027_v59 }
 0x61f PF: > { %2042 = sbr.rel (!%p2838_p9) target bundleno = 1584 (0x630), region = 217  ;;  %s3809_s6 = sld [smem:[#allocation11_spill]] (%p2838_p9)  ;;  %v2089_v49 = vld [vmem:[%s2894_s20] sm:$0xff] (%p2838_p9)  ;;  %v2091_v19 = vld [vmem:[%s2894_s20 + $0x8] sm:$0xff] (%p2838_p9)  ;;  %v2093_v43 = vld [vmem:[%s2894_s20 + $0x10] sm:$0xff] (%p2838_p9) }
 0x620   : > { %s2363_s10 = sshll.u32 (%p2838_p9), %s2690_s27, 4  ;;  %s3810_s14 = sld [smem:[#allocation15_spill]] (%p2838_p9)  ;;  %v2095_v45 = vld [vmem:[%s2894_s20 + $0x18] sm:$0xff] (%p2838_p9)  ;;  %v2097_v46 = vld [vmem:[%s2894_s20 + $0x20] sm:$0xff] (%p2838_p9)  ;;  %v2101_v47 = vld [vmem:[%s2894_s20 + $0x30] sm:$0xff] (%p2838_p9) }
 0x624   : > { %v2099_v62 = vld [vmem:[%s2894_s20 + $0x28] sm:$0xff] }
 0x625   : > { %s2044_s26 = sadd.s32 %s3809_s6, %s2363_s10  ;;  %v2103_v40 = vld [vmem:[%s2894_s20 + $0x38] sm:$0xff] }
 0x626   : > { %s2364_s21 = sshll.u32 %s2044_s26, 3 }
 0x627   : > { %s2046_s17 = scalar_lea.vmem %s3810_s14, %s2364_s21 }
 0x628   : > { %2090 = vst [vmem:[%s2046_s17] sm:$0xff] %v2089_v49 }
 0x629   : > { %2092 = vst [vmem:[%s2046_s17 + $0x10] sm:$0xff] %v2091_v19 }
 0x62a   : > { %2094 = vst [vmem:[%s2046_s17 + $0x20] sm:$0xff] %v2093_v43 }
 0x62b   : > { %2096 = vst [vmem:[%s2046_s17 + $0x30] sm:$0xff] %v2095_v45 }
 0x62c   : > { %2098 = vst [vmem:[%s2046_s17 + $0x40] sm:$0xff] %v2097_v46 }
 0x62d   : > { %2100 = vst [vmem:[%s2046_s17 + $0x50] sm:$0xff] %v2099_v62 }
 0x62e   : > { %2102 = vst [vmem:[%s2046_s17 + $0x60] sm:$0xff] %v2101_v47 }
 0x62f   : > { %2104 = vst [vmem:[%s2046_s17 + $0x70] sm:$0xff] %v2103_v40 }
 0x630 PF: > { %s16_s7 = sadd.s32 1, %s2706_s7   ;;  %s3811_s13 = sld [smem:[#allocation12_spill]] }
 0x631   : > { %p13_p4 = scmp.ge.s32.totalorder %s16_s7, 10   ;;  %s3812_s12 = sld [smem:[#allocation13_spill]] }
 0x632   : > { %s3813_s18 = sld [smem:[#allocation14_spill]]  ;;  %s3814_s21 = smov %s2670_s22 }
 0x633   : > { %s3815_s22 = smov %s2849_s9  ;;  %s3816_s23 = smov %s2678_s24 }
 0x634   : > { %s3817_s24 = smov %s2846_s11  ;;  %s3818_s25 = smov %s2694_s28 }
 0x635   : > { %s3819_s26 = smov %s2698_s29  ;;  %s3820_s27 = smov %s2702_s30 }
 0x636   : > { %s3821_s28 = smov %s3811_s13  ;;  %15 = sbr.rel (!%p13_p4) target bundleno = 8 (0x8), region = 310 }
 0x637   : > { %s3822_s29 = smov %s3812_s12 }
 0x638   : > { %s3823_s30 = smov %s3813_s18 }

</bundles_post_ra>
